<compile_context>
chip_gen: v7x
topology: tpu7x:2x2x1
jax: 0.10.0
libtpu: 0.0.40
codegen_flags: <defaults>
</compile_context>

<pallas_src>
import jax
import jax.numpy as jnp
from jax.experimental import pallas as pl
from jax.experimental.pallas import tpu as pltpu

DOF = 3
L_DIM = sum(i + 1 for i in range(DOF))      # 6
HID = 30
IN_DIM = 3 * DOF                            # 9
BATCH = 8

# ---- fused first-layer (zb) row layout: zb = W1 @ x^T + b1, zb is (Z_ROWS, TB) ----
Z_MAUX = 0                  # rows   0: 30  mNet layer-1, qDDot part (+ folded bias)
Z_CAUX = 30                 # rows  30: 60  cNet layer-1, qDot part (+ bias)
AUX_ROWS = 64               # rows  60: 64  zero padding (8-aligned aux block)
Z_G = 64                    # rows  64: 94  gNet pre-activation (sin-destined)
Z_SIN = 128                 # rows 128:188  [z_ld | z_lo]               (sin-destined)
Z_COS = 188                 # rows 188:248  [z_ld | z_lo] with bias+pi/2 (cos via sin)
Z_ROWS = 256

# ---- packed-parameter buffer layout (row offsets are multiples of 8) ----
R_W1 = 0                    # (256, 9) fused first-layer weight; column 9 = bias column
R_WMC = 256                 # (64, 120) block-diagonal m/c layer-1 acting on trig rows
R_HEAD = R_WMC + 64         # (3, 64)  [m_w2 | c_w2 | 0]^T output head
R_GH = R_HEAD + 8           # (3, 30)  g_w2^T output head
R_BOUT = R_GH + 8           # (3, 1)   m_b2 + c_b2 + g_b2
P_ROWS = R_BOUT + 8         # 344
P_COLS = 128


def delan_sin_kernel(xt_ref, p_ref, ot_ref):
    xt = xt_ref[...]                                               # (9, TB)

    w1 = p_ref[R_W1:R_W1 + Z_ROWS, 0:IN_DIM]                       # (256, 9)
    b1 = p_ref[R_W1:R_W1 + Z_ROWS, IN_DIM:IN_DIM + 1]              # (256, 1)
    # One fused matmul over everything that reads x (feature-major):
    #   rows   0: 60  m/c auxiliary pre-activations (added after the layer-1 matmul)
    #   rows  64: 94  z_g
    #   rows 128:248  [z_ld | z_lo | z_ld + pi/2 | z_lo + pi/2]
    zb = jnp.dot(w1, xt, preferred_element_type=jnp.float32) + b1  # (256, TB)

    aux = zb[0:AUX_ROWS, :]                                        # (64, TB), rows 60:64 = 0
    sin_g = jnp.sin(zb[Z_G:Z_G + HID, :])                          # (30, TB)
    trig = jnp.sin(zb[Z_SIN:Z_SIN + 4 * HID, :])                   # (120,TB) = [sin|sin|cos|cos]

    w_mc = p_ref[R_WMC:R_WMC + AUX_ROWS, 0:4 * HID]                # (64, 120) block-diagonal
    hh = jax.nn.sigmoid(
        jnp.dot(w_mc, trig, preferred_element_type=jnp.float32) + aux)   # (64, TB)

    w_head = p_ref[R_HEAD:R_HEAD + DOF, 0:AUX_ROWS]                # (3, 64)
    g_head = p_ref[R_GH:R_GH + DOF, 0:HID]                         # (3, 30)
    b_out = p_ref[R_BOUT:R_BOUT + DOF, 0:1]                        # (3, 1)

    ot_ref[...] = (jnp.dot(w_head, hh, preferred_element_type=jnp.float32)
                   + jnp.dot(g_head, sin_g, preferred_element_type=jnp.float32)
                   + b_out)                                        # (3, TB)


def pack_params(params):
    """One-time host/XLA precompute: fold biases, the analytic Jacobian and all layer
    fusions into a single transposed (P_ROWS, P_COLS) f32 buffer for the kernel."""
    (ld_w1, ld_b1, ld_w2, ld_b2,
     lo_w1, lo_b1, lo_w2, lo_b2,
     g_w1, g_b1, g_w2, g_b2,
     m_w1, m_b1, m_w2, m_b2,
     c_w1, c_b1, c_w2, c_b2) = params

    half_pi = jnp.float32(jnp.pi / 2)

    # --- fused first layer: zb = W1 @ x^T + b1 (x = [q | qDot | qDDot]) ---
    w1 = jnp.zeros((Z_ROWS, IN_DIM), jnp.float32)
    b1 = jnp.zeros((Z_ROWS, 1), jnp.float32)

    # mNet layer-1: qDDot part; Ld/Lo output biases folded into the bias
    m_b1_fold = m_b1 + ld_b2 @ m_w1[0:DOF] + lo_b2 @ m_w1[DOF:L_DIM]          # (1, HID)
    w1 = w1.at[Z_MAUX:Z_MAUX + HID, 2 * DOF:3 * DOF].set(m_w1[L_DIM:L_DIM + DOF].T)
    b1 = b1.at[Z_MAUX:Z_MAUX + HID, 0].set(m_b1_fold[0])

    # cNet layer-1: qDot part
    w1 = w1.at[Z_CAUX:Z_CAUX + HID, DOF:2 * DOF].set(
        c_w1[L_DIM * DOF:L_DIM * DOF + DOF].T)
    b1 = b1.at[Z_CAUX:Z_CAUX + HID, 0].set(c_b1[0])

    # gNet first layer
    w1 = w1.at[Z_G:Z_G + HID, 0:DOF].set(g_w1.T)
    b1 = b1.at[Z_G:Z_G + HID, 0].set(g_b1[0])

    # Ld/Lo first layers: sin-destined copy, and cos-destined copy (bias + pi/2) so a
    # single sin sweep in the kernel produces [sin(z_ld)|sin(z_lo)|cos(z_ld)|cos(z_lo)].
    ldlo_w = jnp.concatenate([ld_w1, lo_w1], axis=1).T            # (60, DOF)
    ldlo_b = jnp.concatenate([ld_b1, lo_b1], axis=1)[0]           # (60,)
    w1 = w1.at[Z_SIN:Z_SIN + 2 * HID, 0:DOF].set(ldlo_w)
    b1 = b1.at[Z_SIN:Z_SIN + 2 * HID, 0].set(ldlo_b)
    w1 = w1.at[Z_COS:Z_COS + 2 * HID, 0:DOF].set(ldlo_w)
    b1 = b1.at[Z_COS:Z_COS + 2 * HID, 0].set(ldlo_b + half_pi)

    # --- fused m/c layer-1 acting on the 120-row trig block (block-diagonal) ---
    # mNet part acts on [sin(z_ld)|sin(z_lo)]; h_l is never materialized.
    w_m = jnp.concatenate([ld_w2 @ m_w1[0:DOF], lo_w2 @ m_w1[DOF:L_DIM]], axis=0)  # (60, 30)
    # cNet part acts on [cos(z_ld)|cos(z_lo)]: analytic Jacobian folded in.
    # M_ld[h, i*DOF+j] = ld_w2[h, i] * ld_w1[j, h]  (= d h_ld[i] / d q[j] weights)
    m_ld = (ld_w2[:, :, None] * ld_w1.T[:, None, :]).reshape(HID, DOF * DOF)
    m_lo = (lo_w2[:, :, None] * lo_w1.T[:, None, :]).reshape(HID, (L_DIM - DOF) * DOF)
    w_c = jnp.concatenate([m_ld @ c_w1[0:DOF * DOF],
                           m_lo @ c_w1[DOF * DOF:L_DIM * DOF]], axis=0)            # (60, 30)
    w_mc = jnp.zeros((AUX_ROWS, 4 * HID), jnp.float32)
    w_mc = w_mc.at[0:HID, 0:2 * HID].set(w_m.T)
    w_mc = w_mc.at[HID:2 * HID, 2 * HID:4 * HID].set(w_c.T)

    # --- output heads ---
    w_head = jnp.zeros((DOF, AUX_ROWS), jnp.float32)
    w_head = w_head.at[:, 0:HID].set(m_w2.T)
    w_head = w_head.at[:, HID:2 * HID].set(c_w2.T)
    b_out = (m_b2 + c_b2 + g_b2).T                                 # (DOF, 1)

    p = jnp.zeros((P_ROWS, P_COLS), jnp.float32)
    p = p.at[R_W1:R_W1 + Z_ROWS, 0:IN_DIM].set(w1)
    p = p.at[R_W1:R_W1 + Z_ROWS, IN_DIM:IN_DIM + 1].set(b1)
    p = p.at[R_WMC:R_WMC + AUX_ROWS, 0:4 * HID].set(w_mc)
    p = p.at[R_HEAD:R_HEAD + DOF, 0:AUX_ROWS].set(w_head)
    p = p.at[R_GH:R_GH + DOF, 0:HID].set(g_w2.T)
    p = p.at[R_BOUT:R_BOUT + DOF, 0:1].set(b_out)
    return p


def _default_tile_b(B):
    """Large tiles amortize the ~0.35us per-grid-step overhead; keep >= 2 grid steps
    when possible so both v7x TensorCores get work under 'parallel' semantics.
    Tile capped at 2048 to stay well under the default scoped-VMEM limit."""
    if B % 128 != 0:
        return B                      # single block; lane dim equals the full batch dim
    tile = 128
    for cand in (2048, 1024, 512, 256, 128):
        if B % cand == 0 and B // cand >= 2:
            tile = cand
            break
    return tile


def delan_sin_forward(x, packed_params, *, tile_b=None):
    B = x.shape[0]
    if tile_b is None:
        tile_b = _default_tile_b(B)
    assert B % tile_b == 0, "batch must be divisible by tile_b"

    xt = jnp.asarray(x, jnp.float32).T                 # (9, B): batch on the lane axis

    out_t = pl.pallas_call(
        delan_sin_kernel,
        out_shape=jax.ShapeDtypeStruct((DOF, B), jnp.float32),
        grid_spec=pltpu.PrefetchScalarGridSpec(
            num_scalar_prefetch=0,
            grid=(B // tile_b,),
            in_specs=[
                pl.BlockSpec((IN_DIM, tile_b), lambda i: (0, i)),
                pl.BlockSpec((P_ROWS, P_COLS), lambda i: (0, 0)),  # resident weights
            ],
            out_specs=pl.BlockSpec((DOF, tile_b), lambda i: (0, i)),
        ),
        compiler_params=pltpu.CompilerParams(
            dimension_semantics=("parallel",)),
    )(xt, packed_params)
    return out_t.T                                     # (B, DOF)


# ---------------- deterministic parameter construction (original layout) ----------------
def make_params(key):
    def mlp(key, n_in, n_out):
        k1, k2, k3, k4 = jax.random.split(key, 4)
        w1 = jax.random.normal(k1, (n_in, HID), jnp.float32) * 0.3
        b1 = jax.random.normal(k2, (1, HID), jnp.float32) * 0.1
        w2 = jax.random.normal(k3, (HID, n_out), jnp.float32) * 0.3
        b2 = jax.random.normal(k4, (1, n_out), jnp.float32) * 0.1
        return [w1, b1, w2, b2]

    keys = jax.random.split(key, 5)
    params = []
    params += mlp(keys[0], DOF, DOF)                       # LdNet
    params += mlp(keys[1], DOF, L_DIM - DOF)               # LoNet
    params += mlp(keys[2], DOF, DOF)                       # gNet
    params += mlp(keys[3], L_DIM + DOF, DOF)               # mNet
    params += mlp(keys[4], L_DIM * DOF + DOF, DOF)         # cNet
    return params


# ---------------- pure-JAX reference (autodiff Jacobian, un-fused params) ----------------
def reference_forward(x, params):
    (ld_w1, ld_b1, ld_w2, ld_b2,
     lo_w1, lo_b1, lo_w2, lo_b2,
     g_w1, g_b1, g_w2, g_b2,
     m_w1, m_b1, m_w2, m_b2,
     c_w1, c_b1, c_w2, c_b2) = params

    q, q_dot, q_ddot = x[:, :DOF], x[:, DOF:2 * DOF], x[:, 2 * DOF:3 * DOF]

    def h_l_fn(qi):  # qi: (DOF,)
        h_ld = jnp.sin(qi @ ld_w1 + ld_b1[0]) @ ld_w2 + ld_b2[0]
        h_lo = jnp.sin(qi @ lo_w1 + lo_b1[0]) @ lo_w2 + lo_b2[0]
        return jnp.concatenate([h_ld, h_lo])

    h_l = jax.vmap(h_l_fn)(q)                              # (B, L_DIM)
    jac = jax.vmap(jax.jacobian(h_l_fn))(q)                # (B, L_DIM, DOF)
    dl = jac.reshape(x.shape[0], L_DIM * DOF)

    m_in = jnp.concatenate([h_l, q_ddot], axis=1)
    m = jax.nn.sigmoid(m_in @ m_w1 + m_b1) @ m_w2 + m_b2

    c_in = jnp.concatenate([dl, q_dot], axis=1)
    c = jax.nn.sigmoid(c_in @ c_w1 + c_b1) @ c_w2 + c_b2

    g = jnp.sin(q @ g_w1 + g_b1) @ g_w2 + g_b2
    return m + c + g


if __name__ == "__main__":
    key = jax.random.PRNGKey(0)
    k_x, k_p, k_x2 = jax.random.split(key, 3)
    params = make_params(k_p)
    packed = pack_params(params)                 # one-time precompute

    # small-shape check (grid = 1)
    x = jax.random.normal(k_x, (BATCH, 3 * DOF), jnp.float32)
    out = jax.block_until_ready(delan_sin_forward(x, packed))
    ref = reference_forward(x, params)
    assert out.shape == (BATCH, DOF)
    assert jnp.allclose(out, ref, rtol=1e-4, atol=1e-4), "mismatch vs JAX reference (B=8)"

    # multi-block check (grid = 2 exercises the batch-tiled path / v7x parallelism)
    x2 = jax.random.normal(k_x2, (256, 3 * DOF), jnp.float32)
    out2 = jax.block_until_ready(delan_sin_forward(x2, packed))
    ref2 = reference_forward(x2, params)
    assert jnp.allclose(out2, ref2, rtol=1e-4, atol=1e-4), "mismatch vs JAX reference (B=256)"

    print("KERNEL_OK")
</pallas_src>

<mosaic_0001>
module attributes {stable_mosaic.version = 11 : i64} {
  func.func @delan_sin_kernel(%arg0: i32, %arg1: memref<9x8xf32, #tpu.memory_space<vmem>>, %arg2: memref<344x128xf32, #tpu.memory_space<vmem>>, %arg3: memref<3x8xf32, #tpu.memory_space<vmem>>) attributes {dimension_semantics = [#tpu.dimension_semantics<parallel>], iteration_bounds = array<i64: 1>, scalar_prefetch = 0 : i64, scratch_operands = 0 : i64, tpu.core_type = #tpu.core_type<tc>, window_params = [{transform_indices = @transform_0, window_bounds = array<i64: 9, 8>}, {pipeline_mode = #tpu.pipeline_mode<synchronous>, transform_indices = @transform_1, window_bounds = array<i64: 344, 128>}, {transform_indices = @transform_2, window_bounds = array<i64: 3, 8>}]} {
    %c0 = arith.constant 0 : index
    %c0_0 = arith.constant 0 : index
    %0 = vector.load %arg1[%c0, %c0_0] : memref<9x8xf32, #tpu.memory_space<vmem>>, vector<9x8xf32>
    %c0_1 = arith.constant 0 : index
    %c0_2 = arith.constant 0 : index
    %1 = vector.load %arg2[%c0_1, %c0_2] : memref<344x128xf32, #tpu.memory_space<vmem>>, vector<256x9xf32>
    %c0_3 = arith.constant 0 : index
    %c9 = arith.constant 9 : index
    %2 = vector.load %arg2[%c0_3, %c9] : memref<344x128xf32, #tpu.memory_space<vmem>>, vector<256x1xf32>
    %cst = arith.constant dense<0.000000e+00> : vector<256x8xf32>
    %3 = tpu.matmul %1, %0, %cst {dimension_numbers = #tpu.dot_dimension_numbers<[1], [0], [0], [1], [0, 0, 1, 1], [], []>} : vector<256x9xf32>, vector<9x8xf32>, vector<256x8xf32> -> vector<256x8xf32>
    %4 = vector.broadcast %2 : vector<256x1xf32> to vector<256x8xf32>
    %5 = arith.addf %3, %4 : vector<256x8xf32>
    %6 = vector.extract_strided_slice %5 {offsets = [0, 0], sizes = [64, 8], strides = [1, 1]} : vector<256x8xf32> to vector<64x8xf32>
    %7 = vector.extract_strided_slice %5 {offsets = [64, 0], sizes = [30, 8], strides = [1, 1]} : vector<256x8xf32> to vector<30x8xf32>
    %8 = math.sin %7 : vector<30x8xf32>
    %9 = vector.extract_strided_slice %5 {offsets = [128, 0], sizes = [120, 8], strides = [1, 1]} : vector<256x8xf32> to vector<120x8xf32>
    %10 = math.sin %9 : vector<120x8xf32>
    %c256 = arith.constant 256 : index
    %c0_4 = arith.constant 0 : index
    %11 = vector.load %arg2[%c256, %c0_4] : memref<344x128xf32, #tpu.memory_space<vmem>>, vector<64x120xf32>
    %cst_5 = arith.constant dense<0.000000e+00> : vector<64x8xf32>
    %12 = tpu.matmul %11, %10, %cst_5 {dimension_numbers = #tpu.dot_dimension_numbers<[1], [0], [0], [1], [0, 0, 1, 1], [], []>} : vector<64x120xf32>, vector<120x8xf32>, vector<64x8xf32> -> vector<64x8xf32>
    %13 = arith.addf %12, %6 : vector<64x8xf32>
    %14 = arith.negf %13 : vector<64x8xf32>
    %15 = math.exp %14 : vector<64x8xf32>
    %cst_6 = arith.constant 1.000000e+00 : f32
    %16 = vector.broadcast %cst_6 : f32 to vector<64x8xf32>
    %17 = arith.addf %16, %15 : vector<64x8xf32>
    %18 = arith.divf %16, %17 : vector<64x8xf32>
    %c320 = arith.constant 320 : index
    %c0_7 = arith.constant 0 : index
    %19 = vector.load %arg2[%c320, %c0_7] : memref<344x128xf32, #tpu.memory_space<vmem>>, vector<3x64xf32>
    %c328 = arith.constant 328 : index
    %c0_8 = arith.constant 0 : index
    %20 = vector.load %arg2[%c328, %c0_8] : memref<344x128xf32, #tpu.memory_space<vmem>>, vector<3x30xf32>
    %c336 = arith.constant 336 : index
    %c0_9 = arith.constant 0 : index
    %21 = vector.load %arg2[%c336, %c0_9] : memref<344x128xf32, #tpu.memory_space<vmem>>, vector<3x1xf32>
    %cst_10 = arith.constant dense<0.000000e+00> : vector<3x8xf32>
    %22 = tpu.matmul %19, %18, %cst_10 {dimension_numbers = #tpu.dot_dimension_numbers<[1], [0], [0], [1], [0, 0, 1, 1], [], []>} : vector<3x64xf32>, vector<64x8xf32>, vector<3x8xf32> -> vector<3x8xf32>
    %cst_11 = arith.constant dense<0.000000e+00> : vector<3x8xf32>
    %23 = tpu.matmul %20, %8, %cst_11 {dimension_numbers = #tpu.dot_dimension_numbers<[1], [0], [0], [1], [0, 0, 1, 1], [], []>} : vector<3x30xf32>, vector<30x8xf32>, vector<3x8xf32> -> vector<3x8xf32>
    %24 = arith.addf %22, %23 : vector<3x8xf32>
    %25 = vector.broadcast %21 : vector<3x1xf32> to vector<3x8xf32>
    %26 = arith.addf %24, %25 : vector<3x8xf32>
    %c0_12 = arith.constant 0 : index
    %c0_13 = arith.constant 0 : index
    %27 = vector.load %arg3[%c0_12, %c0_13] : memref<3x8xf32, #tpu.memory_space<vmem>>, vector<3x8xf32>
    tpu.vector_store %arg3[%c0_12, %c0_13], %26 {strides = array<i32>} : memref<3x8xf32, #tpu.memory_space<vmem>>, vector<3x8xf32>,
    return
  }
  func.func @transform_0(%arg0: i32) -> (i32, i32) {
    %c0_i32 = arith.constant 0 : i32
    %c0_i32_0 = arith.constant 0 : i32
    return %c0_i32, %arg0 : i32, i32
  }
  func.func @transform_1(%arg0: i32) -> (i32, i32) {
    %c0_i32 = arith.constant 0 : i32
    %c0_i32_0 = arith.constant 0 : i32
    %c0_i32_1 = arith.constant 0 : i32
    return %c0_i32, %c0_i32_0 : i32, i32
  }
  func.func @transform_2(%arg0: i32) -> (i32, i32) {
    %c0_i32 = arith.constant 0 : i32
    %c0_i32_0 = arith.constant 0 : i32
    return %c0_i32, %arg0 : i32, i32
  }
}

</mosaic_0001>

<bundles_post_ra>
// kernel: tpu_custom_call.1
= control target key start
LH: loop header
LB: loop body
LE: loop exit
PB: predicated region body
PF: predicated region fallthrough
CT: control target
= control target key end

     0   :  { %7 = vsyncpa [#allocation3], 0  ;;  %s5378_s0 = inlined_call_operand.vmem [shape: f32[9,8], index: 0, kind: input, shape index: {}]   ;;  %s5379_s1 = inlined_call_operand.hbm [shape: f32[344,128], index: 1, kind: input, shape index: {}]   ;;  %s5380_s2 = inlined_call_operand.hbm [shape: f32[3,8], index: 2, kind: output, shape index: {}]  }
   0x1   :  { %8 = vsyncpa [#allocation4], 0  ;;  %s3490_s9 = smov [#allocation2]   ;;  %s3442_s13 = scalar_lea.hbm %s5379_s1, 5504 }
   0x2   :  { %s16_s10 = sshll.u32 %s3490_s9, 4  ;;  %p3443_p0 = scmp.ne.s32.totalorder %s5379_s1, %s3442_s13  ;;  %s17_s10 = int_to_ptr.vmem [resolvable:$true] %s16_s10 }
   0x3   :  { %p3446_p1 = scmp.lt.u32.totalorder %s3442_s13, %s5379_s1 }
   0x5   :  { %p3448_p2 = pnand %p3446_p1, %p3443_p0 }
   0x7   :  { %3451 = shalt.err (!%p3448_p2)
}
   0x8   :  { %s3452_s18 = scalar_lea.vmem %s17_s10, 5504  ;;  %p3457_p4 = scmp.lt.s32.totalorder %s17_s10, %s17_s10 }
   0x9   :  { %p3453_p3 = scmp.ne.s32.totalorder %s17_s10, %s3452_s18  ;;  %p3458_p5 = scmp.lt.s32.totalorder %s3452_s18, %s3452_s18 }
   0xb   :  { %p3459_p6 = por %p3458_p5, %p3457_p4 }
   0xd   :  { %p3460_p7 = pnand %p3459_p6, %p3453_p3 }
   0xf   :  { %3463 = shalt.err (!%p3460_p7)
}
  0x10   :  { %s3491_s19 = smov 128   ;;  %s3492_s20 = smov 8  }
  0x11   :  { %22 = dma.hbm_to_vmem [thread:$0]  %s5379_s1, 5504, %s17_s10, [#allocation3], %s3491_s19, %s3491_s19, %s3492_s20  }
  0x12   :  { %3486 = dma.done.wait [#allocation3], 5504  }
  0x13   :  { %3487 = vsyncadd [#allocation3], 4294961792  ;;  %v3493_v0 = vmov 9   ;;  %vm280_vm0 = vcmask 1040384   ;;  %vm5470_vm1 = vcmask 72704   ;;  %vm5424_vm2 = vmmov 1  }
  0x14   :  { %3330 = vset.pattern.permute.xlu0 %v3493_v0  ;;  %3331 = vset.pattern.permute.xlu1 %v3493_v0  ;;  %vm3168_vm3 = vmpackc.low %vm280_vm0, %vm5424_vm2  ;;  %v26_v1 = vld [vmem:[%s5378_s0] sm:$0xff]  ;;  %v27_v2 = vld [vmem:[%s5378_s0 + $0x8] sm:$0x1]  ;;  %s3505_s0 = smov [#allocation5]  }
  0x15   :  { %v3540_v3 = vld [vmem:[#allocation2] sm:$0xff]  ;;  %v3167_v4 = vpack.c.bf16 %v27_v2, %v26_v1  ;;  %v3545_v6 = vld [vmem:[#allocation2 + $0x8] sm:$0xff]  ;;  %v46_v8 = vld [vmem:[#allocation2 + $0x90] sm:$0xff]  ;;  %s2835_s1 = sshll.u32 %s3505_s0, 4  ;;  %s2836_s1 = int_to_ptr.vmem [resolvable:$true] %s2835_s1 }
  0x16   :  { %3047 = vmatprep.mubr.msk.f32.mxu0 %vm5470_vm1, %v3540_v3  ;;  %v44_v5 = vld [vmem:[#allocation2 + $0x80] sm:$0xff]  ;;  %v45_v7 = vld [vmem:[#allocation2 + $0x88] sm:$0xff]  ;;  %v3547_v9 = vld [vmem:[#allocation2 + $0x10] sm:$0xff]  ;;  %148 = vperm.xlu1 %3331, %v46_v8   ;;  %s3464_s27 = scalar_lea.vmem %s2836_s1, 64  ;;  %p3469_p9 = scmp.lt.s32.totalorder %s2836_s1, %s2836_s1 }
  0x17   :  { %3071 = vmatprep.mubr.msk.f32.mxu1 %vm5470_vm1, %v44_v5  ;;  %138 = vperm.xlu0 %3330, %v44_v5   ;;  %v31_v10 = vld [vmem:[#allocation2 + $0x18] sm:$0xff]  ;;  %v32_v12 = vld [vmem:[#allocation2 + $0x20] sm:$0xff]  ;;  %v33_v14 = vld [vmem:[#allocation2 + $0x28] sm:$0xff]  ;;  %p3465_p8 = scmp.ne.s32.totalorder %s2836_s1, %s3464_s27  ;;  %p3470_p10 = scmp.lt.s32.totalorder %s3464_s27, %s3464_s27 }
  0x18   :  { %3169 = vmatprep.subr.msk.bf16.mxu0 %vm3168_vm3, %v3167_v4  ;;  %3220 = vmatprep.subr.msk.bf16.mxu1 %vm3168_vm3, %v3167_v4  ;;  %v47_v11 = vld [vmem:[#allocation2 + $0x98] sm:$0xff]  ;;  %v48_v13 = vld [vmem:[#allocation2 + $0xa0] sm:$0xff]  ;;  %v49_v15 = vld [vmem:[#allocation2 + $0xa8] sm:$0xff] }
  0x19   :  { %3172 = vmatpush3.bf16.msk.msra.mxu0 %vm3168_vm3, %v3167_v4  ;;  %3221 = vmatpush3.bf16.msk.msra.mxu1 %vm3168_vm3, %v3167_v4  ;;  %v34_v16 = vld [vmem:[#allocation2 + $0x30] sm:$0xff]  ;;  %v35_v18 = vld [vmem:[#allocation2 + $0x38] sm:$0xff]  ;;  %v36_v20 = vld [vmem:[#allocation2 + $0x40] sm:$0xff]  ;;  %p3471_p11 = por %p3470_p10, %p3469_p9 }
  0x1a   :  { %153 = vperm.xlu1 %3331, %v47_v11   ;;  %v50_v17 = vld [vmem:[#allocation2 + $0xb0] sm:$0xff]  ;;  %v51_v19 = vld [vmem:[#allocation2 + $0xb8] sm:$0xff]  ;;  %v52_v21 = vld [vmem:[#allocation2 + $0xc0] sm:$0xff] }
  0x1b   :  { %143 = vperm.xlu0 %3330, %v45_v7   ;;  %v37_v22 = vld [vmem:[#allocation2 + $0x48] sm:$0xff]  ;;  %v38_v24 = vld [vmem:[#allocation2 + $0x50] sm:$0xff]  ;;  %v39_v26 = vld [vmem:[#allocation2 + $0x58] sm:$0xff]  ;;  %p3472_p12 = pnand %p3471_p11, %p3465_p8 }
  0x1c   :  { %3048 = vmatmul.mubr.msk.f32.vlgmr.msra.gmra.mrb[0].mxu0 %vm5470_vm1, %v3545_v6  ;;  %3072 = vmatmul.mubr.msk.f32.vlgmr.msra.gmra.mrb[0].mxu1 %vm5470_vm1, %v45_v7  ;;  %v53_v23 = vld [vmem:[#allocation2 + $0xc8] sm:$0xff]  ;;  %v54_v25 = vld [vmem:[#allocation2 + $0xd0] sm:$0xff]  ;;  %v55_v27 = vld [vmem:[#allocation2 + $0xd8] sm:$0xff] }
  0x1d   :  { %3050 = vmatprep.mubr.msk.f32.mxu0 %vm5470_vm1, %v3547_v9  ;;  %3074 = vmatprep.mubr.msk.f32.mxu1 %vm5470_vm1, %v46_v8  ;;  %v56_v28 = vld [vmem:[#allocation2 + $0xe0] sm:$0xff]  ;;  %v57_v29 = vld [vmem:[#allocation2 + $0xe8] sm:$0xff]  ;;  %v58_v30 = vld [vmem:[#allocation2 + $0xf0] sm:$0xff] }
  0x1e   :  { %163 = vperm.xlu1 %3331, %v49_v15   ;;  %v59_v31 = vld [vmem:[#allocation2 + $0xf8] sm:$0xff] }
  0x1f   :  { %158 = vperm.xlu0 %3330, %v48_v13  }
  0x20   :  { %3051 = vmatmul.mubr.msk.f32.gmra.mrb[2].mxu0 %vm5470_vm1, %v31_v10  ;;  %3075 = vmatmul.mubr.msk.f32.gmra.mrb[2].mxu1 %vm5470_vm1, %v47_v11 }
  0x21   :  { %3053 = vmatprep.mubr.msk.f32.mxu0 %vm5470_vm1, %v32_v12  ;;  %3077 = vmatprep.mubr.msk.f32.mxu1 %vm5470_vm1, %v48_v13  ;;  %v5394_v13 = vmov 683565275  }
  0x22   :  { %173 = vperm.xlu1 %3331, %v51_v19  }
  0x23   :  { %168 = vperm.xlu0 %3330, %v50_v17  }
  0x24   :  { %3054 = vmatmul.mubr.msk.f32.gmra.mrb[4].mxu0 %vm5470_vm1, %v33_v14  ;;  %3078 = vmatmul.mubr.msk.f32.gmra.mrb[4].mxu1 %vm5470_vm1, %v49_v15  ;;  %v5392_v15 = vmov 2475754826  }
  0x25   :  { %3056 = vmatprep.mubr.msk.f32.mxu0 %vm5470_vm1, %v34_v16  ;;  %3080 = vmatprep.mubr.msk.f32.mxu1 %vm5470_vm1, %v50_v17 }
  0x26   :  { %183 = vperm.xlu1 %3331, %v53_v23  }
  0x27   :  { %178 = vperm.xlu0 %3330, %v52_v21  }
  0x28   :  { %3057 = vmatmul.mubr.msk.f32.gmra.mrb[6].mxu0 %vm5470_vm1, %v35_v18  ;;  %3081 = vmatmul.mubr.msk.f32.gmra.mrb[6].mxu1 %vm5470_vm1, %v51_v19 }
  0x29   :  { %3059 = vmatprep.mubr.msk.f32.mxu0 %vm5470_vm1, %v36_v20  ;;  %3083 = vmatprep.mubr.msk.f32.mxu1 %vm5470_vm1, %v52_v21 }
  0x2a   :  { %193 = vperm.xlu1 %3331, %v55_v27  }
  0x2b   :  { %188 = vperm.xlu0 %3330, %v54_v25  }
  0x2c   :  { %3060 = vmatmul.mubr.msk.f32.gmra.mrb[8].mxu0 %vm5470_vm1, %v37_v22  ;;  %3084 = vmatmul.mubr.msk.f32.gmra.mrb[8].mxu1 %vm5470_vm1, %v53_v23 }
  0x2d   :  { %3062 = vmatprep.mubr.msk.f32.mxu0 %vm5470_vm1, %v38_v24  ;;  %3086 = vmatprep.mubr.msk.f32.mxu1 %vm5470_vm1, %v54_v25 }
  0x2e   :  { %203 = vperm.xlu1 %3331, %v57_v29  }
  0x2f   :  { %198 = vperm.xlu0 %3330, %v56_v28  }
  0x30   :  { %3063 = vmatmul.mubr.msk.f32.gmra.mrb[10].mxu0 %vm5470_vm1, %v39_v26  ;;  %3087 = vmatmul.mubr.msk.f32.gmra.mrb[10].mxu1 %vm5470_vm1, %v55_v27 }
  0x31   :  { %3089 = vmatprep.mubr.msk.f32.mxu1 %vm5470_vm1, %v56_v28 }
  0x32   :  { %102 = vperm.xlu1 %3331, %v36_v20   ;;  %v5385_v20 = vmov 2102212464  }
  0x33   :  { %208 = vperm.xlu0 %3330, %v58_v30  }
  0x34   :  { %3090 = vmatmul.mubr.msk.f32.gmra.mrb[12].mxu1 %vm5470_vm1, %v57_v29 }
  0x35   :  { %3092 = vmatprep.mubr.msk.f32.mxu1 %vm5470_vm1, %v58_v30  ;;  %v5390_v30 = vmov 1326507024  }
  0x36   :  { %112 = vperm.xlu1 %3331, %v38_v24  }
  0x37   :  { %107 = vperm.xlu0 %3330, %v37_v22   ;;  %v5398_v22 = vmov 920167782  }
  0x38   :  { %3093 = vmatmul.mubr.msk.f32.gmra.mrb[14].mxu1 %vm5470_vm1, %v59_v31 }
  0x3a   :  { %62 = vperm.xlu1 %3331, %v3540_v3  }
  0x3b   :  { %117 = vperm.xlu0 %3330, %v39_v26  }
  0x3e   :  { %72 = vperm.xlu1 %3331, %v3547_v9  }
  0x3f   :  { %67 = vperm.xlu0 %3330, %v3545_v6  }
  0x42   :  { %82 = vperm.xlu1 %3331, %v32_v12  }
  0x43   :  { %77 = vperm.xlu0 %3330, %v31_v10  }
  0x46   :  { %92 = vperm.xlu1 %3331, %v34_v16  }
  0x47   :  { %87 = vperm.xlu0 %3330, %v33_v14  }
  0x4b   :  { %97 = vperm.xlu0 %3330, %v35_v18   ;;  %v5387_v18 = vmov 2131351028  }
  0x95   :  { %v149_v33 = vpop.permute.xlu1 %148 }
  0x96   :  { %v139_v32 = vpop.permute.xlu0 %138 }
  0x99   :  { %v154_v41 = vpop.permute.xlu1 %153 }
  0x9a   :  { %v144_v34 = vpop.permute.xlu0 %143 }
  0xef   :  { %v3073_v35 = vpop.f32.mrb[0].mxu1 }
  0xf0   :  { %v3580_v36 = vadd.f32 %v3073_v35, %v144_v34  ;;  %v426_v37 = vpop.f32.mrb[1].mxu1 }
  0xf1   :  { %v3582_v38 = vadd.f32 %v426_v37, %v139_v32 }
  0xf2   :  { %5494 = vst [vmem:[#allocation8_spill] sm:$0xff] %v3580_v36  ;;  %v1024_v39 = vand.u32 2147483647, %v3580_v36  ;;  %v1027_v40 = vand.u32 2139095040, %v3580_v36 }
  0xf3   :  { %v920_v42 = vand.u32 2147483647, %v3582_v38  ;;  %v923_v43 = vand.u32 2139095040, %v3582_v38  ;;  %v3076_v44 = vpop.f32.mrb[2].mxu1 }
  0xf4   :  { %v1028_v45 = vshrl.u32 %v1027_v40, 23  ;;  %v1031_v46 = vand.u32 8388607, %v1024_v39  ;;  %v3590_v47 = vadd.f32 %v3076_v44, %v154_v41  ;;  %v436_v48 = vpop.f32.mrb[3].mxu1 }
  0xf5   :  { %v924_v49 = vshrl.u32 %v923_v43, 23  ;;  %v927_v50 = vand.u32 8388607, %v920_v42  ;;  %v3604_v1 = vadd.f32 %v436_v48, %v149_v33 }
  0xf6   :  { %5495 = vst [vmem:[#allocation9_spill] sm:$0xff] %v3590_v47  ;;  %v2897_v51 = vadd.s32 4294967169, %v1028_v45  ;;  %v5384_v52 = vand.u32 2147483647, %v3590_v47  ;;  %v1235_v54 = vand.u32 2139095040, %v3590_v47  ;;  %v1032_v56 = vor.u32 8388608, %v1031_v46 }
  0xf7   :  { %v2893_v53 = vadd.s32 4294967169, %v924_v49  ;;  %v3596_v55 = vpop.f32.mrb[4].mxu1  ;;  %v928_v58 = vor.u32 8388608, %v927_v50  ;;  %5496 = vst [vmem:[#allocation10_spill] sm:$0xff] %v3604_v1 }
  0xf8   :  { %v1034_v57 = vadd.s32 1, %v2897_v51  ;;  %v1236_v60 = vshrl.u32 %v1235_v54, 23  ;;  %v3600_v61 = vand.u32 8388607, %v5384_v52  ;;  %v3602_v62 = vpop.f32.mrb[5].mxu1  ;;  %v3608_v5 = vshll.u32 %v1032_v56, 8 }
  0xf9   :  { %v930_v59 = vadd.s32 1, %v2893_v53  ;;  %v3616_v10 = vshll.u32 %v928_v58, 8 }
  0xfa   :  { %vm1035_vm4 = vcmp.gt.s32.totalorder %v1034_v57, 0  ;;  %v2905_v0 = vadd.s32 4294967169, %v1236_v60  ;;  %v1240_v11 = vor.u32 8388608, %v3600_v61 }
  0xfb   :  { %v1036_v63 = vsel %vm1035_vm4, %v1034_v57, 0  ;;  %vm931_vm5 = vcmp.gt.s32.totalorder %v930_v59, 0  ;;  %v3606_v2 = vpop.f32.mrb[6].mxu1 }
  0xfc   :  { %v1037_v3 = vshrl.u32 %v1036_v63, 5  ;;  %v1038_v4 = vand.u32 31, %v1036_v63  ;;  %v932_v6 = vsel %vm931_vm5, %v930_v59, 0  ;;  %v3610_v7 = vpop.f32.mrb[7].mxu1  ;;  %v3621_v17 = vadd.s32 1, %v2905_v0 }
  0xfd   :  { %v3612_v8 = vshrl.u32 %v932_v6, 5  ;;  %v3614_v9 = vand.u32 31, %v932_v6 }
  0xfe   :  { %v1039_v12 = vsub.s32 32, %v1038_v4  ;;  %v1041_v14 = vshll.u32 %v5394_v13, %v1038_v4  ;;  %v1044_v16 = vshll.u32 %v5392_v15, %v1038_v4  ;;  %v1047_v19 = vshll.u32 %v5387_v18, %v1038_v4 }
  0xff   :  { %v1050_v21 = vshll.u32 %v5385_v20, %v1038_v4  ;;  %v1053_v23 = vshll.u32 %v5398_v22, %v1038_v4  ;;  %vm1056_vm6 = vcmp.lt.s32.totalorder %v1037_v3, 1  ;;  %v3626_v24 = vpop.f32.mrb[8].mxu0  ;;  %vm1057_vm7 = vcmp.lt.s32.totalorder %v1037_v3, 2 }
 0x100   :  { %v1042_v25 = vshrl.u32 %v5392_v15, %v1039_v12  ;;  %v1045_v26 = vshrl.u32 %v5387_v18, %v1039_v12  ;;  %v1048_v27 = vshrl.u32 %v5385_v20, %v1039_v12  ;;  %v1040_v28 = vshrl.u32 %v5394_v13, %v1039_v12 }
 0x101   :  { %v1051_v29 = vshrl.u32 %v5398_v22, %v1039_v12  ;;  %v1054_v31 = vshrl.u32 %v5390_v30, %v1039_v12  ;;  %vm1058_vm8 = vcmp.lt.s32.totalorder %v1037_v3, 3  ;;  %v935_v35 = vsub.s32 32, %v3614_v9 }
 0x102   :  { %v1043_v32 = vor.u32 %v1042_v25, %v1041_v14  ;;  %v1046_v33 = vor.u32 %v1045_v26, %v1044_v16  ;;  %v1049_v34 = vor.u32 %v1048_v27, %v1047_v19  ;;  %vm1059_vm9 = vcmp.lt.s32.totalorder %v1037_v3, 4 }
 0x103   :  { %v1052_v37 = vor.u32 %v1051_v29, %v1050_v21  ;;  %v1055_v40 = vor.u32 %v1054_v31, %v1053_v23  ;;  %v937_v41 = vshll.u32 %v5394_v13, %v3614_v9  ;;  %v940_v51 = vshll.u32 %v5392_v15, %v3614_v9 }
 0x104   :  { %v1060_v43 = vsel %vm1056_vm6, %v1040_v28, %v1043_v32  ;;  %v1061_v44 = vsel %vm1059_vm9, %v1049_v34, 2102212464  ;;  %v1064_v45 = vsel %vm1056_vm6, %v1043_v32, %v1046_v33  ;;  %v1068_v46 = vsel %vm1056_vm6, %v1046_v33, %v1049_v34 }
 0x105   :  { %v1062_v48 = vsel %vm1058_vm8, %v1046_v33, %v1061_v44  ;;  %v1065_v49 = vsel %vm1059_vm9, %v1052_v37, 920167782  ;;  %v1069_v50 = vsel %vm1059_vm9, %v1055_v40, 1326507024  ;;  %v936_v56 = vshrl.u32 %v5394_v13, %v935_v35 }
 0x106   :  { %v1066_v53 = vsel %vm1058_vm8, %v1049_v34, %v1065_v49  ;;  %v1070_v54 = vsel %vm1058_vm8, %v1052_v37, %v1069_v50  ;;  %v938_v57 = vshrl.u32 %v5392_v15, %v935_v35  ;;  %v1063_v58 = vsel %vm1057_vm7, %v1060_v43, %v1062_v48 }
 0x107   :  { %v1067_v59 = vsel %vm1057_vm7, %v1064_v45, %v1066_v53  ;;  %v1071_v60 = vsel %vm1057_vm7, %v1068_v46, %v1070_v54  ;;  %v941_v63 = vshrl.u32 %v5387_v18, %v935_v35  ;;  %v943_v19 = vshll.u32 %v5387_v18, %v3614_v9 }
 0x108   :  { %v3652_v0 = vmul.u32.u64.low %v3608_v5, %v1071_v60  ;;  %v3653_v4 = vmul.u32.u64.high %v3608_v5, %v1071_v60, %v3652_v0  ;;  %v3656_v6 = vmul.u32.u64.low %v3608_v5, %v1067_v59  ;;  %v3657_v12 = vmul.u32.u64.high %v3608_v5, %v1067_v59, %v3656_v6 }
 0x109   :  { %v939_v14 = vor.u32 %v938_v57, %v937_v41  ;;  %v942_v16 = vor.u32 %v941_v63, %v940_v51  ;;  %v944_v21 = vshrl.u32 %v5385_v20, %v935_v35  ;;  %v1079_v3 = vmul.u32 %v3608_v5, %v1063_v58 }
 0x10a   :  { %v946_v23 = vshll.u32 %v5385_v20, %v3614_v9  ;;  %v947_v25 = vshrl.u32 %v5398_v22, %v935_v35  ;;  %v950_v26 = vshrl.u32 %v5390_v30, %v935_v35  ;;  %v949_v28 = vshll.u32 %v5398_v22, %v3614_v9 }
 0x10b   :  { %v945_v27 = vor.u32 %v944_v21, %v943_v19  ;;  %vm952_vm10 = vcmp.lt.s32.totalorder %v3612_v8, 1  ;;  %vm953_vm11 = vcmp.lt.s32.totalorder %v3612_v8, 2  ;;  %vm1081_vm12 = vc.u32 %v3653_v4, %v3656_v6 }
 0x10c   :  { %v1082_v5 = vadd.s32 1, %v3657_v12  ;;  %v948_v29 = vor.u32 %v947_v25, %v946_v23  ;;  %vm954_vm13 = vcmp.lt.s32.totalorder %v3612_v8, 3  ;;  %v951_v31 = vor.u32 %v950_v26, %v949_v28 }
 0x10d   :  { %vm955_vm14 = vcmp.lt.s32.totalorder %v3612_v8, 4  ;;  %v956_v32 = vsel %vm952_vm10, %v936_v56, %v939_v14  ;;  %v960_v33 = vsel %vm952_vm10, %v939_v14, %v942_v16  ;;  %v964_v37 = vsel %vm952_vm10, %v942_v16, %v945_v27 }
 0x10e   :  { %v1083_v34 = vsel %vm1081_vm12, %v1082_v5, %v3657_v12  ;;  %v957_v9 = vsel %vm955_vm14, %v945_v27, 2102212464  ;;  %v961_v35 = vsel %vm955_vm14, %v948_v29, 920167782  ;;  %v965_v44 = vsel %vm955_vm14, %v951_v31, 1326507024 }
 0x10f   :  { %v1084_v40 = vadd.s32 %v1083_v34, %v1079_v3  ;;  %v958_v41 = vsel %vm954_vm13, %v942_v16, %v957_v9  ;;  %v962_v43 = vsel %vm954_vm13, %v945_v27, %v961_v35  ;;  %v966_v46 = vsel %vm954_vm13, %v948_v29, %v965_v44 }
 0x110   :  { %v963_v45 = vsel %vm953_vm11, %v960_v33, %v962_v43  ;;  %vm1243_vm15 = vcmp.gt.s32.totalorder %v3621_v17, 0  ;;  %v1131_v48 = vand.u32 2139095040, %v3604_v1  ;;  %v967_v50 = vsel %vm953_vm11, %v964_v37, %v966_v46 }
 0x111   :  { %v1085_v49 = vadd.s32 536870912, %v1084_v40  ;;  %v3685_v51 = vmul.u32.u64.low %v3616_v10, %v963_v45  ;;  %v3686_v53 = vmul.u32.u64.high %v3616_v10, %v963_v45, %v3685_v51  ;;  %v959_v54 = vsel %vm953_vm11, %v956_v32, %v958_v41 }
 0x112   :  { %v3692_v56 = vmul.u32.u64.low %v3616_v10, %v967_v50  ;;  %v3693_v57 = vmul.u32.u64.high %v3616_v10, %v967_v50, %v3692_v56  ;;  %v1244_v58 = vsel %vm1243_vm15, %v3621_v17, 0  ;;  %v3700_v63 = vshll.u32 %v1240_v11, 8 }
 0x113   :  { %v3696_v59 = vshrl.u32 %v1085_v49, 30  ;;  %v1246_v60 = vand.u32 31, %v1244_v58  ;;  %v5383_v0 = vand.u32 2147483647, %v3604_v1  ;;  %v1132_v12 = vshrl.u32 %v1131_v48, 23 }
 0x114   :  { %v975_v8 = vmul.u32 %v3616_v10, %v959_v54  ;;  %v978_v16 = vadd.s32 1, %v3686_v53  ;;  %vm977_vm0 = vc.u32 %v3693_v57, %v3685_v51  ;;  %v1245_v17 = vshrl.u32 %v1244_v58, 5  ;;  %v3715_v10 = vpop.f32.mrb[8].mxu1 }
 0x115   :  { %5497 = vst [vmem:[#allocation11_spill] sm:$0xff] %v3696_v59  ;;  %v1087_v14 = vshll.u32 %v3696_v59, 30  ;;  %v1247_v19 = vsub.s32 32, %v1246_v60  ;;  %v1249_v21 = vshll.u32 %v5394_v13, %v1246_v60  ;;  %v1252_v61 = vshll.u32 %v5392_v15, %v1246_v60 }
 0x116   :  { %v979_v3 = vsel %vm977_vm0, %v978_v16, %v3686_v53  ;;  %v1255_v25 = vshll.u32 %v5387_v18, %v1246_v60  ;;  %v1258_v5 = vshll.u32 %v5385_v20, %v1246_v60  ;;  %v1261_v33 = vshll.u32 %v5398_v22, %v1246_v60 }
 0x117   :  { %v3710_v11 = vsub.s32 %v1084_v40, %v1087_v14  ;;  %v1250_v23 = vshrl.u32 %v5392_v15, %v1247_v19  ;;  %v980_v26 = vadd.s32 %v979_v3, %v975_v8  ;;  %v1253_v27 = vshrl.u32 %v5387_v18, %v1247_v19 }
 0x118   :  { %v1256_v28 = vshrl.u32 %v5385_v20, %v1247_v19  ;;  %v1259_v32 = vshrl.u32 %v5398_v22, %v1247_v19  ;;  %v1262_v37 = vshrl.u32 %v5390_v30, %v1247_v19  ;;  %v1248_v41 = vshrl.u32 %v5394_v13, %v1247_v19 }
 0x119   :  { %v1090_v29 = vsub.s32 0, %v3710_v11  ;;  %v1251_v31 = vor.u32 %v1250_v23, %v1249_v21  ;;  %v981_v34 = vadd.s32 536870912, %v980_v26  ;;  %v1254_v9 = vor.u32 %v1253_v27, %v1252_v61 }
 0x11a   :  { %v1257_v35 = vor.u32 %v1256_v28, %v1255_v25  ;;  %v1260_v43 = vor.u32 %v1259_v32, %v1258_v5  ;;  %v2901_v44 = vadd.s32 4294967169, %v1132_v12  ;;  %v1263_v46 = vor.u32 %v1262_v37, %v1261_v33 }
 0x11b   :  { %v2898_v40 = vmin.u32 %v1090_v29, %v3710_v11  ;;  %v3726_v45 = vshrl.u32 %v981_v34, 30  ;;  %vm1264_vm3 = vcmp.lt.s32.totalorder %v1245_v17, 1  ;;  %vm1267_vm4 = vcmp.lt.s32.totalorder %v1245_v17, 4 }
 0x11c   :  { %vm1265_vm5 = vcmp.lt.s32.totalorder %v1245_v17, 2  ;;  %v1269_v49 = vsel %vm1267_vm4, %v1257_v35, 2102212464  ;;  %v1272_v50 = vsel %vm1264_vm3, %v1251_v31, %v1254_v9  ;;  %vm1266_vm6 = vcmp.lt.s32.totalorder %v1245_v17, 3 }
 0x11d   :  { %v1092_v48 = vclz %v2898_v40  ;;  %v983_v53 = vshll.u32 %v3726_v45, 30  ;;  %v1273_v54 = vsel %vm1267_vm4, %v1260_v43, 920167782  ;;  %v1276_v56 = vsel %vm1264_vm3, %v1254_v9, %v1257_v35 }
 0x11e   :  { %v1268_v60 = vsel %vm1264_vm3, %v1248_v41, %v1251_v31  ;;  %v1274_v14 = vsel %vm1266_vm6, %v1257_v35, %v1273_v54  ;;  %v1277_v8 = vsel %vm1267_vm4, %v1263_v46, 1326507024  ;;  %v1270_v12 = vsel %vm1266_vm6, %v1254_v9, %v1269_v49  ;;  %v3751_v41 = vpop.f32.mrb[9].mxu0  ;;  %v164_v54 = vpop.permute.xlu1 %163 }
 0x11f   :  { %v2899_v58 = vadd.s32 4294967294, %v1092_v48  ;;  %v3729_v16 = vsub.s32 %v980_v26, %v983_v53  ;;  %v1275_v19 = vsel %vm1265_vm5, %v1272_v50, %v1274_v14  ;;  %v1278_v21 = vsel %vm1266_vm6, %v1260_v43, %v1277_v8 }
 0x120   :  { %v1279_v61 = vsel %vm1265_vm5, %v1276_v56, %v1278_v21  ;;  %v3734_v3 = vmul.u32.u64.low %v3700_v63, %v1275_v19  ;;  %v3735_v23 = vmul.u32.u64.high %v3700_v63, %v1275_v19, %v3734_v3  ;;  %v1271_v29 = vsel %vm1265_vm5, %v1268_v60, %v1270_v12 }
 0x121   :  { %vm2900_vm7 = vcmp.lt.s32.totalorder %v2899_v58, 0  ;;  %v986_v27 = vsub.s32 0, %v3729_v16  ;;  %v3740_v28 = vmul.u32.u64.low %v3700_v63, %v1279_v61  ;;  %v3741_v5 = vmul.u32.u64.high %v3700_v63, %v1279_v61, %v3740_v28 }
 0x122   :  { %v1095_v25 = vsel %vm2900_vm7, 0, %v2899_v58  ;;  %v1138_v31 = vadd.s32 1, %v2901_v44  ;;  %v1135_v33 = vand.u32 8388607, %v5383_v0  ;;  %v1290_v9 = vadd.s32 1, %v3735_v23 }
 0x123   :  { %v1100_v26 = vsub.s32 4294967266, %v1095_v25  ;;  %v2894_v32 = vmin.u32 %v986_v27, %v3729_v16  ;;  %v1096_v34 = vsub.s32 32, %v1095_v25  ;;  %v1287_v37 = vmul.u32 %v3700_v63, %v1271_v29 }
 0x124   :  { %vm1139_vm8 = vcmp.gt.s32.totalorder %v1138_v31, 0  ;;  %vm1289_vm9 = vc.u32 %v3741_v5, %v3734_v3  ;;  %v1080_v17 = vadd.s32 %v3656_v6, %v3653_v4  ;;  %v1136_v49 = vor.u32 8388608, %v1135_v33 }
 0x125   :  { %v988_v35 = vclz %v2894_v32  ;;  %v1140_v40 = vsel %vm1139_vm8, %v1138_v31, 0  ;;  %v1101_v43 = vadd.s32 127, %v1100_v26  ;;  %v1291_v44 = vsel %vm1289_vm9, %v1290_v9, %v3735_v23 }
 0x126   :  { %v1292_v48 = vadd.s32 %v1291_v44, %v1287_v37  ;;  %v1142_v50 = vand.u32 31, %v1140_v40  ;;  %v1098_v53 = vshrl.u32 %v1080_v17, %v1096_v34  ;;  %v1097_v58 = vshll.u32 %v3710_v11, %v1095_v25 }
 0x127   :  { %v2895_v46 = vadd.s32 4294967294, %v988_v35  ;;  %v1102_v60 = vshll.u32 %v1101_v43, 23  ;;  %v3758_v14 = vadd.f32 %v3596_v55, %v164_v54  ;;  %v976_v4 = vadd.s32 %v3685_v51, %v3693_v57 }
 0x128   :  { %v1293_v63 = vadd.s32 536870912, %v1292_v48  ;;  %v1143_v56 = vsub.s32 32, %v1142_v50  ;;  %v3766_v12 = vshll.u32 %v1136_v49, 8  ;;  %v1099_v19 = vor.u32 %v1098_v53, %v1097_v58 }
 0x129   :  { %vm2896_vm10 = vcmp.lt.s32.totalorder %v2895_v46, 0  ;;  %5498 = vst [vmem:[#allocation12_spill] sm:$0xff] %v3758_v14  ;;  %v1141_v21 = vshrl.u32 %v1140_v40, 5  ;;  %v1145_v55 = vshll.u32 %v5394_v13, %v1142_v50  ;;  %v1148_v25 = vshll.u32 %v5392_v15, %v1142_v50 }
 0x12a   :  { %v3762_v6 = vsel %vm2896_vm10, 0, %v2895_v46  ;;  %v3764_v8 = vshrl.u32 %v1293_v63, 30  ;;  %v1146_v61 = vshrl.u32 %v5392_v15, %v1143_v56  ;;  %v1149_v23 = vshrl.u32 %v5387_v18, %v1143_v56 }
 0x12b   :  { %v1152_v51 = vshrl.u32 %v5385_v20, %v1143_v56  ;;  %v1103_v57 = vor.u32 4788187, %v1102_v60  ;;  %v996_v27 = vsub.s32 4294967266, %v3762_v6  ;;  %v1151_v28 = vshll.u32 %v5387_v18, %v1142_v50 }
 0x12c   :  { %5499 = vst [vmem:[#allocation13_spill] sm:$0xff] %v3764_v8  ;;  %v1295_v11 = vshll.u32 %v3764_v8, 30  ;;  %v5382_v26 = vand.u32 2147483647, %v3758_v14  ;;  %v1147_v31 = vor.u32 %v1146_v61, %v1145_v55  ;;  %v1150_v32 = vor.u32 %v1149_v23, %v1148_v25 }
 0x12d   :  { %v1154_v33 = vshll.u32 %v5385_v20, %v1142_v50  ;;  %v1153_v34 = vor.u32 %v1152_v51, %v1151_v28  ;;  %v1155_v9 = vshrl.u32 %v5398_v22, %v1143_v56  ;;  %v1157_v35 = vshll.u32 %v5398_v22, %v1142_v50  ;;  %v3793_v28 = vpop.f32.mrb[9].mxu1 }
 0x12e   :  { %v3777_v29 = vsub.s32 %v1292_v48, %v1295_v11  ;;  %v1158_v37 = vshrl.u32 %v5390_v30, %v1143_v56  ;;  %v1106_v40 = vcvt.s32.f32 %v1099_v19  ;;  %v992_v17 = vsub.s32 32, %v3762_v6 }
 0x12f   :  { %vm1160_vm11 = vcmp.lt.s32.totalorder %v1141_v21, 1  ;;  %v997_v44 = vadd.s32 127, %v996_v27  ;;  %v1156_v46 = vor.u32 %v1155_v9, %v1154_v33  ;;  %vm1161_vm12 = vcmp.lt.s32.totalorder %v1141_v21, 2 }
 0x130   :  { %v1298_v43 = vsub.s32 0, %v3777_v29  ;;  %v1159_v48 = vor.u32 %v1158_v37, %v1157_v35  ;;  %v1104_v49 = vand.u32 2147483647, %v1103_v57  ;;  %v993_v53 = vshll.u32 %v3729_v16, %v3762_v6 }
 0x131   :  { %vm1163_vm13 = vcmp.lt.s32.totalorder %v1141_v21, 4  ;;  %vm1162_vm14 = vcmp.lt.s32.totalorder %v1141_v21, 3  ;;  %v1168_v63 = vsel %vm1160_vm11, %v1147_v31, %v1150_v32  ;;  %v994_v60 = vshrl.u32 %v976_v4, %v992_v17 }
 0x132   :  { %v2906_v54 = vmin.u32 %v1298_v43, %v3777_v29  ;;  %v1165_v50 = vsel %vm1163_vm13, %v1153_v34, 2102212464  ;;  %v1169_v58 = vsel %vm1163_vm13, %v1156_v46, 920167782  ;;  %v1144_v61 = vshrl.u32 %v5394_v13, %v1143_v56 }
 0x133   :  { %v1170_v23 = vsel %vm1162_vm14, %v1153_v34, %v1169_v58  ;;  %v998_v11 = vshll.u32 %v997_v44, 23  ;;  %v1172_v25 = vsel %vm1160_vm11, %v1150_v32, %v1153_v34  ;;  %v1173_v51 = vsel %vm1163_vm13, %v1159_v48, 1326507024 }
 0x134   :  { %v1300_v19 = vclz %v2906_v54  ;;  %v1171_v55 = vsel %vm1161_vm12, %v1168_v63, %v1170_v23  ;;  %v1164_v6 = vsel %vm1160_vm11, %v1144_v61, %v1147_v31  ;;  %v1166_v57 = vsel %vm1162_vm14, %v1150_v32, %v1165_v50  ;;  %v159_v61 = vpop.permute.xlu0 %158 }
 0x135   :  { %v1174_v27 = vsel %vm1162_vm14, %v1156_v46, %v1173_v51  ;;  %v3797_v4 = vmul.u32.u64.low %v3766_v12, %v1171_v55  ;;  %v3798_v9 = vmul.u32.u64.high %v3766_v12, %v1171_v55, %v3797_v4  ;;  %v1443_v56 = vand.u32 2139095040, %v3758_v14 }
 0x136   :  { %v2907_v16 = vadd.s32 4294967294, %v1300_v19  ;;  %v1175_v33 = vsel %vm1161_vm12, %v1172_v25, %v1174_v27  ;;  %v1107_v35 = vmul.f32 %v1106_v40, %v1104_v49  ;;  %v999_v31 = vor.u32 4788187, %v998_v11 }
 0x137   :  { %v3803_v34 = vmul.u32.u64.low %v3766_v12, %v1175_v33  ;;  %v3804_v37 = vmul.u32.u64.high %v3766_v12, %v1175_v33, %v3803_v34  ;;  %v1167_v17 = vsel %vm1161_vm12, %v1164_v6, %v1166_v57  ;;  %v1444_v43 = vshrl.u32 %v1443_v56, 23 }
 0x138   :  { %vm2908_vm15 = vcmp.lt.s32.totalorder %v2907_v16, 0  ;;  %v1447_v46 = vand.u32 8388607, %v5382_v26  ;;  %v995_v48 = vor.u32 %v994_v60, %v993_v53  ;;  %v1186_v54 = vadd.s32 1, %v3798_v9 }
 0x139   :  { %v1303_v32 = vsel %vm2908_vm15, 0, %v2907_v16  ;;  %v2913_v50 = vadd.s32 4294967169, %v1444_v43  ;;  %v1183_v40 = vmul.u32 %v3766_v12, %v1167_v17  ;;  %vm1185_vm0 = vc.u32 %v3804_v37, %v3797_v4 }
 0x13a   :  { %v1308_v44 = vsub.s32 4294967266, %v1303_v32  ;;  %v1108_v49 = vxor.u32 2147483648, %v1107_v35  ;;  %v1000_v58 = vand.u32 2147483647, %v999_v31  ;;  %v1187_v21 = vsel %vm1185_vm0, %v1186_v54, %v3798_v9 }
 0x13b   :  { %v1450_v19 = vadd.s32 1, %v2913_v50  ;;  %v1304_v23 = vsub.s32 32, %v1303_v32  ;;  %v1188_v11 = vadd.s32 %v1187_v21, %v1183_v40  ;;  %v1448_v55 = vor.u32 8388608, %v1447_v46 }
 0x13c   :  { %v1309_v63 = vadd.s32 127, %v1308_v44  ;;  %v1002_v25 = vcvt.s32.f32 %v995_v48  ;;  %v3815_v60 = vadd.f32 %v3602_v62, %v159_v61  ;;  %vm5445_vm4 = vcmp.lt.s32.totalorder %v3580_v36, 0 }
 0x13d   :  { %vm1451_vm3 = vcmp.gt.s32.totalorder %v1450_v19, 0  ;;  %v1288_v12 = vadd.s32 %v3734_v3, %v3741_v5  ;;  %v1189_v51 = vadd.s32 536870912, %v1188_v11  ;;  %v1109_v6 = vsel %vm5445_vm4, %v1108_v49, %v1107_v35 }
 0x13e   :  { %v1310_v53 = vshll.u32 %v1309_v63, 23  ;;  %5500 = vst [vmem:[#allocation14_spill] sm:$0xff] %v3815_v60  ;;  %v1452_v16 = vsel %vm1451_vm3, %v1450_v19, 0  ;;  %v3822_v57 = vmul.f32 %v1002_v25, %v1000_v58  ;;  %v1305_v33 = vshll.u32 %v3777_v29, %v1303_v32 }
 0x13f   :  { %v1454_v27 = vand.u32 31, %v1452_v16  ;;  %v1306_v9 = vshrl.u32 %v1288_v12, %v1304_v23  ;;  %v3825_v56 = vshrl.u32 %v1189_v51, 30  ;;  %v3827_v62 = vshll.u32 %v1448_v55, 8 }
 0x140   :  { %v3829_v34 = vor.u32 4788187, %v1310_v53  ;;  %v5381_v3 = vand.u32 2147483647, %v3815_v60  ;;  %v1339_v5 = vand.u32 2139095040, %v3815_v60  ;;  %v1453_v35 = vshrl.u32 %v1452_v16, 5 }
 0x141   :  { %5501 = vst [vmem:[#allocation15_spill] sm:$0xff] %v3825_v56  ;;  %v1455_v31 = vsub.s32 32, %v1454_v27  ;;  %v1191_v17 = vshll.u32 %v3825_v56, 30  ;;  %v1457_v43 = vshll.u32 %v5394_v13, %v1454_v27  ;;  %v1460_v44 = vshll.u32 %v5392_v15, %v1454_v27 }
 0x142   :  { %v1463_v46 = vshll.u32 %v5387_v18, %v1454_v27  ;;  %vm3842_vm5 = vcmp.le.f32.partialorder %v1024_v39, 0.7853982  ;;  %v5502_v54 = vmov 0  ;;  %v1466_v63 = vshll.u32 %v5385_v20, %v1454_v27 }
 0x143   :  { %v1458_v29 = vshrl.u32 %v5392_v15, %v1455_v31  ;;  %v1461_v32 = vshrl.u32 %v5387_v18, %v1455_v31  ;;  %v1464_v48 = vshrl.u32 %v5385_v20, %v1455_v31  ;;  %v5503_v54 = vsel %vm3842_vm5, 4294967295, %v5502_v54 }
 0x144   :  { %5504 = vst [vmem:[#allocation16_spill] sm:$0xff] %v5503_v54  ;;  %v3846_v50 = vsub.s32 %v1188_v11, %v1191_v17  ;;  %v1467_v40 = vshrl.u32 %v5398_v22, %v1455_v31  ;;  %v1470_v49 = vshrl.u32 %v5390_v30, %v1455_v31  ;;  %v1469_v61 = vshll.u32 %v5398_v22, %v1454_v27 }
 0x145   :  { %v1459_v58 = vor.u32 %v1458_v29, %v1457_v43  ;;  %v1462_v21 = vor.u32 %v1461_v32, %v1460_v44  ;;  %v1465_v19 = vor.u32 %v1464_v48, %v1463_v46  ;;  %v1307_v23 = vor.u32 %v1306_v9, %v1305_v33  ;;  %v174_v48 = vpop.permute.xlu1 %173 }
 0x146   :  { %v1194_v55 = vsub.s32 0, %v3846_v50  ;;  %v1468_v39 = vor.u32 %v1467_v40, %v1466_v63  ;;  %v1343_v25 = vand.u32 8388607, %v5381_v3  ;;  %v1312_v11 = vand.u32 2147483647, %v3829_v34 }
 0x147   :  { %v1471_v53 = vor.u32 %v1470_v49, %v1469_v61  ;;  %vm1475_vm6 = vcmp.lt.s32.totalorder %v1453_v35, 4  ;;  %v1340_v12 = vshrl.u32 %v1339_v5, 23  ;;  %v1456_v16 = vshrl.u32 %v5394_v13, %v1455_v31 }
 0x148   :  { %v2902_v51 = vmin.u32 %v1194_v55, %v3846_v50  ;;  %vm1472_vm7 = vcmp.lt.s32.totalorder %v1453_v35, 1  ;;  %v1477_v17 = vsel %vm1475_vm6, %v1465_v19, 2102212464  ;;  %vm1473_vm8 = vcmp.lt.s32.totalorder %v1453_v35, 2 }
 0x149   :  { %vm1474_vm9 = vcmp.lt.s32.totalorder %v1453_v35, 3  ;;  %v1480_v27 = vsel %vm1472_vm7, %v1459_v58, %v1462_v21  ;;  %v1481_v33 = vsel %vm1475_vm6, %v1468_v39, 920167782  ;;  %v1476_v43 = vsel %vm1472_vm7, %v1456_v16, %v1459_v58 }
 0x14a   :  { %v1196_v9 = vclz %v2902_v51  ;;  %v1482_v44 = vsel %vm1474_vm9, %v1465_v19, %v1481_v33  ;;  %v1484_v29 = vsel %vm1472_vm7, %v1462_v21, %v1465_v19  ;;  %v1478_v34 = vsel %vm1474_vm9, %v1462_v21, %v1477_v17 }
 0x14b   :  { %v1483_v32 = vsel %vm1473_vm8, %v1480_v27, %v1482_v44  ;;  %v1485_v5 = vsel %vm1475_vm6, %v1471_v53, 1326507024  ;;  %v2909_v46 = vadd.s32 4294967169, %v1340_v12  ;;  %v3870_v58 = vsel %vm3842_vm5, %v3580_v36, %v1109_v6  ;;  %v3880_v12 = vpop.f32.mrb[10].mxu0 }
 0x14c   :  { %v2903_v31 = vadd.s32 4294967294, %v1196_v9  ;;  %v1486_v63 = vsel %vm1474_vm9, %v1468_v39, %v1485_v5  ;;  %v3863_v40 = vmul.u32.u64.low %v3827_v62, %v1483_v32  ;;  %v3864_v49 = vmul.u32.u64.high %v3827_v62, %v1483_v32, %v3863_v40 }
 0x14d   :  { %v1487_v21 = vsel %vm1473_vm8, %v1484_v29, %v1486_v63  ;;  %v1346_v19 = vadd.s32 1, %v2909_v46  ;;  %v3874_v61 = vadd.f32 %v3606_v2, %v174_v48  ;;  %v1314_v55 = vcvt.s32.f32 %v1307_v23 }
 0x14e   :  { %vm2904_vm10 = vcmp.lt.s32.totalorder %v2903_v31, 0  ;;  %v3877_v39 = vmul.u32.u64.low %v3827_v62, %v1487_v21  ;;  %v3878_v53 = vmul.u32.u64.high %v3827_v62, %v1487_v21, %v3877_v39  ;;  %v1004_v51 = vxor.u32 2147483648, %v3822_v57 }
 0x14f   :  { %5505 = vst [vmem:[#allocation17_spill] sm:$0xff] %v3874_v61  ;;  %v3883_v16 = vsel %vm2904_vm10, 0, %v2903_v31  ;;  %v1479_v6 = vsel %vm1473_vm8, %v1476_v43, %v1478_v34  ;;  %vm1347_vm11 = vcmp.gt.s32.totalorder %v1346_v19, 0  ;;  %v3886_v17 = vmul.f32 %v1314_v55, %v1312_v11 }
 0x150   :  { %v1498_v2 = vadd.s32 1, %v3864_v49  ;;  %v1344_v27 = vor.u32 8388608, %v1343_v25  ;;  %v1204_v23 = vsub.s32 4294967266, %v3883_v16  ;;  %v1348_v33 = vsel %vm1347_vm11, %v1346_v19, 0 }
 0x151   :  { %v1651_v9 = vand.u32 2139095040, %v3874_v61  ;;  %3334 = vcosq.f32 %v3870_v58  ;;  %vm5459_vm12 = vcmp.lt.s32.totalorder %v3582_v38, 0  ;;  %v1495_v44 = vmul.u32 %v3827_v62, %v1479_v6 }
 0x152   :  { %vm1497_vm13 = vc.u32 %v3878_v53, %v3863_v40  ;;  %v3899_v35 = vsel %vm5459_vm12, %v1004_v51, %v3822_v57  ;;  %v1184_v25 = vadd.s32 %v3797_v4, %v3804_v37  ;;  %v1350_v43 = vand.u32 31, %v1348_v33 }
 0x153   :  { %v1499_v11 = vsel %vm1497_vm13, %v1498_v2, %v3864_v49  ;;  %v1316_v29 = vxor.u32 2147483648, %v3886_v17  ;;  %v3905_v32 = vshll.u32 %v1344_v27, 8  ;;  %v5389_v62 = vand.u32 2147483647, %v3874_v61 }
 0x154   :  { %v1500_v34 = vadd.s32 %v1499_v11, %v1495_v44  ;;  %v1200_v5 = vsub.s32 32, %v3883_v16  ;;  %v1205_v46 = vadd.s32 127, %v1204_v23  ;;  %v1351_v48 = vsub.s32 32, %v1350_v43  ;;  %v169_v44 = vpop.permute.xlu0 %168 }
 0x155   :  { %v1652_v31 = vshrl.u32 %v1651_v9, 23  ;;  %v1349_v63 = vshrl.u32 %v1348_v33, 5  ;;  %v1353_v21 = vshll.u32 %v5394_v13, %v1350_v43  ;;  %v1356_v4 = vshll.u32 %v5392_v15, %v1350_v43 }
 0x156   :  { %v1501_v57 = vadd.s32 536870912, %v1500_v34  ;;  %v1354_v37 = vshrl.u32 %v5392_v15, %v1351_v48  ;;  %v1357_v49 = vshrl.u32 %v5387_v18, %v1351_v48  ;;  %v1359_v19 = vshll.u32 %v5387_v18, %v1350_v43 }
 0x157   :  { %v1360_v55 = vshrl.u32 %v5385_v20, %v1351_v48  ;;  %v1362_v51 = vshll.u32 %v5385_v20, %v1350_v43  ;;  %v1363_v6 = vshrl.u32 %v5398_v22, %v1351_v48  ;;  %v1365_v2 = vshll.u32 %v5398_v22, %v1350_v43 }
 0x158   :  { %v3915_v39 = vshrl.u32 %v1501_v57, 30  ;;  %v1355_v27 = vor.u32 %v1354_v37, %v1353_v21  ;;  %v1358_v23 = vor.u32 %v1357_v49, %v1356_v4  ;;  %v1366_v9 = vshrl.u32 %v5390_v30, %v1351_v48 }
 0x159   :  { %v1361_v33 = vor.u32 %v1360_v55, %v1359_v19  ;;  %v1201_v11 = vshll.u32 %v3846_v50, %v3883_v16  ;;  %v1364_v26 = vor.u32 %v1363_v6, %v1362_v51  ;;  %v1655_v57 = vand.u32 8388607, %v5389_v62 }
 0x15a   :  { %5506 = vst [vmem:[#allocation18_spill] sm:$0xff] %v3915_v39  ;;  %v1503_v3 = vshll.u32 %v3915_v39, 30  ;;  %v1202_v0 = vshrl.u32 %v1184_v25, %v1200_v5  ;;  %v1206_v52 = vshll.u32 %v1205_v46, 23  ;;  %v1367_v20 = vor.u32 %v1366_v9, %v1365_v2 }
 0x15b   :  { %v2921_v18 = vadd.s32 4294967169, %v1652_v31  ;;  %v3926_v43 = vpop.eup %3334  ;;  %vm3930_vm14 = vcmp.le.f32.partialorder %v920_v42, 0.7853982  ;;  %vm5438_vm15 = vcmp.lt.s32.totalorder %v3590_v47, 0  ;;  %v1352_v16 = vshrl.u32 %v5394_v13, %v1351_v48 }
 0x15c   :  { %5507 = vst [vmem:[#allocation19_spill] sm:$0xff] %v3926_v43  ;;  %v3935_v50 = vsub.s32 %v1500_v34, %v1503_v3  ;;  %vm1368_vm0 = vcmp.lt.s32.totalorder %v1349_v63, 1  ;;  %vm1371_vm3 = vcmp.lt.s32.totalorder %v1349_v63, 4  ;;  %vm1370_vm6 = vcmp.lt.s32.totalorder %v1349_v63, 3  ;;  %v3940_v3 = vpop.permute.xlu0 %178 }
 0x15d   :  { %v1373_v25 = vsel %vm1371_vm3, %v1361_v33, 2102212464  ;;  %v1376_v5 = vsel %vm1368_vm0, %v1355_v27, %v1358_v23  ;;  %v1377_v46 = vsel %vm1371_vm3, %v1364_v26, 920167782  ;;  %vm1369_vm7 = vcmp.lt.s32.totalorder %v1349_v63, 2 }
 0x15e   :  { %v1506_v31 = vsub.s32 0, %v3935_v50  ;;  %v1378_v4 = vsel %vm1370_vm6, %v1361_v33, %v1377_v46  ;;  %v1380_v42 = vsel %vm1368_vm0, %v1358_v23, %v1361_v33  ;;  %v1207_v37 = vor.u32 4788187, %v1206_v52 }
 0x15f   :  { %v1372_v49 = vsel %vm1368_vm0, %v1352_v16, %v1355_v27  ;;  %v1379_v19 = vsel %vm1369_vm7, %v1376_v5, %v1378_v4  ;;  %v1381_v55 = vsel %vm1371_vm3, %v1367_v20, 1326507024  ;;  %v1374_v48 = vsel %vm1370_vm6, %v1358_v23, %v1373_v25  ;;  %v3953_v20 = vpop.f32.mrb[10].mxu1 }
 0x160   :  { %v2914_v34 = vmin.u32 %v1506_v31, %v3935_v50  ;;  %v1382_v51 = vsel %vm1370_vm6, %v1364_v26, %v1381_v55  ;;  %v1658_v6 = vadd.s32 1, %v2921_v18  ;;  %v1203_v2 = vor.u32 %v1202_v0, %v1201_v11 }
 0x161   :  { %v1383_v9 = vsel %vm1369_vm7, %v1380_v42, %v1382_v51  ;;  %v3945_v62 = vmul.u32.u64.low %v3905_v32, %v1379_v19  ;;  %v3946_v30 = vmul.u32.u64.high %v3905_v32, %v1379_v19, %v3945_v62  ;;  %3336 = vsinq.f32 %v3870_v58 }
 0x162   :  { %v1508_v52 = vclz %v2914_v34  ;;  %v3950_v27 = vmul.u32.u64.low %v3905_v32, %v1383_v9  ;;  %v3951_v33 = vmul.u32.u64.high %v3905_v32, %v1383_v9, %v3950_v27  ;;  %vm1659_vm8 = vcmp.gt.s32.totalorder %v1658_v6, 0 }
 0x163   :  { %v1375_v18 = vsel %vm1369_vm7, %v1372_v49, %v1374_v48  ;;  %v1660_v0 = vsel %vm1659_vm8, %v1658_v6, 0  ;;  %v3958_v26 = vadd.f32 %v3610_v7, %v169_v44  ;;  %v1208_v23 = vand.u32 2147483647, %v1207_v37  ;;  %v3974_v44 = vpop.permute.xlu0 %188 }
 0x164   :  { %v2915_v11 = vadd.s32 4294967294, %v1508_v52  ;;  %v1656_v16 = vor.u32 8388608, %v1655_v57  ;;  %v1662_v25 = vand.u32 31, %v1660_v0  ;;  %v3964_v5 = vsel %vm3930_vm14, %v3582_v38, %v3899_v35 }
 0x165   :  { %5510 = vst [vmem:[#allocation20_spill] sm:$0xff] %v3958_v26  ;;  %v3971_v58 = vsel %vm5438_vm15, %v1316_v29, %v3886_v17  ;;  %v1210_v63 = vcvt.s32.f32 %v1203_v2  ;;  %v1394_v7 = vadd.s32 1, %v3946_v30  ;;  %v1391_v57 = vmul.u32 %v3905_v32, %v1375_v18 }
 0x166   :  { %vm2916_vm9 = vcmp.lt.s32.totalorder %v2915_v11, 0  ;;  %vm1393_vm10 = vc.u32 %v3951_v33, %v3945_v62  ;;  %v1663_v35 = vsub.s32 32, %v1662_v25  ;;  %v1496_v46 = vadd.s32 %v3863_v40, %v3878_v53 }
 0x167   :  { %v3981_v31 = vsel %vm2916_vm9, 0, %v2915_v11  ;;  %v1395_v17 = vsel %vm1393_vm10, %v1394_v7, %v3946_v30  ;;  %v3985_v4 = vmul.f32 %v1210_v63, %v1208_v23  ;;  %v3988_v49 = vshll.u32 %v1656_v16, 8  ;;  %v4001_v18 = vpop.permute.xlu0 %198 }
 0x168   :  { %v1516_v42 = vsub.s32 4294967266, %v3981_v31  ;;  %v1396_v37 = vadd.s32 %v1395_v17, %v1391_v57  ;;  %v3990_v32 = vshrl.u32 %v1660_v0, 5  ;;  %v1666_v19 = vshrl.u32 %v5392_v15, %v1663_v35 }
 0x169   :  { %v5511_v55 = vmov 2131351028   ;;  %v1547_v40 = vand.u32 2139095040, %v3958_v26  ;;  %v1665_v30 = vshll.u32 %v5394_v13, %v1662_v25  ;;  %v1668_v48 = vshll.u32 %v5392_v15, %v1662_v25 }
 0x16a   :  { %v1669_v34 = vshrl.u32 %v5511_v55, %v1663_v35  ;;  %v1397_v53 = vadd.s32 536870912, %v1396_v37  ;;  %v5512_v51 = vmov 2102212464   ;;  %v1517_v2 = vadd.s32 127, %v1516_v42 }
 0x16b   :  { %v1672_v6 = vshrl.u32 %v5512_v51, %v1663_v35  ;;  %v1671_v9 = vshll.u32 %v5511_v55, %v1662_v25  ;;  %v1674_v52 = vshll.u32 %v5512_v51, %v1662_v25  ;;  %v1675_v27 = vshrl.u32 %v5398_v22, %v1663_v35  ;;  %v4006_v63 = vpop.eup %3336 }
 0x16c   :  { %v1212_v0 = vxor.u32 2147483648, %v3985_v4  ;;  %v4004_v23 = vshrl.u32 %v1397_v53, 30  ;;  %v1667_v11 = vor.u32 %v1666_v19, %v1665_v30  ;;  %v1670_v16 = vor.u32 %v1669_v34, %v1668_v48  ;;  %5514 = vst [vmem:[#allocation22_spill] sm:$0xff] %v4006_v63 }
 0x16d   :  { %v1673_v7 = vor.u32 %v1672_v6, %v1671_v9  ;;  %v1676_v57 = vor.u32 %v1675_v27, %v1674_v52  ;;  %v1677_v17 = vshll.u32 %v5398_v22, %v1662_v25  ;;  %v5515_v42 = vmov 1326507024  }
 0x16e   :  { %5513 = vst [vmem:[#allocation21_spill] sm:$0xff] %v4004_v23  ;;  %v1678_v15 = vshrl.u32 %v5515_v42, %v1663_v35  ;;  %v5516_v29 = vand.u32 2147483647, %v3590_v47  ;;  %v5517_v13 = vmov 0  ;;  %v1512_v39 = vsub.s32 32, %v3981_v31 }
 0x16f   :  { %v1513_v19 = vshll.u32 %v3935_v50, %v3981_v31  ;;  %v1399_v34 = vshll.u32 %v4004_v23, 30  ;;  %v1548_v53 = vshrl.u32 %v1547_v40, 23  ;;  %v1518_v30 = vshll.u32 %v1517_v2, 23  ;;  %v4030_v2 = vpop.permute.xlu0 %208 }
 0x170   :  { %vm4012_vm11 = vcmp.le.f32.partialorder %v5516_v29, 0.7853982  ;;  %v5520_v48 = vmov 683565275   ;;  %v1679_v25 = vor.u32 %v1678_v15, %v1677_v17  ;;  %vm1680_vm13 = vcmp.lt.s32.totalorder %v3990_v32, 1 }
 0x171   :  { %v5518_v13 = vsel %vm4012_vm11, 4294967295, %v5517_v13  ;;  %v1664_v6 = vshrl.u32 %v5520_v48, %v1663_v35  ;;  %v4022_v9 = vsub.s32 %v1396_v37, %v1399_v34  ;;  %vm1682_vm0 = vcmp.lt.s32.totalorder %v3990_v32, 3 }
 0x172   :  { %5519 = vst [vmem:[#allocation23_spill] sm:$0xff] %v5518_v13  ;;  %vm1683_vm3 = vcmp.lt.s32.totalorder %v3990_v32, 4  ;;  %v1688_v29 = vsel %vm1680_vm13, %v1667_v11, %v1670_v16  ;;  %v1692_v31 = vsel %vm1680_vm13, %v1670_v16, %v1673_v7  ;;  %v5521_v15 = vand.u32 2147483647, %v3604_v1 }
 0x173   :  { %v1685_v52 = vsel %vm1683_vm3, %v1673_v7, 2102212464  ;;  %v1689_v50 = vsel %vm1683_vm3, %v1676_v57, 920167782  ;;  %v1693_v40 = vsel %vm1683_vm3, %v1679_v25, 1326507024  ;;  %v1514_v37 = vshrl.u32 %v1496_v46, %v1512_v39 }
 0x174   :  { %vm4034_vm6 = vcmp.le.f32.partialorder %v5521_v15, 0.7853982  ;;  %v5522_v35 = vmov 0  ;;  %v1402_v27 = vsub.s32 0, %v4022_v9  ;;  %vm1681_vm7 = vcmp.lt.s32.totalorder %v3990_v32, 2 }
 0x175   :  { %v5523_v35 = vsel %vm4034_vm6, 4294967295, %v5522_v35  ;;  %v1690_v17 = vsel %vm1682_vm0, %v1673_v7, %v1689_v50  ;;  %v1519_v34 = vor.u32 4788187, %v1518_v30  ;;  %v1694_v22 = vsel %vm1682_vm0, %v1676_v57, %v1693_v40 }
 0x176   :  { %5524 = vst [vmem:[#allocation24_spill] sm:$0xff] %v5523_v35  ;;  %v1691_v25 = vsel %vm1681_vm7, %v1688_v29, %v1690_v17  ;;  %v2917_v23 = vadd.s32 4294967169, %v1548_v53  ;;  %v2910_v15 = vmin.u32 %v1402_v27, %v4022_v9  ;;  %v1684_v39 = vsel %vm1680_vm13, %v1664_v6, %v1667_v11  ;;  %v108_v6 = vpop.permute.xlu0 %107 }
 0x177   :  { %v1686_v46 = vsel %vm1682_vm0, %v1670_v16, %v1685_v52  ;;  %v1695_v8 = vsel %vm1681_vm7, %v1692_v31, %v1694_v22  ;;  %v4058_v29 = vmul.u32.u64.low %v3988_v49, %v1691_v25  ;;  %v4059_v50 = vmul.u32.u64.high %v3988_v49, %v1691_v25, %v4058_v29  ;;  %v4073_v16 = vpop.f32.mrb[11].mxu0 }
 0x178   :  { %v4054_v7 = vmul.u32.u64.low %v3988_v49, %v1695_v8  ;;  %v4055_v30 = vmul.u32.u64.high %v3988_v49, %v1695_v8, %v4054_v7  ;;  %3338 = vcosq.f32 %v3964_v5  ;;  %v1515_v57 = vor.u32 %v1514_v37, %v1513_v19 }
 0x179   :  { %v1404_v53 = vclz %v2910_v15  ;;  %v1554_v11 = vadd.s32 1, %v2917_v23  ;;  %3340 = vsinq.f32 %v3964_v5  ;;  %v4068_v22 = vsel %vm4012_vm11, %v3590_v47, %v3971_v58 }
 0x17a   :  { %vm5444_vm8 = vcmp.lt.s32.totalorder %v3604_v1, 0  ;;  %v1687_v8 = vsel %vm1681_vm7, %v1684_v39, %v1686_v46  ;;  %v1520_v19 = vand.u32 2147483647, %v1519_v34  ;;  %vm1705_vm10 = vc.u32 %v4055_v30, %v4058_v29 }
 0x17b   :  { %v1213_v23 = vsel %vm5444_vm8, %v1212_v0, %v3985_v4  ;;  %v2911_v5 = vadd.s32 4294967294, %v1404_v53  ;;  %vm1555_vm9 = vcmp.gt.s32.totalorder %v1554_v11, 0  ;;  %v1706_v58 = vadd.s32 1, %v4059_v50 }
 0x17c   :  { %v5525_v52 = vand.u32 2147483647, %v3958_v26  ;;  %v4084_v32 = vadd.f32 %v3626_v24, %v108_v6  ;;  %v1522_v40 = vcvt.s32.f32 %v1515_v57  ;;  %v1703_v37 = vmul.u32 %v3988_v49, %v1687_v8 }
 0x17d   :  { %vm2912_vm13 = vcmp.lt.s32.totalorder %v2911_v5, 0  ;;  %v1556_v27 = vsel %vm1555_vm9, %v1554_v11, 0  ;;  %v4090_v4 = vsel %vm4034_vm6, %v3604_v1, %v1213_v23  ;;  %v1707_v17 = vsel %vm1705_vm10, %v1706_v58, %v4059_v50 }
 0x17e   :  { %v1551_v31 = vand.u32 8388607, %v5525_v52  ;;  %5526 = vst [vmem:[#allocation25_spill] sm:$0xff] %v4084_v32  ;;  %v4092_v0 = vsel %vm2912_vm13, 0, %v2911_v5  ;;  %v1558_v34 = vand.u32 31, %v1556_v27  ;;  %v4095_v25 = vmul.f32 %v1522_v40, %v1520_v19 }
 0x17f   :  { %v1392_v24 = vadd.s32 %v3945_v62, %v3951_v33  ;;  %v1412_v15 = vsub.s32 4294967266, %v4092_v0  ;;  %v1708_v39 = vadd.s32 %v1707_v17, %v1703_v37  ;;  %v1408_v49 = vsub.s32 32, %v4092_v0 }
 0x180   :  { %v1552_v46 = vor.u32 8388608, %v1551_v31  ;;  %v1559_v7 = vsub.s32 32, %v1558_v34  ;;  %v611_v57 = vand.u32 2139095040, %v4084_v32  ;;  %v1561_v11 = vshll.u32 %v5520_v48, %v1558_v34 }
 0x181   :  { %v1709_v53 = vadd.s32 536870912, %v1708_v39  ;;  %v5527_v8 = vmov 2475754826   ;;  %v1567_v6 = vshll.u32 %v5511_v55, %v1558_v34  ;;  %v1413_v23 = vadd.s32 127, %v1412_v15 }
 0x182   :  { %v1564_v50 = vshll.u32 %v5527_v8, %v1558_v34  ;;  %v1562_v19 = vshrl.u32 %v5527_v8, %v1559_v7  ;;  %v1565_v62 = vshrl.u32 %v5511_v55, %v1559_v7  ;;  %v1568_v33 = vshrl.u32 %v5512_v51, %v1559_v7  ;;  %v4108_v5 = vpop.eup %3338 }
 0x183   :  { %v4110_v58 = vshrl.u32 %v1709_v53, 30  ;;  %v1557_v52 = vshrl.u32 %v1556_v27, 5  ;;  %v1570_v31 = vshll.u32 %v5512_v51, %v1558_v34  ;;  %v5529_v40 = vmov 920167782   ;;  %v4114_v17 = vpop.eup %3340 }
 0x184   :  { %v1571_v37 = vshrl.u32 %v5529_v40, %v1559_v7  ;;  %v1563_v13 = vor.u32 %v1562_v19, %v1561_v11  ;;  %v1566_v47 = vor.u32 %v1565_v62, %v1564_v50  ;;  %v1569_v15 = vor.u32 %v1568_v33, %v1567_v6 }
 0x185   :  { %5528 = vst [vmem:[#allocation26_spill] sm:$0xff] %v4110_v58  ;;  %v1592_v35 = vshll.u32 %v1552_v46, 8  ;;  %v1409_v1 = vshll.u32 %v4022_v9, %v4092_v0  ;;  %v1711_v56 = vshll.u32 %v4110_v58, 30  ;;  %v612_v63 = vshrl.u32 %v611_v57, 23 }
 0x186   :  { %v1572_v43 = vor.u32 %v1571_v37, %v1570_v31  ;;  %v1410_v53 = vshrl.u32 %v1392_v24, %v1408_v49  ;;  %v1414_v54 = vshll.u32 %v1413_v23, 23  ;;  %v1573_v27 = vshll.u32 %v5529_v40, %v1558_v34 }
 0x187   :  { %v1574_v36 = vshrl.u32 %v5515_v42, %v1559_v7  ;;  %v4121_v59 = vsub.s32 %v1708_v39, %v1711_v56  ;;  %vm1576_vm0 = vcmp.lt.s32.totalorder %v1557_v52, 1  ;;  %vm1578_vm3 = vcmp.lt.s32.totalorder %v1557_v52, 3 }
 0x188   :  { %vm1579_vm7 = vcmp.lt.s32.totalorder %v1557_v52, 4  ;;  %v1584_v50 = vsel %vm1576_vm0, %v1563_v13, %v1566_v47  ;;  %v1560_v57 = vshrl.u32 %v5520_v48, %v1559_v7  ;;  %vm1577_vm9 = vcmp.lt.s32.totalorder %v1557_v52, 2 }
 0x189   :  { %v1575_v11 = vor.u32 %v1574_v36, %v1573_v27  ;;  %v1581_v46 = vsel %vm1579_vm7, %v1569_v15, 2102212464  ;;  %v1585_v9 = vsel %vm1579_vm7, %v1572_v43, 920167782  ;;  %v1714_v0 = vsub.s32 0, %v4121_v59 }
 0x18a   :  { %v1586_v24 = vsel %vm1578_vm3, %v1569_v15, %v1585_v9  ;;  %v1415_v34 = vor.u32 4788187, %v1414_v54  ;;  %v1588_v56 = vsel %vm1576_vm0, %v1566_v47, %v1569_v15  ;;  %v1580_v36 = vsel %vm1576_vm0, %v1560_v57, %v1563_v13 }
 0x18b   :  { %v1587_v49 = vsel %vm1577_vm9, %v1584_v50, %v1586_v24  ;;  %v1589_v39 = vsel %vm1579_vm7, %v1575_v11, 1326507024  ;;  %v2922_v6 = vmin.u32 %v1714_v0, %v4121_v59  ;;  %v1582_v23 = vsel %vm1578_vm3, %v1566_v47, %v1581_v46  ;;  %v184_v0 = vpop.permute.xlu1 %183 }
 0x18c   :  { %v1590_v19 = vsel %vm1578_vm3, %v1572_v43, %v1589_v39  ;;  %v4134_v7 = vmul.u32.u64.low %v1592_v35, %v1587_v49  ;;  %v4135_v33 = vmul.u32.u64.high %v1592_v35, %v1587_v49, %v4134_v7  ;;  %v2881_v54 = vadd.s32 4294967169, %v612_v63  ;;  %v4144_v43 = vpop.f32.mrb[11].mxu1 }
 0x18d   :  { %v1591_v62 = vsel %vm1577_vm9, %v1588_v56, %v1590_v19  ;;  %3342 = vcosq.f32 %v4068_v22  ;;  %v1716_v31 = vclz %v2922_v6  ;;  %v1411_v13 = vor.u32 %v1410_v53, %v1409_v1 }
 0x18e   :  { %v4139_v37 = vmul.u32.u64.low %v1592_v35, %v1591_v62  ;;  %v4140_v15 = vmul.u32.u64.high %v1592_v35, %v1591_v62, %v4139_v37  ;;  %3344 = vsinq.f32 %v4068_v22  ;;  %v1583_v47 = vsel %vm1577_vm9, %v1580_v36, %v1582_v23 }
 0x18f   :  { %v618_v27 = vadd.s32 1, %v2881_v54  ;;  %3346 = vcosq.f32 %v4090_v4  ;;  %v1524_v11 = vxor.u32 2147483648, %v4095_v25  ;;  %v2923_v46 = vadd.s32 4294967294, %v1716_v31  ;;  %v4179_v31 = vpop.permute.xlu1 %193 }
 0x190   :  { %v1416_v63 = vand.u32 2147483647, %v1415_v34  ;;  %v1602_v50 = vadd.s32 1, %v4135_v33  ;;  %v5419_v9 = vand.u32 2147483647, %v4084_v32  ;;  %v1599_v22 = vmul.u32 %v1592_v35, %v1583_v47 }
 0x191   :  { %vm619_vm10 = vcmp.gt.s32.totalorder %v618_v27, 0  ;;  %vm2924_vm13 = vcmp.lt.s32.totalorder %v2923_v46, 0  ;;  %vm1601_vm0 = vc.u32 %v4140_v15, %v4134_v7  ;;  %v1418_v52 = vcvt.s32.f32 %v1411_v13 }
 0x192   :  { %v620_v1 = vsel %vm619_vm10, %v618_v27, 0  ;;  %v4152_v53 = vsel %vm2924_vm13, 0, %v2923_v46  ;;  %v1603_v57 = vsel %vm1601_vm0, %v1602_v50, %v4135_v33  ;;  %3348 = vsinq.f32 %v4090_v4 }
 0x193   :  { %v622_v24 = vand.u32 31, %v620_v1  ;;  %vm5436_vm3 = vcmp.lt.s32.totalorder %v3758_v14, 0  ;;  %v1604_v34 = vadd.s32 %v1603_v57, %v1599_v22  ;;  %v4158_v49 = vadd.f32 %v3715_v10, %v184_v0 }
 0x194   :  { %v4163_v35 = vsel %vm5436_vm3, %v1524_v11, %v4095_v25  ;;  %v4165_v56 = vmul.f32 %v1418_v52, %v1416_v63  ;;  %v615_v39 = vand.u32 8388607, %v5419_v9  ;;  %v1724_v36 = vsub.s32 4294967266, %v4152_v53 }
 0x195   :  { %v623_v6 = vsub.s32 32, %v622_v24  ;;  %v1605_v4 = vadd.s32 536870912, %v1604_v34  ;;  %v4170_v23 = vshrl.u32 %v620_v1, 5  ;;  %v625_v19 = vshll.u32 %v5520_v48, %v622_v24 }
 0x196   :  { %v628_v62 = vshll.u32 %v5527_v8, %v622_v24  ;;  %v631_v13 = vshll.u32 %v5511_v55, %v622_v24  ;;  %v634_v47 = vshll.u32 %v5512_v51, %v622_v24  ;;  %v1420_v46 = vxor.u32 2147483648, %v4165_v56 }
 0x197   :  { %v626_v10 = vshrl.u32 %v5527_v8, %v623_v6  ;;  %v629_v25 = vshrl.u32 %v5511_v55, %v623_v6  ;;  %v632_v33 = vshrl.u32 %v5512_v51, %v623_v6  ;;  %v4177_v54 = vpop.eup %3342  ;;  %v4181_v37 = vshrl.u32 %v1605_v4, 30 }
 0x198   :  { %5530 = vst [vmem:[#allocation27_spill] sm:$0xff] %v4177_v54  ;;  %v635_v27 = vshrl.u32 %v5529_v40, %v623_v6  ;;  %v4186_v11 = vpop.eup %3344  ;;  %v1704_v63 = vadd.s32 %v4058_v29, %v4055_v30  ;;  %v1725_v1 = vadd.s32 127, %v1724_v36  ;;  %v5534_v9 = vand.u32 2147483647, %v3758_v14 }
 0x199   :  { %5531 = vst [vmem:[#allocation28_spill] sm:$0xff] %v4181_v37  ;;  %5532 = vst [vmem:[#allocation29_spill] sm:$0xff] %v4186_v11  ;;  %v627_v50 = vor.u32 %v626_v10, %v625_v19  ;;  %v630_v0 = vor.u32 %v629_v25, %v628_v62  ;;  %v4191_v22 = vpop.eup %3346  ;;  %v1607_v52 = vshll.u32 %v4181_v37, 30  ;;  %v633_v57 = vor.u32 %v632_v33, %v631_v13  ;;  %v4214_v62 = vpop.permute.xlu1 %203 }
 0x19a   :  { %5533 = vst [vmem:[#allocation30_spill] sm:$0xff] %v4191_v22  ;;  %v636_v4 = vor.u32 %v635_v27, %v634_v47  ;;  %vm4196_vm7 = vcmp.le.f32.partialorder %v5534_v9, 0.7853982  ;;  %v5535_v58 = vmov 0  ;;  %v616_v54 = vor.u32 8388608, %v615_v39 }
 0x19b   :  { %v5536_v58 = vsel %vm4196_vm7, 4294967295, %v5535_v58  ;;  %v637_v11 = vshll.u32 %v5529_v40, %v622_v24  ;;  %v638_v30 = vshrl.u32 %v5515_v42, %v623_v6  ;;  %v1859_v29 = vand.u32 2139095040, %v4158_v49 }
 0x19c   :  { %5537 = vst [vmem:[#allocation31_spill] sm:$0xff] %v5536_v58  ;;  %vm5437_vm9 = vcmp.lt.s32.totalorder %v3815_v60, 0  ;;  %v1720_v36 = vsub.s32 32, %v4152_v53  ;;  %v4205_v19 = vsub.s32 %v1604_v34, %v1607_v52  ;;  %vm640_vm10 = vcmp.lt.s32.totalorder %v4170_v23, 1  ;;  %v4212_v10 = vpop.eup %3348 }
 0x19d   :  { %vm643_vm13 = vcmp.lt.s32.totalorder %v4170_v23, 4  ;;  %v639_v9 = vor.u32 %v638_v30, %v637_v11  ;;  %vm642_vm0 = vcmp.lt.s32.totalorder %v4170_v23, 3  ;;  %v648_v24 = vsel %vm640_vm10, %v627_v50, %v630_v0  ;;  %5538 = vst [vmem:[#allocation32_spill] sm:$0xff] %v4212_v10 }
 0x19e   :  { %v649_v39 = vsel %vm643_vm13, %v636_v4, 920167782  ;;  %v1726_v25 = vshll.u32 %v1725_v1, 23  ;;  %v1610_v33 = vsub.s32 0, %v4205_v19  ;;  %v624_v34 = vshrl.u32 %v5520_v48, %v623_v6 }
 0x19f   :  { %v650_v13 = vsel %vm642_vm0, %v633_v57, %v649_v39  ;;  %vm641_vm2 = vcmp.lt.s32.totalorder %v4170_v23, 2  ;;  %v645_v47 = vsel %vm643_vm13, %v633_v57, 2102212464  ;;  %v652_v27 = vsel %vm640_vm10, %v630_v0, %v633_v57 }
 0x1a0   :  { %v653_v11 = vsel %vm643_vm13, %v639_v9, 1326507024  ;;  %v2918_v52 = vmin.u32 %v1610_v33, %v4205_v19  ;;  %v651_v30 = vsel %vm641_vm2, %v648_v24, %v650_v13  ;;  %v656_v37 = vshll.u32 %v616_v54, 8 }
 0x1a1   :  { %v654_v1 = vsel %vm642_vm0, %v636_v4, %v653_v11  ;;  %v1722_v6 = vshrl.u32 %v1704_v63, %v1720_v36  ;;  %v644_v39 = vsel %vm640_vm10, %v624_v34, %v627_v50  ;;  %v1860_v10 = vshrl.u32 %v1859_v29, 23  ;;  %v103_v34 = vpop.permute.xlu1 %102 }
 0x1a2   :  { %v655_v22 = vsel %vm641_vm2, %v652_v27, %v654_v1  ;;  %v5539_v57 = vand.u32 2147483647, %v3815_v60  ;;  %v5540_v9 = vmov 0  ;;  %v1612_v33 = vclz %v2918_v52 }
 0x1a3   :  { %v646_v24 = vsel %vm642_vm0, %v630_v0, %v645_v47  ;;  %v4240_v4 = vmul.u32.u64.low %v656_v37, %v655_v22  ;;  %v4241_v54 = vmul.u32.u64.high %v656_v37, %v655_v22, %v4240_v4  ;;  %v1727_v63 = vor.u32 4788187, %v1726_v25 }
 0x1a4   :  { %vm4234_vm13 = vcmp.le.f32.partialorder %v5539_v57, 0.7853982  ;;  %v4243_v36 = vmul.u32.u64.low %v656_v37, %v651_v30  ;;  %v4244_v50 = vmul.u32.u64.high %v656_v37, %v651_v30, %v4243_v36  ;;  %v5429_v29 = vand.u32 2147483647, %v4158_v49 }
 0x1a5   :  { %v5541_v9 = vsel %vm4234_vm13, 4294967295, %v5540_v9  ;;  %v1528_v13 = vsel %vm4196_vm7, %v3758_v14, %v4163_v35  ;;  %v1721_v27 = vshll.u32 %v4121_v59, %v4152_v53  ;;  %v2919_v0 = vadd.s32 4294967294, %v1612_v33 }
 0x1a6   :  { %5542 = vst [vmem:[#allocation33_spill] sm:$0xff] %v5541_v9  ;;  %v2929_v47 = vadd.s32 4294967169, %v1860_v10  ;;  %v1421_v22 = vsel %vm5437_vm9, %v1420_v46, %v4165_v56  ;;  %v1600_v25 = vadd.s32 %v4134_v7, %v4140_v15  ;;  %v647_v11 = vsel %vm641_vm2, %v644_v39, %v646_v24 }
 0x1a7   :  { %v4262_v52 = vadd.f32 %v3751_v41, %v103_v34  ;;  %v1723_v30 = vor.u32 %v1722_v6, %v1721_v27  ;;  %vm2920_vm10 = vcmp.lt.s32.totalorder %v2919_v0, 0  ;;  %vm665_vm0 = vc.u32 %v4241_v54, %v4243_v36 }
 0x1a8   :  { %v1866_v59 = vadd.s32 1, %v2929_v47  ;;  %v1728_v53 = vand.u32 2147483647, %v1727_v63  ;;  %v1615_v35 = vsel %vm2920_vm10, 0, %v2919_v0  ;;  %v666_v10 = vadd.s32 1, %v4244_v50 }
 0x1a9   :  { %5543 = vst [vmem:[#allocation34_spill] sm:$0xff] %v4262_v52  ;;  %v1863_v56 = vand.u32 8388607, %v5429_v29  ;;  %v1616_v7 = vsub.s32 32, %v1615_v35  ;;  %v1620_v15 = vsub.s32 4294967266, %v1615_v35  ;;  %v663_v23 = vmul.u32 %v656_v37, %v647_v11 }
 0x1aa   :  { %vm1867_vm2 = vcmp.gt.s32.totalorder %v1866_v59, 0  ;;  %3350 = vcosq.f32 %v1528_v13  ;;  %v667_v41 = vsel %vm665_vm0, %v666_v10, %v4244_v50  ;;  %v507_v1 = vand.u32 2139095040, %v4262_v52  ;;  %v4277_v50 = vpop.f32.mrb[12].mxu1 }
 0x1ab   :  { %v1868_v46 = vsel %vm1867_vm2, %v1866_v59, 0  ;;  %v1730_v6 = vcvt.s32.f32 %v1723_v30  ;;  %v1618_v39 = vshrl.u32 %v1600_v25, %v1616_v7  ;;  %v1621_v57 = vadd.s32 127, %v1620_v15 }
 0x1ac   :  { %v668_v33 = vadd.s32 %v667_v41, %v663_v23  ;;  %3352 = vsinq.f32 %v1528_v13  ;;  %v4274_v24 = vsel %vm4234_vm13, %v3815_v60, %v1421_v22  ;;  %v1870_v4 = vand.u32 31, %v1868_v46 }
 0x1ad   :  { %v1731_v63 = vmul.f32 %v1730_v6, %v1728_v53  ;;  %v1617_v37 = vshll.u32 %v4205_v19, %v1615_v35  ;;  %v1864_v27 = vor.u32 8388608, %v1863_v56  ;;  %v4279_v0 = vshrl.u32 %v1868_v46, 5 }
 0x1ae   :  { %v669_v34 = vadd.s32 536870912, %v668_v33  ;;  %v1871_v47 = vsub.s32 32, %v1870_v4  ;;  %v508_v11 = vshrl.u32 %v507_v1, 23  ;;  %v1622_v30 = vshll.u32 %v1621_v57, 23 }
 0x1af   :  { %v1619_v13 = vor.u32 %v1618_v39, %v1617_v37  ;;  %v1873_v22 = vshll.u32 %v5520_v48, %v1870_v4  ;;  %v1876_v19 = vshll.u32 %v5527_v8, %v1870_v4  ;;  %v1879_v7 = vshll.u32 %v5511_v55, %v1870_v4 }
 0x1b0   :  { %v4282_v59 = vshrl.u32 %v669_v34, 30  ;;  %v1874_v53 = vshrl.u32 %v5527_v8, %v1871_v47  ;;  %v1877_v35 = vshrl.u32 %v5511_v55, %v1871_v47  ;;  %v1880_v10 = vshrl.u32 %v5512_v51, %v1871_v47 }
 0x1b1   :  { %v1882_v15 = vshll.u32 %v5512_v51, %v1870_v4  ;;  %v1883_v23 = vshrl.u32 %v5529_v40, %v1871_v47  ;;  %3354 = vcosq.f32 %v4274_v24  ;;  %vm5443_vm10 = vcmp.lt.s32.totalorder %v3874_v61, 0 }
 0x1b2   :  { %v671_v56 = vshll.u32 %v4282_v59, 30  ;;  %v1732_v41 = vxor.u32 2147483648, %v1731_v63  ;;  %v1875_v46 = vor.u32 %v1874_v53, %v1873_v22  ;;  %v1878_v1 = vor.u32 %v1877_v35, %v1876_v19 }
 0x1b3   :  { %v1881_v39 = vor.u32 %v1880_v10, %v1879_v7  ;;  %v1884_v57 = vor.u32 %v1883_v23, %v1882_v15  ;;  %v4297_v37 = vshll.u32 %v1864_v27, 8  ;;  %v1623_v29 = vor.u32 4788187, %v1622_v30 }
 0x1b4   :  { %v4295_v6 = vsub.s32 %v668_v33, %v671_v56  ;;  %v4299_v34 = vpop.eup %3350  ;;  %v1885_v25 = vshll.u32 %v5529_v40, %v1870_v4  ;;  %v1886_v58 = vshrl.u32 %v5515_v42, %v1871_v47  ;;  %v5545_v14 = vand.u32 2147483647, %v4262_v52 }
 0x1b5   :  { %5544 = vst [vmem:[#allocation35_spill] sm:$0xff] %v4299_v34  ;;  %v5546_v60 = vand.u32 2147483647, %v3874_v61  ;;  %v5547_v22 = vmov 0  ;;  %v1626_v33 = vcvt.s32.f32 %v1619_v13  ;;  %vm1888_vm2 = vcmp.lt.s32.totalorder %v4279_v0, 1 }
 0x1b6   :  { %v511_v9 = vand.u32 8388607, %v5545_v14  ;;  %v674_v27 = vsub.s32 0, %v4295_v6  ;;  %v2877_v53 = vadd.s32 4294967169, %v508_v11  ;;  %v4313_v30 = vpop.eup %3352  ;;  %v1872_v4 = vshrl.u32 %v5520_v48, %v1871_v47 }
 0x1b7   :  { %vm4307_vm0 = vcmp.le.f32.partialorder %v5546_v60, 0.7853982  ;;  %5550 = vst [vmem:[#allocation37_spill] sm:$0xff] %v4313_v30  ;;  %v1887_v19 = vor.u32 %v1886_v58, %v1885_v25  ;;  %vm1891_vm3 = vcmp.lt.s32.totalorder %v4279_v0, 4  ;;  %v1896_v14 = vsel %vm1888_vm2, %v1875_v46, %v1878_v1 }
 0x1b8   :  { %v5548_v22 = vsel %vm4307_vm0, 4294967295, %v5547_v22  ;;  %v2882_v60 = vmin.u32 %v674_v27, %v4295_v6  ;;  %vm1890_vm9 = vcmp.lt.s32.totalorder %v4279_v0, 3  ;;  %v1893_v13 = vsel %vm1891_vm3, %v1881_v39, 2102212464 }
 0x1b9   :  { %5549 = vst [vmem:[#allocation36_spill] sm:$0xff] %v5548_v22  ;;  %v1897_v35 = vsel %vm1891_vm3, %v1884_v57, 920167782  ;;  %v1624_v10 = vand.u32 2147483647, %v1623_v29  ;;  %vm1889_vm15 = vcmp.lt.s32.totalorder %v4279_v0, 2  ;;  %v1900_v56 = vsel %vm1888_vm2, %v1878_v1, %v1881_v39 }
 0x1ba   :  { %v1898_v11 = vsel %vm1890_vm9, %v1881_v39, %v1897_v35  ;;  %v676_v47 = vclz %v2882_v60  ;;  %v1892_v58 = vsel %vm1888_vm2, %v1872_v4, %v1875_v46  ;;  %v1901_v7 = vsel %vm1891_vm3, %v1887_v19, 1326507024 }
 0x1bb   :  { %v1899_v25 = vsel %vm1889_vm15, %v1896_v14, %v1898_v11  ;;  %v1894_v15 = vsel %vm1890_vm9, %v1878_v1, %v1893_v13  ;;  %v1902_v23 = vsel %vm1890_vm9, %v1884_v57, %v1901_v7  ;;  %v1733_v29 = vsel %vm5443_vm10, %v1732_v41, %v1731_v63  ;;  %v4337_v46 = vpop.eup %3354 }
 0x1bc   :  { %v4329_v27 = vmul.u32.u64.low %v4297_v37, %v1899_v25  ;;  %v4330_v34 = vmul.u32.u64.high %v4297_v37, %v1899_v25, %v4329_v27  ;;  %v2883_v35 = vadd.s32 4294967294, %v676_v47  ;;  %v1903_v39 = vsel %vm1889_vm15, %v1900_v56, %v1902_v23  ;;  %5551 = vst [vmem:[#allocation38_spill] sm:$0xff] %v4337_v46 }
 0x1bd   :  { %v514_v60 = vadd.s32 1, %v2877_v53  ;;  %v4339_v4 = vmul.f32 %v1626_v33, %v1624_v10  ;;  %v4342_v1 = vmul.u32.u64.low %v4297_v37, %v1903_v39  ;;  %v4343_v57 = vmul.u32.u64.high %v4297_v37, %v1903_v39, %v4342_v1  ;;  %v4357_v10 = vpop.f32.mrb[13].mxu1 }
 0x1be   :  { %v512_v19 = vor.u32 8388608, %v511_v9  ;;  %vm2884_vm3 = vcmp.lt.s32.totalorder %v2883_v35, 0  ;;  %v1895_v14 = vsel %vm1889_vm15, %v1892_v58, %v1894_v15  ;;  %v4349_v63 = vadd.f32 %v3793_v28, %v3940_v3  ;;  %v3094_v28 = vpop.f32.mrb[14].mxu1 }
 0x1bf   :  { %vm515_vm9 = vcmp.gt.s32.totalorder %v514_v60, 0  ;;  %v4354_v41 = vsel %vm4307_vm0, %v3874_v61, %v1733_v29  ;;  %v679_v33 = vsel %vm2884_vm3, 0, %v2883_v35  ;;  %v1914_v53 = vadd.s32 1, %v4330_v34 }
 0x1c0   :  { %v516_v13 = vsel %vm515_vm9, %v514_v60, 0  ;;  %v664_v9 = vadd.s32 %v4243_v36, %v4241_v54  ;;  %v680_v0 = vsub.s32 32, %v679_v33  ;;  %v684_v11 = vsub.s32 4294967266, %v679_v33 }
 0x1c1   :  { %v1911_v47 = vmul.u32 %v4297_v37, %v1895_v14  ;;  %vm1913_vm15 = vc.u32 %v4343_v57, %v4329_v27  ;;  %v518_v58 = vand.u32 31, %v516_v13  ;;  %v4367_v15 = vshll.u32 %v512_v19, 8 }
 0x1c2   :  { %v685_v25 = vadd.s32 127, %v684_v11  ;;  %v1915_v7 = vsel %vm1913_vm15, %v1914_v53, %v4330_v34  ;;  %v1755_v54 = vand.u32 2139095040, %v4349_v63  ;;  %v681_v36 = vshll.u32 %v4295_v6, %v679_v33 }
 0x1c3   :  { %v682_v23 = vshrl.u32 %v664_v9, %v680_v0  ;;  %v1916_v29 = vadd.s32 %v1915_v7, %v1911_v47  ;;  %v519_v35 = vsub.s32 32, %v518_v58  ;;  %v517_v60 = vshrl.u32 %v516_v13, 5 }
 0x1c4   :  { %v686_v39 = vshll.u32 %v685_v25, 23  ;;  %v521_v37 = vshll.u32 %v5520_v48, %v518_v58  ;;  %v524_v1 = vshll.u32 %v5527_v8, %v518_v58  ;;  %v527_v19 = vshll.u32 %v5511_v55, %v518_v58 }
 0x1c5   :  { %v1917_v14 = vadd.s32 536870912, %v1916_v29  ;;  %v522_v11 = vshrl.u32 %v5527_v8, %v519_v35  ;;  %v525_v34 = vshrl.u32 %v5511_v55, %v519_v35  ;;  %v528_v28 = vshrl.u32 %v5512_v51, %v519_v35 }
 0x1c6   :  { %v687_v53 = vor.u32 4788187, %v686_v39  ;;  %v530_v6 = vshll.u32 %v5512_v51, %v518_v58  ;;  %v531_v33 = vshrl.u32 %v5529_v40, %v519_v35  ;;  %vm5454_vm2 = vcmp.lt.s32.totalorder %v3958_v26, 0 }
 0x1c7   :  { %v683_v13 = vor.u32 %v682_v23, %v681_v36  ;;  %v4380_v9 = vshrl.u32 %v1917_v14, 30  ;;  %v523_v0 = vor.u32 %v522_v11, %v521_v37  ;;  %v526_v47 = vor.u32 %v525_v34, %v524_v1 }
 0x1c8   :  { %v529_v25 = vor.u32 %v528_v28, %v527_v19  ;;  %v532_v7 = vor.u32 %v531_v33, %v530_v6  ;;  %v533_v56 = vshll.u32 %v5529_v40, %v518_v58  ;;  %v534_v3 = vshrl.u32 %v5515_v42, %v519_v35 }
 0x1c9   :  { %5552 = vst [vmem:[#allocation39_spill] sm:$0xff] %v4380_v9  ;;  %vm610_vm3 = vcmp.lt.s32.totalorder %v4084_v32, 0  ;;  %v1919_v39 = vshll.u32 %v4380_v9, 30  ;;  %v520_v22 = vshrl.u32 %v5520_v48, %v519_v35  ;;  %vm536_vm9 = vcmp.lt.s32.totalorder %v517_v60, 1 }
 0x1ca   :  { %v1756_v61 = vshrl.u32 %v1755_v54, 23  ;;  %v5553_v36 = vand.u32 2147483647, %v3958_v26  ;;  %v5554_v23 = vmov 0  ;;  %v688_v37 = vand.u32 2147483647, %v687_v53 }
 0x1cb   :  { %v535_v1 = vor.u32 %v534_v3, %v533_v56  ;;  %vm538_vm10 = vcmp.lt.s32.totalorder %v517_v60, 3  ;;  %vm539_vm8 = vcmp.lt.s32.totalorder %v517_v60, 4  ;;  %v4393_v58 = vsub.s32 %v1916_v29, %v1919_v39 }
 0x1cc   :  { %vm4389_vm15 = vcmp.le.f32.partialorder %v5553_v36, 0.7853982  ;;  %v541_v14 = vsel %vm539_vm8, %v529_v25, 2102212464  ;;  %v544_v11 = vsel %vm536_vm9, %v523_v0, %v526_v47  ;;  %v545_v34 = vsel %vm539_vm8, %v532_v7, 920167782 }
 0x1cd   :  { %v5555_v23 = vsel %vm4389_vm15, 4294967295, %v5554_v23  ;;  %v690_v19 = vcvt.s32.f32 %v683_v13  ;;  %vm537_vm4 = vcmp.lt.s32.totalorder %v517_v60, 2  ;;  %v546_v35 = vsel %vm538_vm10, %v529_v25, %v545_v34 }
 0x1ce   :  { %5556 = vst [vmem:[#allocation40_spill] sm:$0xff] %v5555_v23  ;;  %v548_v54 = vsel %vm536_vm9, %v526_v47, %v529_v25  ;;  %v1922_v28 = vsub.s32 0, %v4393_v58  ;;  %v540_v6 = vsel %vm536_vm9, %v520_v22, %v523_v0  ;;  %v547_v53 = vsel %vm537_vm4, %v544_v11, %v546_v35 }
 0x1cf   :  { %v549_v56 = vsel %vm539_vm8, %v535_v1, 1326507024  ;;  %v542_v3 = vsel %vm538_vm10, %v526_v47, %v541_v14  ;;  %v4401_v29 = vmul.u32.u64.low %v4367_v15, %v547_v53  ;;  %v4402_v39 = vmul.u32.u64.high %v4367_v15, %v547_v53, %v4401_v29 }
 0x1d0   :  { %v550_v33 = vsel %vm538_vm10, %v532_v7, %v549_v56  ;;  %v691_v36 = vmul.f32 %v690_v19, %v688_v37  ;;  %v2930_v13 = vmin.u32 %v1922_v28, %v4393_v58  ;;  %v2925_v25 = vadd.s32 4294967169, %v1756_v61 }
 0x1d1   :  { %v551_v34 = vsel %vm537_vm4, %v548_v54, %v550_v33  ;;  %v5557_v9 = vxor.u32 2147483648, %v4339_v4  ;;  %v5448_v7 = vand.u32 2147483647, %v4349_v63  ;;  %3356 = vsinq.f32 %v4274_v24  ;;  %v118_v33 = vpop.permute.xlu0 %117 }
 0x1d2   :  { %v4413_v0 = vmul.u32.u64.low %v4367_v15, %v551_v34  ;;  %v4414_v47 = vmul.u32.u64.high %v4367_v15, %v551_v34, %v4413_v0  ;;  %v1924_v37 = vclz %v2930_v13  ;;  %v543_v1 = vsel %vm537_vm4, %v540_v6, %v542_v3 }
 0x1d3   :  { %v1629_v22 = vsel %vm5454_vm2, %v5557_v9, %v4339_v4  ;;  %v1762_v14 = vadd.s32 1, %v2925_v25  ;;  %3358 = vcosq.f32 %v4354_v41  ;;  %v5558_v61 = vand.u32 2147483647, %v4084_v32 }
 0x1d4   :  { %v5561_v4 = vsub.s32 4, %v4282_v59  ;;  %v562_v24 = vadd.s32 1, %v4402_v39  ;;  %v4437_v60 = vsel %vm4389_vm15, %v3958_v26, %v1629_v22  ;;  %v692_v19 = vxor.u32 2147483648, %v691_v36 }
 0x1d5   :  { %vm4422_vm8 = vcmp.le.f32.partialorder %v5558_v61, 0.7853982  ;;  %v2931_v35 = vadd.s32 4294967294, %v1924_v37  ;;  %vm1763_vm4 = vcmp.gt.s32.totalorder %v1762_v14, 0  ;;  %v559_v54 = vmul.u32 %v4367_v15, %v543_v1 }
 0x1d6   :  { %v4431_v9 = vsel %vm610_vm3, %v5561_v4, %v4282_v59  ;;  %vm561_vm10 = vc.u32 %v4414_v47, %v4401_v29  ;;  %v1759_v28 = vand.u32 8388607, %v5448_v7  ;;  %v1764_v59 = vsel %vm1763_vm4, %v1762_v14, 0 }
 0x1d7   :  { %3360 = vsinq.f32 %v4354_v41  ;;  %vm2932_vm9 = vcmp.lt.s32.totalorder %v2931_v35, 0  ;;  %v563_v6 = vsel %vm561_vm10, %v562_v24, %v4402_v39  ;;  %v1766_v53 = vand.u32 31, %v1764_v59  ;;  %v4452_v41 = vpop.f32.mrb[15].mxu1 }
 0x1d8   :  { %3362 = vcosq.f32 %v4437_v60  ;;  %v1927_v15 = vsel %vm2932_vm9, 0, %v2931_v35  ;;  %v564_v3 = vadd.s32 %v563_v6, %v559_v54  ;;  %v1912_v13 = vadd.s32 %v4329_v27, %v4343_v57 }
 0x1d9   :  { %v1928_v34 = vsub.s32 32, %v1927_v15  ;;  %v1932_v25 = vsub.s32 4294967266, %v1927_v15  ;;  %v1767_v22 = vsub.s32 32, %v1766_v53  ;;  %v693_v39 = vsel %vm610_vm3, %v692_v19, %v691_v36 }
 0x1da   :  { %v565_v0 = vadd.s32 536870912, %v564_v3  ;;  %v1760_v37 = vor.u32 8388608, %v1759_v28  ;;  %v4457_v1 = vadd.f32 %v3880_v12, %v118_v33  ;;  %v1929_v14 = vshll.u32 %v4393_v58, %v1927_v15 }
 0x1db   :  { %v1930_v61 = vshrl.u32 %v1912_v13, %v1928_v34  ;;  %v1933_v4 = vadd.s32 127, %v1932_v25  ;;  %v1770_v24 = vshrl.u32 %v5527_v8, %v1767_v22  ;;  %v1769_v57 = vshll.u32 %v5520_v48, %v1766_v53  ;;  %v4466_v36 = vpop.eup %3356 }
 0x1dc   :  { %5562 = vst [vmem:[#allocation41_spill] sm:$0xff] %v4457_v1  ;;  %v4461_v27 = vshrl.u32 %v565_v0, 30  ;;  %v1773_v35 = vshrl.u32 %v5511_v55, %v1767_v22  ;;  %v1776_v54 = vshrl.u32 %v5512_v51, %v1767_v22  ;;  %v1772_v12 = vshll.u32 %v5527_v8, %v1766_v53 }
 0x1dd   :  { %v1934_v19 = vshll.u32 %v1933_v4, 23  ;;  %v1775_v28 = vshll.u32 %v5511_v55, %v1766_v53  ;;  %v1779_v58 = vshrl.u32 %v5529_v40, %v1767_v22  ;;  %v4471_v6 = vpop.eup %3358  ;;  %v1931_v15 = vor.u32 %v1930_v61, %v1929_v14 }
 0x1de   :  { %5563 = vst [vmem:[#allocation42_spill] sm:$0xff] %v4471_v6  ;;  %v567_v33 = vshll.u32 %v4461_v27, 30  ;;  %v1765_v13 = vshrl.u32 %v1764_v59, 5  ;;  %v1778_v34 = vshll.u32 %v5512_v51, %v1766_v53  ;;  %v1771_v0 = vor.u32 %v1770_v24, %v1769_v57 }
 0x1df   :  { %v1935_v25 = vor.u32 4788187, %v1934_v19  ;;  %v1774_v7 = vor.u32 %v1773_v35, %v1772_v12  ;;  %v1777_v56 = vor.u32 %v1776_v54, %v1775_v28  ;;  %v1781_v26 = vshll.u32 %v5529_v40, %v1766_v53 }
 0x1e0   :  { %v4475_v23 = vsub.s32 %v564_v3, %v567_v33  ;;  %v1780_v4 = vor.u32 %v1779_v58, %v1778_v34  ;;  %v1782_v30 = vshrl.u32 %v5515_v42, %v1767_v22  ;;  %v696_v14 = vsel %vm4422_vm8, %v4084_v32, %v693_v39 }
 0x1e1   :  { %v4479_v46 = vpop.eup %3360  ;;  %v1768_v59 = vshrl.u32 %v5520_v48, %v1767_v22  ;;  %v1800_v61 = vshll.u32 %v1760_v37, 8  ;;  %v819_v24 = vand.u32 2139095040, %v4457_v1  ;;  %vm506_vm3 = vcmp.lt.s32.totalorder %v4262_v52, 0 }
 0x1e2   :  { %5564 = vst [vmem:[#allocation43_spill] sm:$0xff] %v4479_v46  ;;  %v4486_v57 = vpop.eup %3362  ;;  %v570_v3 = vsub.s32 0, %v4475_v23  ;;  %v1783_v53 = vor.u32 %v1782_v30, %v1781_v26  ;;  %vm1784_vm4 = vcmp.lt.s32.totalorder %v1765_v13, 1  ;;  %vm1787_vm10 = vcmp.lt.s32.totalorder %v1765_v13, 4 }
 0x1e3   :  { %5565 = vst [vmem:[#allocation44_spill] sm:$0xff] %v4486_v57  ;;  %v1936_v35 = vand.u32 2147483647, %v1935_v25  ;;  %v1938_v54 = vcvt.s32.f32 %v1931_v15  ;;  %v1789_v19 = vsel %vm1787_vm10, %v1777_v56, 2102212464  ;;  %v1792_v12 = vsel %vm1784_vm4, %v1771_v0, %v1774_v7 }
 0x1e4   :  { %v2878_v39 = vmin.u32 %v570_v3, %v4475_v23  ;;  %vm1786_vm9 = vcmp.lt.s32.totalorder %v1765_v13, 3  ;;  %v1793_v22 = vsel %vm1787_vm10, %v1780_v4, 920167782  ;;  %v1796_v37 = vsel %vm1784_vm4, %v1774_v7, %v1777_v56 }
 0x1e5   :  { %vm1785_vm2 = vcmp.lt.s32.totalorder %v1765_v13, 2  ;;  %v1788_v28 = vsel %vm1784_vm4, %v1768_v59, %v1771_v0  ;;  %v1794_v58 = vsel %vm1786_vm9, %v1777_v56, %v1793_v22  ;;  %v1797_v33 = vsel %vm1787_vm10, %v1783_v53, 1326507024 }
 0x1e6   :  { %v572_v34 = vclz %v2878_v39  ;;  %v1790_v32 = vsel %vm1786_vm9, %v1774_v7, %v1789_v19  ;;  %v1795_v6 = vsel %vm1785_vm2, %v1792_v12, %v1794_v58  ;;  %v1798_v26 = vsel %vm1786_vm9, %v1780_v4, %v1797_v33  ;;  %v113_v33 = vpop.permute.xlu1 %112 }
 0x1e7   :  { %v590_v30 = vsub.s32 4, %v4461_v27  ;;  %v1799_v15 = vsel %vm1785_vm2, %v1796_v37, %v1798_v26  ;;  %v4494_v25 = vmul.u32.u64.low %v1800_v61, %v1795_v6  ;;  %v4495_v46 = vmul.u32.u64.high %v1800_v61, %v1795_v6, %v4494_v25 }
 0x1e8   :  { %vm5465_vm12 = vcmp.lt.s32.totalorder %v4158_v49, 0  ;;  %v1939_v3 = vmul.f32 %v1938_v54, %v1936_v35  ;;  %v5566_v0 = vand.u32 2147483647, %v4262_v52  ;;  %v2879_v7 = vadd.s32 4294967294, %v572_v34 }
 0x1e9   :  { %v4505_v59 = vmul.u32.u64.low %v1800_v61, %v1799_v15  ;;  %v4506_v4 = vmul.u32.u64.high %v1800_v61, %v1799_v15, %v4505_v59  ;;  %3364 = vsinq.f32 %v4437_v60  ;;  %v1791_v53 = vsel %vm1785_vm2, %v1788_v28, %v1790_v32 }
 0x1ea   :  { %vm4501_vm4 = vcmp.le.f32.partialorder %v5566_v0, 0.7853982  ;;  %v5460_v6 = vand.u32 2147483647, %v4457_v1  ;;  %v820_v19 = vshrl.u32 %v819_v24, 23  ;;  %3366 = vcosq.f32 %v696_v14 }
 0x1eb   :  { %v560_v35 = vadd.s32 %v4401_v29, %v4414_v47  ;;  %vm2880_vm10 = vcmp.lt.s32.totalorder %v2879_v7, 0  ;;  %v4515_v54 = vadd.f32 %v3953_v20, %v4179_v31  ;;  %v4520_v39 = vsel %vm506_vm3, %v590_v30, %v4461_v27 }
 0x1ec   :  { %v575_v12 = vsel %vm2880_vm10, 0, %v2879_v7  ;;  %v1810_v32 = vadd.s32 1, %v4495_v46  ;;  %v2889_v60 = vadd.s32 4294967169, %v820_v19  ;;  %v1940_v13 = vxor.u32 2147483648, %v1939_v3 }
 0x1ed   :  { %5569 = vst [vmem:[#allocation45_spill] sm:$0xff] %v4515_v54  ;;  %v576_v24 = vsub.s32 32, %v575_v12  ;;  %v580_v22 = vsub.s32 4294967266, %v575_v12  ;;  %v1807_v37 = vmul.u32 %v1800_v61, %v1791_v53  ;;  %v577_v29 = vshll.u32 %v4475_v23, %v575_v12 }
 0x1ee   :  { %vm1809_vm2 = vc.u32 %v4506_v4, %v4494_v25  ;;  %v823_v20 = vand.u32 8388607, %v5460_v6  ;;  %v826_v31 = vadd.s32 1, %v2889_v60  ;;  %v2067_v58 = vand.u32 2139095040, %v4515_v54 }
 0x1ef   :  { %v578_v47 = vshrl.u32 %v560_v35, %v576_v24  ;;  %v581_v28 = vadd.s32 127, %v580_v22  ;;  %v1811_v27 = vsel %vm1809_vm2, %v1810_v32, %v4495_v46  ;;  %3368 = vsinq.f32 %v696_v14 }
 0x1f0   :  { %v5570_v61 = vsel %vm4422_vm8, 0, %v4431_v9  ;;  %v1812_v34 = vadd.s32 %v1811_v27, %v1807_v37  ;;  %vm827_vm9 = vcmp.gt.s32.totalorder %v826_v31, 0  ;;  %v4537_v0 = vadd.f32 %v4073_v16, %v113_v33 }
 0x1f1   :  { %v4534_v23 = vadd.s32 3, %v5570_v61  ;;  %v579_v26 = vor.u32 %v578_v47, %v577_v29  ;;  %v582_v30 = vshll.u32 %v581_v28, 23  ;;  %v828_v15 = vsel %vm827_vm9, %v826_v31, 0 }
 0x1f2   :  { %v1941_v46 = vsel %vm5465_vm12, %v1940_v13, %v1939_v3  ;;  %v1813_v11 = vadd.s32 536870912, %v1812_v34  ;;  %v830_v7 = vand.u32 31, %v828_v15  ;;  %v824_v59 = vor.u32 8388608, %v823_v20 }
 0x1f3   :  { %5571 = vst [vmem:[#allocation46_spill] sm:$0xff] %v4534_v23  ;;  %v583_v9 = vor.u32 4788187, %v582_v30  ;;  %v5466_v53 = vand.u32 2147483647, %v4515_v54  ;;  %v2068_v19 = vshrl.u32 %v2067_v58, 23  ;;  %v4545_v35 = vpop.eup %3364  ;;  %v586_v12 = vcvt.s32.f32 %v579_v26 }
 0x1f4   :  { %v4547_v32 = vshrl.u32 %v1813_v11, 30  ;;  %v829_v16 = vshrl.u32 %v828_v15, 5  ;;  %v831_v60 = vsub.s32 32, %v830_v7  ;;  %v4549_v24 = vpop.eup %3366  ;;  %v833_v13 = vshll.u32 %v5520_v48, %v830_v7 }
 0x1f5   :  { %5573 = vst [vmem:[#allocation48_spill] sm:$0xff] %v4549_v24  ;;  %v584_v3 = vand.u32 2147483647, %v583_v9  ;;  %v836_v22 = vshll.u32 %v5527_v8, %v830_v7  ;;  %v839_v37 = vshll.u32 %v5511_v55, %v830_v7  ;;  %v5574_v29 = vand.u32 2147483647, %v4158_v49 }
 0x1f6   :  { %5572 = vst [vmem:[#allocation47_spill] sm:$0xff] %v4547_v32  ;;  %v5575_v20 = vmov 0  ;;  %v1815_v31 = vshll.u32 %v4547_v32, 30  ;;  %v834_v47 = vshrl.u32 %v5527_v8, %v831_v60  ;;  %v837_v28 = vshrl.u32 %v5511_v55, %v831_v60 }
 0x1f7   :  { %vm4556_vm8 = vcmp.le.f32.partialorder %v5574_v29, 0.7853982  ;;  %v842_v27 = vshll.u32 %v5512_v51, %v830_v7  ;;  %v840_v58 = vshrl.u32 %v5512_v51, %v831_v60  ;;  %v843_v33 = vshrl.u32 %v5529_v40, %v831_v60 }
 0x1f8   :  { %v5576_v20 = vsel %vm4556_vm8, 4294967295, %v5575_v20  ;;  %v845_v61 = vshll.u32 %v5529_v40, %v830_v7  ;;  %v846_v26 = vshrl.u32 %v5515_v42, %v831_v60  ;;  %v587_v30 = vmul.f32 %v586_v12, %v584_v3 }
 0x1f9   :  { %v4568_v15 = vsub.s32 %v1812_v34, %v1815_v31  ;;  %v835_v11 = vor.u32 %v834_v47, %v833_v13  ;;  %v838_v9 = vor.u32 %v837_v28, %v836_v22  ;;  %v841_v29 = vor.u32 %v840_v58, %v839_v37  ;;  %v4572_v23 = vpop.eup %3368 }
 0x1fa   :  { %v844_v14 = vor.u32 %v843_v33, %v842_v27  ;;  %v864_v6 = vshll.u32 %v824_v59, 8  ;;  %v2071_v24 = vand.u32 8388607, %v5466_v53  ;;  %5577 = vst [vmem:[#allocation49_spill] sm:$0xff] %v4572_v23  ;;  %v847_v57 = vor.u32 %v846_v26, %v845_v61 }
 0x1fb   :  { %v1818_v32 = vsub.s32 0, %v4568_v15  ;;  %vm848_vm10 = vcmp.lt.s32.totalorder %v829_v16, 1  ;;  %vm851_vm2 = vcmp.lt.s32.totalorder %v829_v16, 4  ;;  %v832_v7 = vshrl.u32 %v5520_v48, %v831_v60 }
 0x1fc   :  { %v853_v34 = vsel %vm851_vm2, %v841_v29, 2102212464  ;;  %v856_v12 = vsel %vm848_vm10, %v835_v11, %v838_v9  ;;  %v2937_v3 = vadd.s32 4294967169, %v2068_v19  ;;  %v588_v13 = vxor.u32 2147483648, %v587_v30 }
 0x1fd   :  { %v2926_v22 = vmin.u32 %v1818_v32, %v4568_v15  ;;  %vm850_vm9 = vcmp.lt.s32.totalorder %v829_v16, 3  ;;  %v857_v59 = vsel %vm851_vm2, %v844_v14, 920167782  ;;  %vm849_vm12 = vcmp.lt.s32.totalorder %v829_v16, 2 }
 0x1fe   :  { %v852_v37 = vsel %vm848_vm10, %v832_v7, %v835_v11  ;;  %v858_v31 = vsel %vm850_vm9, %v841_v29, %v857_v59  ;;  %v860_v47 = vsel %vm848_vm10, %v838_v9, %v841_v29  ;;  %v854_v27 = vsel %vm850_vm9, %v838_v9, %v853_v34 }
 0x1ff   :  { %v1820_v28 = vclz %v2926_v22  ;;  %v859_v58 = vsel %vm849_vm12, %v856_v12, %v858_v31  ;;  %v861_v60 = vsel %vm851_vm2, %v847_v57, 1326507024  ;;  %v4584_v19 = vsel %vm4556_vm8, %v4158_v49, %v1941_v46 }
 0x200   :  { %v862_v33 = vsel %vm850_vm9, %v844_v14, %v861_v60  ;;  %v4586_v32 = vmul.u32.u64.low %v864_v6, %v859_v58  ;;  %v4587_v61 = vmul.u32.u64.high %v864_v6, %v859_v58, %v4586_v32  ;;  %v2072_v29 = vor.u32 8388608, %v2071_v24 }
 0x201   :  { %v2927_v26 = vadd.s32 4294967294, %v1820_v28  ;;  %v863_v11 = vsel %vm849_vm12, %v860_v47, %v862_v33  ;;  %v2074_v7 = vadd.s32 1, %v2937_v3  ;;  %v589_v9 = vsel %vm506_vm3, %v588_v13, %v587_v30 }
 0x202   :  { %v855_v57 = vsel %vm849_vm12, %v852_v37, %v854_v27  ;;  %v4594_v34 = vmul.u32.u64.low %v864_v6, %v863_v11  ;;  %v4595_v12 = vmul.u32.u64.high %v864_v6, %v863_v11, %v4594_v34  ;;  %3370 = vcosq.f32 %v4584_v19 }
 0x203   :  { %v1808_v46 = vadd.s32 %v4494_v25, %v4506_v4  ;;  %vm2928_vm10 = vcmp.lt.s32.totalorder %v2927_v26, 0  ;;  %vm2075_vm2 = vcmp.gt.s32.totalorder %v2074_v7, 0  ;;  %v874_v22 = vadd.s32 1, %v4587_v61 }
 0x204   :  { %v1823_v14 = vsel %vm2928_vm10, 0, %v2927_v26  ;;  %v2076_v24 = vsel %vm2075_vm2, %v2074_v7, 0  ;;  %v4605_v16 = vsel %vm4501_vm4, %v4262_v52, %v589_v9  ;;  %v871_v59 = vmul.u32 %v864_v6, %v855_v57 }
 0x205   :  { %v1824_v30 = vsub.s32 32, %v1823_v14  ;;  %v1828_v13 = vsub.s32 4294967266, %v1823_v14  ;;  %vm873_vm12 = vc.u32 %v4595_v12, %v4586_v32  ;;  %v2078_v25 = vand.u32 31, %v2076_v24 }
 0x206   :  { %v4609_v4 = vshll.u32 %v2072_v29, 8  ;;  %v715_v37 = vand.u32 2139095040, %v4537_v0  ;;  %v1825_v31 = vshll.u32 %v4568_v15, %v1823_v14  ;;  %v875_v27 = vsel %vm873_vm12, %v874_v22, %v4587_v61 }
 0x207   :  { %v1826_v47 = vshrl.u32 %v1808_v46, %v1824_v30  ;;  %v1829_v28 = vadd.s32 127, %v1828_v13  ;;  %vm818_vm3 = vcmp.lt.s32.totalorder %v4457_v1, 0  ;;  %v876_v58 = vadd.s32 %v875_v27, %v871_v59 }
 0x208   :  { %v2077_v60 = vshrl.u32 %v2076_v24, 5  ;;  %v2079_v33 = vsub.s32 32, %v2078_v25  ;;  %v2081_v6 = vshll.u32 %v5520_v48, %v2078_v25  ;;  %v2084_v29 = vshll.u32 %v5527_v8, %v2078_v25 }
 0x209   :  { %v1827_v26 = vor.u32 %v1826_v47, %v1825_v31  ;;  %v1830_v11 = vshll.u32 %v1829_v28, 23  ;;  %v2087_v7 = vshll.u32 %v5511_v55, %v2078_v25  ;;  %v877_v9 = vadd.s32 536870912, %v876_v58 }
 0x20a   :  { %v2082_v15 = vshrl.u32 %v5527_v8, %v2079_v33  ;;  %v2085_v57 = vshrl.u32 %v5511_v55, %v2079_v33  ;;  %v2090_v61 = vshll.u32 %v5512_v51, %v2078_v25  ;;  %v5578_v14 = vand.u32 2147483647, %v4457_v1 }
 0x20b   :  { %v1831_v34 = vor.u32 4788187, %v1830_v11  ;;  %v1834_v46 = vcvt.s32.f32 %v1827_v26  ;;  %v2088_v24 = vshrl.u32 %v5512_v51, %v2079_v33  ;;  %v2091_v30 = vshrl.u32 %v5529_v40, %v2079_v33 }
 0x20c   :  { %vm4623_vm9 = vcmp.le.f32.partialorder %v5578_v14, 0.7853982  ;;  %v878_v13 = vshrl.u32 %v877_v9, 30  ;;  %v2083_v59 = vor.u32 %v2082_v15, %v2081_v6  ;;  %v2086_v31 = vor.u32 %v2085_v57, %v2084_v29  ;;  %v4630_v28 = vpop.eup %3370 }
 0x20d   :  { %v2093_v47 = vshll.u32 %v5529_v40, %v2078_v25  ;;  %5581 = vst [vmem:[#allocation50_spill] sm:$0xff] %v4630_v28  ;;  %v1832_v27 = vand.u32 2147483647, %v1831_v34  ;;  %v2089_v26 = vor.u32 %v2088_v24, %v2087_v7  ;;  %v2092_v11 = vor.u32 %v2091_v30, %v2090_v61 }
 0x20e   :  { %v2094_v14 = vshrl.u32 %v5515_v42, %v2079_v33  ;;  %v879_v53 = vshll.u32 %v878_v13, 30  ;;  %v902_v3 = vsub.s32 4, %v878_v13  ;;  %vm2096_vm2 = vcmp.lt.s32.totalorder %v2077_v60, 1 }
 0x20f   :  { %v716_v23 = vshrl.u32 %v715_v37, 23  ;;  %v1835_v52 = vmul.f32 %v1834_v46, %v1832_v27  ;;  %v2080_v9 = vshrl.u32 %v5520_v48, %v2079_v33  ;;  %vm2099_vm12 = vcmp.lt.s32.totalorder %v2077_v60, 4 }
 0x210   :  { %v2095_v6 = vor.u32 %v2094_v14, %v2093_v47  ;;  %v4635_v29 = vsub.s32 %v876_v58, %v879_v53  ;;  %vm2097_vm1 = vcmp.lt.s32.totalorder %v2077_v60, 2  ;;  %v2101_v25 = vsel %vm2099_vm12, %v2089_v26, 2102212464 }
 0x211   :  { %v2104_v15 = vsel %vm2096_vm2, %v2083_v59, %v2086_v31  ;;  %v903_v7 = vsel %vm818_vm3, %v902_v3, %v878_v13  ;;  %vm2098_vm10 = vcmp.lt.s32.totalorder %v2077_v60, 3  ;;  %v2100_v57 = vsel %vm2096_vm2, %v2080_v9, %v2083_v59 }
 0x212   :  { %v2105_v61 = vsel %vm2099_vm12, %v2092_v11, 920167782  ;;  %v1836_v34 = vxor.u32 2147483648, %v1835_v52  ;;  %v882_v37 = vsub.s32 0, %v4635_v29  ;;  %v2102_v46 = vsel %vm2098_vm10, %v2086_v31, %v2101_v25 }
 0x213   :  { %v2106_v33 = vsel %vm2098_vm10, %v2089_v26, %v2105_v61  ;;  %v2108_v53 = vsel %vm2096_vm2, %v2086_v31, %v2089_v26  ;;  %v2109_v58 = vsel %vm2099_vm12, %v2095_v6, 1326507024  ;;  %v2885_v30 = vadd.s32 4294967169, %v716_v23 }
 0x214   :  { %v2107_v24 = vsel %vm2097_vm1, %v2104_v15, %v2106_v33  ;;  %v2890_v47 = vmin.u32 %v882_v37, %v4635_v29  ;;  %v905_v3 = vsel %vm4623_vm9, 0, %v903_v7  ;;  %v2110_v13 = vsel %vm2098_vm10, %v2092_v11, %v2109_v58 }
 0x215   :  { %v5582_v59 = vand.u32 2147483647, %v4537_v0  ;;  %v2103_v14 = vsel %vm2097_vm1, %v2100_v57, %v2102_v46  ;;  %v2111_v9 = vsel %vm2097_vm1, %v2108_v53, %v2110_v13  ;;  %vm5583_vm2 = vcmp.lt.s32.totalorder %v4349_v63, 0 }
 0x216   :  { %v4652_v25 = vmul.u32.u64.low %v4609_v4, %v2107_v24  ;;  %v4653_v15 = vmul.u32.u64.high %v4609_v4, %v2107_v24, %v4652_v25  ;;  %v1837_v23 = vsel %vm5583_vm2, %v1836_v34, %v1835_v52  ;;  %v884_v31 = vclz %v2890_v47 }
 0x217   :  { %v719_v27 = vand.u32 8388607, %v5582_v59  ;;  %v4659_v26 = vmul.u32.u64.low %v4609_v4, %v2111_v9  ;;  %v4660_v6 = vmul.u32.u64.high %v4609_v4, %v2111_v9, %v4659_v26  ;;  %3372 = vsinq.f32 %v4584_v19 }
 0x218   :  { %v5584_v60 = vsel %vm4501_vm4, 0, %v4520_v39  ;;  %v5585_v7 = vand.u32 2147483647, %v4349_v63  ;;  %v722_v52 = vadd.s32 1, %v2885_v30  ;;  %3374 = vcosq.f32 %v4605_v16 }
 0x219   :  { %v4667_v11 = vadd.s32 3, %v5584_v60  ;;  %v872_v61 = vadd.s32 %v4586_v32, %v4595_v12  ;;  %v2891_v34 = vadd.s32 4294967294, %v884_v31  ;;  %v4678_v19 = vadd.s32 3, %v905_v3 }
 0x21a   :  { %vm4671_vm1 = vcmp.le.f32.partialorder %v5585_v7, 0.7853982  ;;  %v2119_v39 = vmul.u32 %v4609_v4, %v2103_v14  ;;  %v2122_v37 = vadd.s32 1, %v4653_v15  ;;  %vm723_vm4 = vcmp.gt.s32.totalorder %v722_v52, 0 }
 0x21b   :  { %v4683_v56 = vsel %vm4671_vm1, %v4349_v63, %v1837_v23  ;;  %vm2892_vm10 = vcmp.lt.s32.totalorder %v2891_v34, 0  ;;  %vm2121_vm12 = vc.u32 %v4660_v6, %v4652_v25  ;;  %v720_v46 = vor.u32 8388608, %v719_v27 }
 0x21c   :  { %v724_v33 = vsel %vm723_vm4, %v722_v52, 0  ;;  %v887_v32 = vsel %vm2892_vm10, 0, %v2891_v34  ;;  %v2123_v12 = vsel %vm2121_vm12, %v2122_v37, %v4653_v15  ;;  %v4692_v53 = vadd.f32 %v4144_v43, %v3974_v44 }
 0x21d   :  { %v726_v24 = vand.u32 31, %v724_v33  ;;  %v888_v58 = vsub.s32 32, %v887_v32  ;;  %v892_v30 = vsub.s32 4294967266, %v887_v32  ;;  %v2124_v4 = vadd.s32 %v2123_v12, %v2119_v39 }
 0x21e   :  { %v725_v47 = vshrl.u32 %v724_v33, 5  ;;  %v889_v3 = vshll.u32 %v4635_v29, %v887_v32  ;;  %v4707_v33 = vshll.u32 %v720_v46, 8  ;;  %3376 = vsinq.f32 %v4605_v16 }
 0x21f   :  { %v727_v13 = vsub.s32 32, %v726_v24  ;;  %v729_v59 = vshll.u32 %v5520_v48, %v726_v24  ;;  %v732_v27 = vshll.u32 %v5527_v8, %v726_v24  ;;  %v890_v14 = vshrl.u32 %v872_v61, %v888_v58 }
 0x220   :  { %v893_v9 = vadd.s32 127, %v892_v30  ;;  %v2125_v23 = vadd.s32 536870912, %v2124_v4  ;;  %v735_v15 = vshll.u32 %v5511_v55, %v726_v24  ;;  %v738_v26 = vshll.u32 %v5512_v51, %v726_v24 }
 0x221   :  { %v730_v31 = vshrl.u32 %v5527_v8, %v727_v13  ;;  %v733_v44 = vshrl.u32 %v5511_v55, %v727_v13  ;;  %v736_v43 = vshrl.u32 %v5512_v51, %v727_v13  ;;  %v891_v60 = vor.u32 %v890_v14, %v889_v3  ;;  %v4705_v34 = vpop.eup %3372 }
 0x222   :  { %v894_v29 = vshll.u32 %v893_v9, 23  ;;  %v4702_v7 = vshrl.u32 %v2125_v23, 30  ;;  %v739_v52 = vshrl.u32 %v5529_v40, %v727_v13  ;;  %v4709_v32 = vpop.eup %3374  ;;  %v728_v30 = vshrl.u32 %v5520_v48, %v727_v13 }
 0x223   :  { %v731_v61 = vor.u32 %v730_v31, %v729_v59  ;;  %v734_v39 = vor.u32 %v733_v44, %v732_v27  ;;  %v737_v37 = vor.u32 %v736_v43, %v735_v15  ;;  %v898_v14 = vcvt.s32.f32 %v891_v60 }
 0x224   :  { %v895_v12 = vor.u32 4788187, %v894_v29  ;;  %v2127_v58 = vshll.u32 %v4702_v7, 30  ;;  %v740_v3 = vor.u32 %v739_v52, %v738_v26  ;;  %v741_v9 = vshll.u32 %v5529_v40, %v726_v24 }
 0x225   :  { %v742_v23 = vshrl.u32 %v5515_v42, %v727_v13  ;;  %vm744_vm2 = vcmp.lt.s32.totalorder %v725_v47, 1  ;;  %vm746_vm4 = vcmp.lt.s32.totalorder %v725_v47, 3  ;;  %vm747_vm10 = vcmp.lt.s32.totalorder %v725_v47, 4 }
 0x226   :  { %v896_v28 = vand.u32 2147483647, %v895_v12  ;;  %v4715_v59 = vsub.s32 %v2124_v4, %v2127_v58  ;;  %v749_v27 = vsel %vm747_vm10, %v737_v37, 2102212464  ;;  %v752_v15 = vsel %vm744_vm2, %v731_v61, %v734_v39 }
 0x227   :  { %v743_v46 = vor.u32 %v742_v23, %v741_v9  ;;  %v753_v31 = vsel %vm747_vm10, %v740_v3, 920167782  ;;  %vm745_vm12 = vcmp.lt.s32.totalorder %v725_v47, 2  ;;  %v756_v13 = vsel %vm744_vm2, %v734_v39, %v737_v37 }
 0x228   :  { %v899_v44 = vmul.f32 %v898_v14, %v896_v28  ;;  %v2130_v43 = vsub.s32 0, %v4715_v59  ;;  %v754_v26 = vsel %vm746_vm4, %v737_v37, %v753_v31  ;;  %v5473_v4 = vand.u32 2147483647, %v4692_v53 }
 0x229   :  { %v755_v24 = vsel %vm745_vm12, %v752_v15, %v754_v26  ;;  %v757_v60 = vsel %vm747_vm10, %v743_v46, 1326507024  ;;  %v748_v52 = vsel %vm744_vm2, %v728_v30, %v731_v61  ;;  %v750_v12 = vsel %vm746_vm4, %v734_v39, %v749_v27 }
 0x22a   :  { %v2938_v29 = vmin.u32 %v2130_v43, %v4715_v59  ;;  %v758_v28 = vsel %vm746_vm4, %v740_v3, %v757_v60  ;;  %v900_v58 = vxor.u32 2147483648, %v899_v44  ;;  %3378 = vcosq.f32 %v4683_v56 }
 0x22b   :  { %v759_v14 = vsel %vm745_vm12, %v756_v13, %v758_v28  ;;  %v4729_v9 = vmul.u32.u64.low %v4707_v33, %v755_v24  ;;  %v4730_v23 = vmul.u32.u64.high %v4707_v33, %v755_v24, %v4729_v9  ;;  %v751_v61 = vsel %vm745_vm12, %v748_v52, %v750_v12 }
 0x22c   :  { %v2132_v37 = vclz %v2938_v29  ;;  %v4734_v46 = vmul.u32.u64.low %v4707_v33, %v759_v14  ;;  %v4735_v15 = vmul.u32.u64.high %v4707_v33, %v759_v14, %v4734_v46  ;;  %v1963_v39 = vand.u32 2139095040, %v4692_v53 }
 0x22d   :  { %v4742_v30 = vadd.f32 %v4277_v50, %v4214_v62  ;;  %3380 = vsinq.f32 %v4683_v56  ;;  %v4746_v3 = vand.u32 3, %v4678_v19  ;;  %v4750_v27 = vadd.f32 %v4357_v10, %v4001_v18 }
 0x22e   :  { %v2939_v16 = vadd.s32 4294967294, %v2132_v37  ;;  %v901_v47 = vsel %vm818_vm3, %v900_v58, %v899_v44  ;;  %v770_v31 = vadd.s32 1, %v4730_v23  ;;  %v1964_v43 = vshrl.u32 %v1963_v39, 23 }
 0x22f   :  { %5588 = vst [vmem:[#allocation51_spill] sm:$0xff] %v4746_v3  ;;  %v1967_v62 = vand.u32 8388607, %v5473_v4  ;;  %v2120_v50 = vadd.s32 %v4652_v25, %v4660_v6  ;;  %v767_v19 = vmul.u32 %v4707_v33, %v751_v61  ;;  %vm769_vm4 = vc.u32 %v4735_v15, %v4729_v9 }
 0x230   :  { %vm2940_vm2 = vcmp.lt.s32.totalorder %v2939_v16, 0  ;;  %vm5474_vm10 = vcmp.lt.s32.totalorder %v4537_v0, 0  ;;  %v771_v18 = vsel %vm769_vm4, %v770_v31, %v4730_v23  ;;  %v2933_v10 = vadd.s32 4294967169, %v1964_v43 }
 0x231   :  { %v2135_v56 = vsel %vm2940_vm2, 0, %v2939_v16  ;;  %v5472_v44 = vand.u32 2147483647, %v4742_v30  ;;  %v904_v26 = vsel %vm4623_vm9, %v4457_v1, %v901_v47  ;;  %v772_v25 = vadd.s32 %v771_v18, %v767_v19 }
 0x232   :  { %v2136_v24 = vsub.s32 32, %v2135_v56  ;;  %v2140_v13 = vsub.s32 4294967266, %v2135_v56  ;;  %v1968_v6 = vor.u32 8388608, %v1967_v62  ;;  %v1970_v60 = vadd.s32 1, %v2933_v10 }
 0x233   :  { %v2275_v33 = vand.u32 2139095040, %v4742_v30  ;;  %v4770_v29 = vadd.f32 %v4452_v41, %v4030_v2  ;;  %v2137_v52 = vshll.u32 %v4715_v59, %v2135_v56  ;;  %v5589_v58 = vand.u32 2147483647, %v4537_v0  ;;  %v4783_v2 = vpop.eup %3376 }
 0x234   :  { %v2138_v12 = vshrl.u32 %v2120_v50, %v2136_v24  ;;  %v2141_v28 = vadd.s32 127, %v2140_v13  ;;  %v773_v14 = vadd.s32 536870912, %v772_v25  ;;  %3382 = vcosq.f32 %v904_v26  ;;  %v4785_v39 = vpop.eup %3378 }
 0x235   :  { %vm4775_vm3 = vcmp.le.f32.partialorder %v5589_v58, 0.7853982  ;;  %vm1971_vm9 = vcmp.gt.s32.totalorder %v1970_v60, 0  ;;  %v2276_v23 = vshrl.u32 %v2275_v33, 23  ;;  %v4781_v37 = vand.u32 8388607, %v5472_v44 }
 0x236   :  { %v2139_v41 = vor.u32 %v2138_v12, %v2137_v52  ;;  %v2142_v59 = vshll.u32 %v2141_v28, 23  ;;  %v774_v46 = vshrl.u32 %v773_v14, 30  ;;  %v1972_v61 = vsel %vm1971_vm9, %v1970_v60, 0 }
 0x237   :  { %3384 = vsinq.f32 %v904_v26  ;;  %vm5475_vm12 = vcmp.lt.s32.totalorder %v4515_v54, 0  ;;  %v4789_v16 = vadd.s32 %v4729_v9, %v4735_v15  ;;  %v1974_v47 = vand.u32 31, %v1972_v61  ;;  %v4793_v43 = vpop.eup %3380 }
 0x238   :  { %v4791_v31 = vshll.u32 %v1968_v6, 8  ;;  %v2143_v62 = vor.u32 4788187, %v2142_v59  ;;  %v775_v50 = vshll.u32 %v774_v46, 30  ;;  %v798_v19 = vsub.s32 4, %v774_v46 }
 0x239   :  { %v1973_v18 = vshrl.u32 %v1972_v61, 5  ;;  %v1975_v10 = vsub.s32 32, %v1974_v47  ;;  %v2945_v24 = vadd.s32 4294967169, %v2276_v23  ;;  %v5592_v13 = vand.u32 2147483647, %v4515_v54 }
 0x23a   :  { %v5593_v9 = vmov 0  ;;  %v2144_v15 = vand.u32 2147483647, %v2143_v62  ;;  %v2146_v6 = vcvt.s32.f32 %v2139_v41  ;;  %v4803_v60 = vsub.s32 %v772_v25, %v775_v50 }
 0x23b   :  { %vm4799_vm2 = vcmp.le.f32.partialorder %v5592_v13, 0.7853982  ;;  %v799_v33 = vsel %vm5474_vm10, %v798_v19, %v774_v46  ;;  %v1977_v52 = vshll.u32 %v5520_v48, %v1974_v47  ;;  %v1978_v12 = vshrl.u32 %v5527_v8, %v1975_v10 }
 0x23c   :  { %v5594_v9 = vsel %vm4799_vm2, 4294967295, %v5593_v9  ;;  %v1980_v28 = vshll.u32 %v5527_v8, %v1974_v47  ;;  %v1981_v58 = vshrl.u32 %v5511_v55, %v1975_v10  ;;  %v2147_v14 = vmul.f32 %v2146_v6, %v2144_v15 }
 0x23d   :  { %5595 = vst [vmem:[#allocation52_spill] sm:$0xff] %v5594_v9  ;;  %v778_v23 = vsub.s32 0, %v4803_v60  ;;  %v1983_v59 = vshll.u32 %v5511_v55, %v1974_v47  ;;  %v1984_v41 = vshrl.u32 %v5512_v51, %v1975_v10  ;;  %v801_v25 = vsel %vm4775_vm3, 0, %v799_v33 }
 0x23e   :  { %v1979_v61 = vor.u32 %v1978_v12, %v1977_v52  ;;  %v1986_v46 = vshll.u32 %v5512_v51, %v1974_v47  ;;  %v1987_v62 = vshrl.u32 %v5529_v40, %v1975_v10  ;;  %v2148_v50 = vxor.u32 2147483648, %v2147_v14  ;;  %v4819_v15 = vpop.eup %3382 }
 0x23f   :  { %v2886_v19 = vmin.u32 %v778_v23, %v4803_v60  ;;  %v1982_v13 = vor.u32 %v1981_v58, %v1980_v28  ;;  %v1985_v44 = vor.u32 %v1984_v41, %v1983_v59  ;;  %5596 = vst [vmem:[#allocation53_spill] sm:$0xff] %v4819_v15  ;;  %v1976_v6 = vshrl.u32 %v5520_v48, %v1975_v10 }
 0x240   :  { %v1988_v4 = vor.u32 %v1987_v62, %v1986_v46  ;;  %v1989_v56 = vshll.u32 %v5529_v40, %v1974_v47  ;;  %v1990_v26 = vshrl.u32 %v5515_v42, %v1975_v10  ;;  %v2149_v33 = vsel %vm5475_vm12, %v2148_v50, %v2147_v14 }
 0x241   :  { %v780_v52 = vclz %v2886_v19  ;;  %vm1992_vm4 = vcmp.lt.s32.totalorder %v1973_v18, 1  ;;  %vm1995_vm9 = vcmp.lt.s32.totalorder %v1973_v18, 4  ;;  %v4826_v12 = vpop.eup %3384  ;;  %vm1994_vm10 = vcmp.lt.s32.totalorder %v1973_v18, 3 }
 0x242   :  { %5597 = vst [vmem:[#allocation54_spill] sm:$0xff] %v4826_v12  ;;  %v1991_v23 = vor.u32 %v1990_v26, %v1989_v56  ;;  %v1996_v28 = vsel %vm1992_vm4, %v1976_v6, %v1979_v61  ;;  %v1997_v58 = vsel %vm1995_vm9, %v1985_v44, 2102212464  ;;  %v805_v41 = vadd.s32 3, %v801_v25 }
 0x243   :  { %v2887_v59 = vadd.s32 4294967294, %v780_v52  ;;  %v1998_v46 = vsel %vm1994_vm10, %v1982_v13, %v1997_v58  ;;  %v2000_v47 = vsel %vm1992_vm4, %v1979_v61, %v1982_v13  ;;  %v4833_v10 = vsel %vm4799_vm2, %v4515_v54, %v2149_v33 }
 0x244   :  { %vm1993_vm12 = vcmp.lt.s32.totalorder %v1973_v18, 2  ;;  %v2001_v14 = vsel %vm1995_vm9, %v1988_v4, 920167782  ;;  %v2004_v62 = vsel %vm1992_vm4, %v1982_v13, %v1985_v44  ;;  %v2005_v50 = vsel %vm1995_vm9, %v1991_v23, 1326507024 }
 0x245   :  { %vm2888_vm8 = vcmp.lt.s32.totalorder %v2887_v59, 0  ;;  %v1999_v56 = vsel %vm1993_vm12, %v1996_v28, %v1998_v46  ;;  %v2002_v26 = vsel %vm1994_vm10, %v1985_v44, %v2001_v14  ;;  %v2006_v6 = vsel %vm1994_vm10, %v1988_v4, %v2005_v50 }
 0x246   :  { %v783_v19 = vsel %vm2888_vm8, 0, %v2887_v59  ;;  %v2003_v25 = vsel %vm1993_vm12, %v2000_v47, %v2002_v26  ;;  %v2282_v61 = vadd.s32 1, %v2945_v24  ;;  %v2007_v15 = vsel %vm1993_vm12, %v2004_v62, %v2006_v6  ;;  %v40_v26 = vld [vmem:[#allocation2 + $0x60] sm:$0xff] }
 0x247   :  { %v784_v52 = vsub.s32 32, %v783_v19  ;;  %v785_v58 = vshll.u32 %v4803_v60, %v783_v19  ;;  %v788_v33 = vsub.s32 4294967266, %v783_v19  ;;  %v2171_v4 = vand.u32 2139095040, %v4750_v27 }
 0x248   :  { %v4841_v12 = vmul.u32.u64.low %v4791_v31, %v2007_v15  ;;  %v4842_v3 = vmul.u32.u64.high %v4791_v31, %v2007_v15, %v4841_v12  ;;  %v4845_v13 = vmul.u32.u64.low %v4791_v31, %v2003_v25  ;;  %v4846_v28 = vmul.u32.u64.high %v4791_v31, %v2003_v25, %v4845_v13 }
 0x249   :  { %v786_v44 = vshrl.u32 %v4789_v16, %v784_v52  ;;  %v789_v23 = vadd.s32 127, %v788_v33  ;;  %vm2283_vm8 = vcmp.gt.s32.totalorder %v2282_v61, 0  ;;  %3386 = vcosq.f32 %v4833_v10 }
 0x24a   :  { %v4852_v18 = vand.u32 3, %v805_v41  ;;  %v2284_v24 = vsel %vm2283_vm8, %v2282_v61, 0  ;;  %v5599_v60 = vor.u32 8388608, %v4781_v37  ;;  %v5600_v47 = vand.u32 2147483647, %v4750_v27  ;;  %v41_v37 = vld [vmem:[#allocation2 + $0x68] sm:$0xff] }
 0x24b   :  { %v787_v12 = vor.u32 %v786_v44, %v785_v58  ;;  %v790_v59 = vshll.u32 %v789_v23, 23  ;;  %v2286_v46 = vand.u32 31, %v2284_v24  ;;  %v2015_v16 = vmul.u32 %v4791_v31, %v1999_v56 }
 0x24c   :  { %5598 = vst [vmem:[#allocation55_spill] sm:$0xff] %v4852_v18  ;;  %v4856_v15 = vshll.u32 %v5599_v60, 8  ;;  %v4860_v14 = vand.u32 8388607, %v5600_v47  ;;  %vm2017_vm10 = vc.u32 %v4842_v3, %v4845_v13  ;;  %v2018_v41 = vadd.s32 1, %v4846_v28 }
 0x24d   :  { %v791_v50 = vor.u32 4788187, %v790_v59  ;;  %v2285_v19 = vshrl.u32 %v2284_v24, 5  ;;  %v2287_v25 = vsub.s32 32, %v2286_v46  ;;  %v2172_v6 = vshrl.u32 %v2171_v4, 23 }
 0x24e   :  { %vm5601_vm12 = vcmask 72704   ;;  %v794_v61 = vcvt.s32.f32 %v787_v12  ;;  %v2019_v52 = vsel %vm2017_vm10, %v2018_v41, %v4846_v28  ;;  %v2289_v31 = vshll.u32 %v5520_v48, %v2286_v46 }
 0x24f   :  { %3065 = vmatprep.mubr.msk.f32.mxu0 %vm5601_vm12, %v40_v26  ;;  %v2292_v56 = vshll.u32 %v5527_v8, %v2286_v46  ;;  %vm5602_vm4 = vmmov %vm5601_vm12  ;;  %v792_v58 = vand.u32 2147483647, %v791_v50  ;;  %v2020_v33 = vadd.s32 %v2019_v52, %v2015_v16  ;;  %v2290_v44 = vshrl.u32 %v5527_v8, %v2287_v25 }
 0x250   :  { %3066 = vmatmul.mubr.msk.f32.gmra.mrb[12].mxu0 %vm5602_vm4, %v41_v37  ;;  %v2295_v23 = vshll.u32 %v5511_v55, %v2286_v46  ;;  %v2293_v24 = vshrl.u32 %v5511_v55, %v2287_v25  ;;  %v2296_v4 = vshrl.u32 %v5512_v51, %v2287_v25  ;;  %v2298_v60 = vshll.u32 %v5512_v51, %v2286_v46 }
 0x251   :  { %v2299_v28 = vshrl.u32 %v5529_v40, %v2287_v25  ;;  %v795_v12 = vmul.f32 %v794_v61, %v792_v58  ;;  %v2021_v59 = vadd.s32 536870912, %v2020_v33  ;;  %v2291_v47 = vor.u32 %v2290_v44, %v2289_v31  ;;  %v42_v44 = vld [vmem:[#allocation2 + $0x70] sm:$0xff] }
 0x252   :  { %v2302_v41 = vshrl.u32 %v5515_v42, %v2287_v25  ;;  %v2294_v26 = vor.u32 %v2293_v24, %v2292_v56  ;;  %v2297_v37 = vor.u32 %v2296_v4, %v2295_v23  ;;  %v2301_v50 = vshll.u32 %v5529_v40, %v2286_v46  ;;  %v43_v4 = vld [vmem:[#allocation2 + $0x78] sm:$0xff] }
 0x253   :  { %v2300_v16 = vor.u32 %v2299_v28, %v2298_v60  ;;  %v796_v52 = vxor.u32 2147483648, %v795_v12  ;;  %v4880_v62 = vshrl.u32 %v2021_v59, 30  ;;  %v2288_v1 = vshrl.u32 %v5520_v48, %v2287_v25  ;;  %v4883_v18 = vpop.eup %3386 }
 0x254   :  { %vm2304_vm9 = vcmp.lt.s32.totalorder %v2285_v19, 1  ;;  %5603 = vst [vmem:[#allocation56_spill] sm:$0xff] %v4883_v18  ;;  %v2303_v9 = vor.u32 %v2302_v41, %v2301_v50  ;;  %vm2306_vm8 = vcmp.lt.s32.totalorder %v2285_v19, 3  ;;  %vm2307_vm10 = vcmp.lt.s32.totalorder %v2285_v19, 4 }
 0x255   :  { %v2312_v61 = vsel %vm2304_vm9, %v2291_v47, %v2294_v26  ;;  %vm5604_vm12 = vcmp.lt.s32.totalorder %v4537_v0, 0  ;;  %v2023_v56 = vshll.u32 %v4880_v62, 30  ;;  %v2309_v46 = vsel %vm2307_vm10, %v2297_v37, 2102212464 }
 0x256   :  { %v797_v31 = vsel %vm5604_vm12, %v796_v52, %v795_v12  ;;  %v2313_v58 = vsel %vm2307_vm10, %v2300_v16, 920167782  ;;  %vm2305_vm4 = vcmp.lt.s32.totalorder %v2285_v19, 2  ;;  %v2308_v25 = vsel %vm2304_vm9, %v2288_v1, %v2291_v47 }
 0x257   :  { %v2310_v23 = vsel %vm2306_vm8, %v2294_v26, %v2309_v46  ;;  %v2314_v24 = vsel %vm2306_vm8, %v2297_v37, %v2313_v58  ;;  %vm5605_vm2 = vcmask 72704   ;;  %3388 = vsinq.f32 %v4833_v10 }
 0x258   :  { %3068 = vmatprep.mubr.msk.f32.mxu0 %vm5605_vm2, %v42_v44  ;;  %v4896_v60 = vsub.s32 %v2020_v33, %v2023_v56  ;;  %v2315_v28 = vsel %vm2305_vm4, %v2312_v61, %v2314_v24  ;;  %v2316_v12 = vsel %vm2304_vm9, %v2294_v26, %v2297_v37  ;;  %vm5606_vm12 = vmmov %vm5605_vm2  ;;  %v800_v1 = vsel %vm4775_vm3, %v4537_v0, %v797_v31 }
 0x259   :  { %3069 = vmatmul.mubr.msk.f32.gmra.mrb[14].mxu0 %vm5606_vm12, %v43_v4  ;;  %v2317_v59 = vsel %vm2307_vm10, %v2303_v9, 1326507024  ;;  %v4906_v47 = vmul.u32.u64.low %v4856_v15, %v2315_v28  ;;  %v4907_v41 = vmul.u32.u64.high %v4856_v15, %v2315_v28, %v4906_v47  ;;  %v2311_v33 = vsel %vm2305_vm4, %v2308_v25, %v2310_v23 }
 0x25a   :  { %v2026_v10 = vsub.s32 0, %v4896_v60  ;;  %v2318_v50 = vsel %vm2306_vm8, %v2300_v16, %v2317_v59  ;;  %v2941_v26 = vadd.s32 4294967169, %v2172_v6  ;;  %v2176_v52 = vor.u32 8388608, %v4860_v14 }
 0x25b   :  { %v2319_v37 = vsel %vm2305_vm4, %v2316_v12, %v2318_v50  ;;  %v2379_v22 = vand.u32 2139095040, %v4770_v29  ;;  %v5607_v9 = vand.u32 2147483647, %v4770_v29  ;;  %v2016_v16 = vadd.s32 %v4845_v13, %v4842_v3 }
 0x25c   :  { %v2934_v31 = vmin.u32 %v2026_v10, %v4896_v60  ;;  %v4920_v56 = vmul.u32.u64.low %v4856_v15, %v2319_v37  ;;  %v4921_v46 = vmul.u32.u64.high %v4856_v15, %v2319_v37, %v4920_v56  ;;  %v2178_v58 = vadd.s32 1, %v2941_v26 }
 0x25d   :  { %v2383_v61 = vand.u32 8388607, %v5607_v9  ;;  %v2330_v19 = vadd.s32 1, %v4907_v41  ;;  %v2380_v6 = vshrl.u32 %v2379_v22, 23  ;;  %3390 = vcosq.f32 %v800_v1 }
 0x25e   :  { %v2028_v14 = vclz %v2934_v31  ;;  %vm2179_vm3 = vcmp.gt.s32.totalorder %v2178_v58, 0  ;;  %v1006_v25 = vsub.s32 4, %v3726_v45  ;;  %3392 = vsinq.f32 %v800_v1 }
 0x25f   :  { %v2384_v44 = vor.u32 8388608, %v2383_v61  ;;  %v2327_v23 = vmul.u32 %v4856_v15, %v2311_v33  ;;  %v2180_v24 = vsel %vm2179_vm3, %v2178_v58, 0  ;;  %v2949_v4 = vadd.s32 4294967169, %v2380_v6 }
 0x260   :  { %v2935_v28 = vadd.s32 4294967294, %v2028_v14  ;;  %vm2329_vm2 = vc.u32 %v4921_v46, %v4906_v47  ;;  %v4930_v12 = vshrl.u32 %v2180_v24, 5  ;;  %v4932_v3 = vshll.u32 %v2176_v52, 8 }
 0x261   :  { %v2331_v13 = vsel %vm2329_vm2, %v2330_v19, %v4907_v41  ;;  %v2182_v59 = vand.u32 31, %v2180_v24  ;;  %v4935_v10 = vadd.s32 1, %v2949_v4  ;;  %v4937_v50 = vshll.u32 %v2384_v44, 8  ;;  %v4939_v1 = vpop.eup %3388 }
 0x262   :  { %5608 = vst [vmem:[#allocation57_spill] sm:$0xff] %v4939_v1  ;;  %vm2936_vm9 = vcmp.lt.s32.totalorder %v2935_v28, 0  ;;  %v2332_v15 = vadd.s32 %v2331_v13, %v2327_v23  ;;  %vm2200_vm8 = vcmp.lt.s32.totalorder %v4930_v12, 1  ;;  %vm5609_vm10 = vcmp.lt.s32.totalorder %v3582_v38, 0 }
 0x263   :  { %v4945_v33 = vsel %vm5609_vm10, %v1006_v25, %v3726_v45  ;;  %v2031_v26 = vsel %vm2936_vm9, 0, %v2935_v28  ;;  %v2183_v37 = vsub.s32 32, %v2182_v59  ;;  %v2185_v41 = vshll.u32 %v5520_v48, %v2182_v59 }
 0x264   :  { %v2188_v52 = vshll.u32 %v5527_v8, %v2182_v59  ;;  %v2032_v22 = vsub.s32 32, %v2031_v26  ;;  %v2033_v9 = vshll.u32 %v4896_v60, %v2031_v26  ;;  %v2036_v61 = vsub.s32 4294967266, %v2031_v26 }
 0x265   :  { %v2333_v31 = vadd.s32 536870912, %v2332_v15  ;;  %v2184_v56 = vshrl.u32 %v5520_v48, %v2183_v37  ;;  %v2186_v58 = vshrl.u32 %v5527_v8, %v2183_v37  ;;  %v2189_v19 = vshrl.u32 %v5511_v55, %v2183_v37 }
 0x266   :  { %v2191_v45 = vshll.u32 %v5511_v55, %v2182_v59  ;;  %v2034_v6 = vshrl.u32 %v2016_v16, %v2032_v22  ;;  %v2037_v44 = vadd.s32 127, %v2036_v61  ;;  %v2192_v25 = vshrl.u32 %v5512_v51, %v2183_v37 }
 0x267   :  { %v4954_v14 = vshrl.u32 %v2333_v31, 30  ;;  %v2187_v23 = vor.u32 %v2186_v58, %v2185_v41  ;;  %v2190_v24 = vor.u32 %v2189_v19, %v2188_v52  ;;  %v2194_v60 = vshll.u32 %v5512_v51, %v2182_v59  ;;  %v4959_v28 = vpop.eup %3390 }
 0x268   :  { %v2195_v4 = vshrl.u32 %v5529_v40, %v2183_v37  ;;  %v2035_v13 = vor.u32 %v2034_v6, %v2033_v9  ;;  %v2038_v26 = vshll.u32 %v2037_v44, 23  ;;  %v2193_v1 = vor.u32 %v2192_v25, %v2191_v45  ;;  %v4962_v54 = vpop.eup %3392 }
 0x269   :  { %5610 = vst [vmem:[#allocation58_spill] sm:$0xff] %v4954_v14  ;;  %v2335_v18 = vshll.u32 %v4954_v14, 30  ;;  %vm5492_vm4 = vcmp.lt.s32.totalorder %v4692_v53, 0  ;;  %v2197_v22 = vshll.u32 %v5529_v40, %v2182_v59  ;;  %v2198_v41 = vshrl.u32 %v5515_v42, %v2183_v37 }
 0x26a   :  { %v2196_v16 = vor.u32 %v2195_v4, %v2194_v60  ;;  %vm2202_vm12 = vcmp.lt.s32.totalorder %v4930_v12, 3  ;;  %v2039_v52 = vor.u32 4788187, %v2038_v26  ;;  %v2042_v61 = vcvt.s32.f32 %v2035_v13 }
 0x26b   :  { %v4968_v31 = vsub.s32 %v2332_v15, %v2335_v18  ;;  %vm2203_vm3 = vcmp.lt.s32.totalorder %v4930_v12, 4  ;;  %v5611_v9 = vand.u32 2147483647, %v4692_v53  ;;  %v2199_v19 = vor.u32 %v2198_v41, %v2197_v22 }
 0x26c   :  { %v2204_v59 = vsel %vm2200_vm8, %v2184_v56, %v2187_v23  ;;  %v2205_v45 = vsel %vm2203_vm3, %v2193_v1, 2102212464  ;;  %v2208_v37 = vsel %vm2200_vm8, %v2187_v23, %v2190_v24  ;;  %v2040_v6 = vand.u32 2147483647, %v2039_v52 }
 0x26d   :  { %vm4973_vm2 = vcmp.le.f32.partialorder %v5611_v9, 0.7853982  ;;  %v2338_v18 = vsub.s32 0, %v4968_v31  ;;  %v2206_v15 = vsel %vm2202_vm12, %v2190_v24, %v2205_v45  ;;  %v2209_v44 = vsel %vm2203_vm3, %v2196_v16, 920167782 }
 0x26e   :  { %vm2201_vm9 = vcmp.lt.s32.totalorder %v4930_v12, 2  ;;  %v2210_v25 = vsel %vm2202_vm12, %v2193_v1, %v2209_v44  ;;  %v2212_v60 = vsel %vm2200_vm8, %v2190_v24, %v2193_v1  ;;  %v2213_v56 = vsel %vm2203_vm3, %v2199_v19, 1326507024 }
 0x26f   :  { %v2043_v4 = vmul.f32 %v2042_v61, %v2040_v6  ;;  %v2946_v13 = vmin.u32 %v2338_v18, %v4968_v31  ;;  %v2211_v23 = vsel %vm2201_vm9, %v2208_v37, %v2210_v25  ;;  %v2214_v26 = vsel %vm2202_vm12, %v2196_v16, %v2213_v56 }
 0x270   :  { %v2207_v22 = vsel %vm2201_vm9, %v2204_v59, %v2206_v15  ;;  %v2215_v41 = vsel %vm2201_vm9, %v2212_v60, %v2214_v26  ;;  %v4993_v52 = vmul.u32.u64.low %v4932_v3, %v2211_v23  ;;  %v4994_v9 = vmul.u32.u64.high %v4932_v3, %v2211_v23, %v4993_v52 }
 0x271   :  { %v2044_v45 = vxor.u32 2147483648, %v2043_v4  ;;  %v2340_v44 = vclz %v2946_v13  ;;  %v4998_v14 = vmul.u32.u64.low %v4932_v3, %v2215_v41  ;;  %v4999_v1 = vmul.u32.u64.high %v4932_v3, %v2215_v41, %v4998_v14 }
 0x272   :  { %v2328_v24 = vadd.s32 %v4906_v47, %v4921_v46  ;;  %vm2387_vm8 = vcmp.gt.s32.totalorder %v4935_v10, 0  ;;  %v1009_v12 = vsel %vm3930_vm14, 0, %v4945_v33  ;;  %v1017_v16 = vxor.u32 2147483648, %v4114_v17  ;;  %v5614_v46 = vld [vmem:[#allocation11_spill] sm:$0xff] }
 0x273   :  { %v2045_v61 = vsel %vm5492_vm4, %v2044_v45, %v2043_v4  ;;  %v2947_v19 = vadd.s32 4294967294, %v2340_v44  ;;  %v2223_v59 = vmul.u32 %v4932_v3, %v2207_v22  ;;  %v2388_v37 = vsel %vm2387_vm8, %v4935_v10, 0 }
 0x274   :  { %v2226_v14 = vadd.s32 1, %v4994_v9  ;;  %v2390_v6 = vand.u32 31, %v2388_v37  ;;  %v1020_v47 = vxor.u32 2147483648, %v4108_v5  ;;  %v1110_v18 = vsub.s32 4, %v5614_v46 }
 0x275   :  { %v5018_v21 = vsel %vm4973_vm2, %v4692_v53, %v2045_v61  ;;  %vm2948_vm14 = vcmp.lt.s32.totalorder %v2947_v19, 0  ;;  %vm2225_vm10 = vc.u32 %v4999_v1, %v4993_v52  ;;  %v1013_v33 = vadd.s32 3, %v1009_v12 }
 0x276   :  { %v2343_v3 = vsel %vm2948_vm14, 0, %v2947_v19  ;;  %v2227_v10 = vsel %vm2225_vm10, %v2226_v14, %v4994_v9  ;;  %v2389_v15 = vshrl.u32 %v2388_v37, 5  ;;  %v2391_v25 = vsub.s32 32, %v2390_v6 }
 0x277   :  { %v2344_v60 = vsub.s32 32, %v2343_v3  ;;  %v2345_v56 = vshll.u32 %v4968_v31, %v2343_v3  ;;  %v2348_v4 = vsub.s32 4294967266, %v2343_v3  ;;  %v2228_v13 = vadd.s32 %v2227_v10, %v2223_v59 }
 0x278   :  { %v2392_v23 = vshrl.u32 %v5520_v48, %v2391_v25  ;;  %v2393_v26 = vshll.u32 %v5520_v48, %v2390_v6  ;;  %v2394_v22 = vshrl.u32 %v5527_v8, %v2391_v25  ;;  %v2396_v41 = vshll.u32 %v5527_v8, %v2390_v6 }
 0x279   :  { %v2346_v45 = vshrl.u32 %v2328_v24, %v2344_v60  ;;  %v2349_v44 = vadd.s32 127, %v2348_v4  ;;  %v2229_v12 = vadd.s32 536870912, %v2228_v13  ;;  %v2397_v9 = vshrl.u32 %v5511_v55, %v2391_v25 }
 0x27a   :  { %v2395_v61 = vor.u32 %v2394_v22, %v2393_v26  ;;  %v2399_v19 = vshll.u32 %v5511_v55, %v2390_v6  ;;  %v2400_v31 = vshrl.u32 %v5512_v51, %v2391_v25  ;;  %v2402_v59 = vshll.u32 %v5512_v51, %v2390_v6 }
 0x27b   :  { %v2347_v37 = vor.u32 %v2346_v45, %v2345_v56  ;;  %v2350_v14 = vshll.u32 %v2349_v44, 23  ;;  %v5032_v3 = vshrl.u32 %v2229_v12, 30  ;;  %v2398_v48 = vor.u32 %v2397_v9, %v2396_v41 }
 0x27c   :  { %vm5491_vm12 = vcmp.lt.s32.totalorder %v4742_v30, 0  ;;  %v2401_v8 = vor.u32 %v2400_v31, %v2399_v19  ;;  %v2403_v24 = vshrl.u32 %v5529_v40, %v2391_v25  ;;  %v2405_v10 = vshll.u32 %v5529_v40, %v2390_v6 }
 0x27d   :  { %v2406_v60 = vshrl.u32 %v5515_v42, %v2391_v25  ;;  %v5615_v55 = vand.u32 2147483647, %v4742_v30  ;;  %v2351_v51 = vor.u32 4788187, %v2350_v14  ;;  %v2354_v56 = vcvt.s32.f32 %v2347_v37 }
 0x27e   :  { %v2231_v26 = vshll.u32 %v5032_v3, 30  ;;  %vm2408_vm9 = vcmp.lt.s32.totalorder %v2389_v15, 1  ;;  %v2404_v22 = vor.u32 %v2403_v24, %v2402_v59  ;;  %vm2409_vm8 = vcmp.lt.s32.totalorder %v2389_v15, 2 }
 0x27f   :  { %vm5040_vm3 = vcmp.le.f32.partialorder %v5615_v55, 0.7853982  ;;  %v2407_v41 = vor.u32 %v2406_v60, %v2405_v10  ;;  %vm2410_vm14 = vcmp.lt.s32.totalorder %v2389_v15, 3  ;;  %v2352_v45 = vand.u32 2147483647, %v2351_v51 }
 0x280   :  { %v5045_v44 = vsub.s32 %v2228_v13, %v2231_v26  ;;  %vm2411_vm10 = vcmp.lt.s32.totalorder %v2389_v15, 4  ;;  %v2412_v42 = vsel %vm2408_vm9, %v2392_v23, %v2395_v61  ;;  %v2416_v6 = vsel %vm2408_vm9, %v2395_v61, %v2398_v48 }
 0x281   :  { %v2413_v40 = vsel %vm2411_vm10, %v2401_v8, 2102212464  ;;  %v2417_v25 = vsel %vm2411_vm10, %v2404_v22, 920167782  ;;  %v2420_v12 = vsel %vm2408_vm9, %v2398_v48, %v2401_v8  ;;  %v2355_v9 = vmul.f32 %v2354_v56, %v2352_v45 }
 0x282   :  { %v2234_v19 = vsub.s32 0, %v5045_v44  ;;  %v2414_v31 = vsel %vm2410_vm14, %v2398_v48, %v2413_v40  ;;  %v2418_v37 = vsel %vm2410_vm14, %v2401_v8, %v2417_v25  ;;  %3394 = vcosq.f32 %v5018_v21 }
 0x283   :  { %v2419_v59 = vsel %vm2409_vm8, %v2416_v6, %v2418_v37  ;;  %v2421_v14 = vsel %vm2411_vm10, %v2407_v41, 1326507024  ;;  %v1014_v13 = vand.u32 3, %v1013_v33  ;;  %v2356_v24 = vxor.u32 2147483648, %v2355_v9  ;;  %v5622_v37 = vld [vmem:[#allocation19_spill] sm:$0xff] }
 0x284   :  { %v2224_v23 = vadd.s32 %v4993_v52, %v4999_v1  ;;  %v2942_v61 = vmin.u32 %v2234_v19, %v5045_v44  ;;  %v2422_v10 = vsel %vm2410_vm14, %v2404_v22, %v2421_v14  ;;  %v2415_v60 = vsel %vm2409_vm8, %v2412_v42, %v2414_v31  ;;  %v5618_v1 = vld [vmem:[#allocation8_spill] sm:$0xff]  ;;  %v5621_v19 = vld [vmem:[#allocation22_spill] sm:$0xff]  ;;  %v5623_v14 = vld [vmem:[#allocation15_spill] sm:$0xff] }
 0x285   :  { %v2423_v48 = vsel %vm2409_vm8, %v2420_v12, %v2422_v10  ;;  %v5059_v8 = vmul.u32.u64.low %v4937_v50, %v2419_v59  ;;  %v5060_v55 = vmul.u32.u64.high %v4937_v50, %v2419_v59, %v5059_v8  ;;  %v2357_v51 = vsel %vm5491_vm12, %v2356_v24, %v2355_v9 }
 0x286   :  { %v2236_v33 = vclz %v2942_v61  ;;  %v5065_v56 = vmul.u32.u64.low %v4937_v50, %v2423_v48  ;;  %v5066_v26 = vmul.u32.u64.high %v4937_v50, %v2423_v48, %v5065_v56  ;;  %vm1012_vm9 = vweird.f32 %v3582_v38 }
 0x287   :  { %v2360_v52 = vsel %vm5040_vm3, %v4742_v30, %v2357_v51  ;;  %vm1016_vm14 = vcmp.eq.s32.totalorder %v1014_v13, 0  ;;  %vm1019_vm8 = vcmp.eq.s32.totalorder %v1014_v13, 2  ;;  %vm5619_vm10 = vcmp.lt.s32.totalorder %v5618_v1, 0 }
 0x288   :  { %v1111_v15 = vsel %vm5619_vm10, %v1110_v18, %v5614_v46  ;;  %3396 = vsinq.f32 %v5018_v21  ;;  %v2943_v22 = vadd.s32 4294967294, %v2236_v33  ;;  %v1018_v41 = vsel %vm1016_vm14, %v4108_v5, %v1017_v16 }
 0x289   :  { %v1021_v45 = vsel %vm1019_vm8, %v1020_v47, %v4114_v17  ;;  %3398 = vcosq.f32 %v2360_v52  ;;  %v2431_v42 = vmul.u32 %v4937_v50, %v2415_v60  ;;  %v2434_v40 = vadd.s32 1, %v5060_v55 }
 0x28a   :  { %v1113_v25 = vsel %vm3842_vm5, 0, %v1111_v15  ;;  %3400 = vsinq.f32 %v2360_v52  ;;  %vm2944_vm10 = vcmp.lt.s32.totalorder %v2943_v22, 0  ;;  %vm2433_vm12 = vc.u32 %v5066_v26, %v5059_v8 }
 0x28b   :  { %vm1015_vm4 = vcmp.lt.s32.totalorder %v1014_v13, 2  ;;  %v2239_v46 = vsel %vm2944_vm10, 0, %v2943_v22  ;;  %v2435_v16 = vsel %vm2433_vm12, %v2434_v40, %v5060_v55  ;;  %v1117_v21 = vadd.s32 3, %v1113_v25  ;;  %v5630_v40 = vld [vmem:[#allocation32_spill] sm:$0xff] }
 0x28c   :  { %v1022_v18 = vsel %vm1015_vm4, %v1018_v41, %v1021_v45  ;;  %v2240_v5 = vsub.s32 32, %v2239_v46  ;;  %v2244_v17 = vsub.s32 4294967266, %v2239_v46  ;;  %v5091_v47 = vadd.s32 %v5059_v8, %v5066_v26  ;;  %v5093_v12 = vpop.eup %3394  ;;  %v5624_v8 = vld [vmem:[#allocation10_spill] sm:$0xff] }
 0x28d   :  { %v2436_v50 = vadd.s32 %v2435_v16, %v2431_v42  ;;  %v1118_v9 = vand.u32 3, %v1117_v21  ;;  %v1121_v31 = vxor.u32 2147483648, %v5621_v19  ;;  %v1124_v59 = vxor.u32 2147483648, %v5622_v37  ;;  %v5631_v16 = vld [vmem:[#allocation30_spill] sm:$0xff]  ;;  %v5632_v21 = vld [vmem:[#allocation13_spill] sm:$0xff] }
 0x28e   :  { %v1214_v13 = vsub.s32 4, %v5623_v14  ;;  %v2241_v24 = vshll.u32 %v5045_v44, %v2239_v46  ;;  %v2242_v61 = vshrl.u32 %v2224_v23, %v2240_v5  ;;  %v2245_v10 = vadd.s32 127, %v2244_v17 }
 0x28f   :  { %v2437_v60 = vadd.s32 536870912, %v2436_v50  ;;  %v1023_v48 = vsel %vm1012_vm9, nan, %v1022_v18  ;;  %vm1120_vm5 = vcmp.eq.s32.totalorder %v1118_v9, 0  ;;  %vm1123_vm4 = vcmp.eq.s32.totalorder %v1118_v9, 2 }
 0x290   :  { %vm5625_vm12 = vcmp.lt.s32.totalorder %v5624_v8, 0  ;;  %v2243_v51 = vor.u32 %v2242_v61, %v2241_v24  ;;  %v2246_v33 = vshll.u32 %v2245_v10, 23  ;;  %v1122_v26 = vsel %vm1120_vm5, %v5622_v37, %v1121_v31  ;;  %v5635_v24 = vld [vmem:[#allocation29_spill] sm:$0xff] }
 0x291   :  { %v1215_v55 = vsel %vm5625_vm12, %v1214_v13, %v5623_v14  ;;  %v5104_v56 = vshrl.u32 %v2437_v60, 30  ;;  %vm2170_vm14 = vcmp.lt.s32.totalorder %v4750_v27, 0  ;;  %vm1116_vm8 = vweird.f32 %v5618_v1  ;;  %v5633_v14 = vld [vmem:[#allocation9_spill] sm:$0xff] }
 0x292   :  { %vm1119_vm10 = vcmp.lt.s32.totalorder %v1118_v9, 2  ;;  %v1125_v38 = vsel %vm1123_vm4, %v1124_v59, %v5621_v19  ;;  %v1217_v23 = vsel %vm4034_vm6, 0, %v1215_v55  ;;  %v5112_v52 = vpop.eup %3396  ;;  %v5627_v15 = vand.u32 2147483647, %v4750_v27  ;;  %v5636_v10 = vld [vmem:[#allocation21_spill] sm:$0xff] }
 0x293   :  { %v2247_v41 = vor.u32 4788187, %v2246_v33  ;;  %v2439_v45 = vshll.u32 %v5104_v56, 30  ;;  %v1126_v42 = vsel %vm1119_vm10, %v1122_v26, %v1125_v38  ;;  %v1225_v1 = vxor.u32 2147483648, %v5630_v40  ;;  %v5122_v6 = vpop.eup %3398 }
 0x294   :  { %vm5116_vm9 = vcmp.le.f32.partialorder %v5627_v15, 0.7853982  ;;  %v1127_v25 = vsel %vm1116_vm8, nan, %v1126_v42  ;;  %v1221_v46 = vadd.s32 3, %v1217_v23  ;;  %v1228_v18 = vxor.u32 2147483648, %v5631_v16  ;;  %v5126_v17 = vpop.eup %3400 }
 0x295   :  { %v1318_v5 = vsub.s32 4, %v5632_v21  ;;  %v2248_v9 = vand.u32 2147483647, %v2247_v41  ;;  %v2250_v19 = vcvt.s32.f32 %v2243_v51  ;;  %v5128_v31 = vsub.s32 %v2436_v50, %v2439_v45  ;;  %v5638_v51 = vld [vmem:[#allocation27_spill] sm:$0xff] }
 0x296   :  { %v3173_v37 = vpack.c.bf16 %v1127_v25, %v1023_v48  ;;  %v1222_v59 = vand.u32 3, %v1221_v46  ;;  %vm5634_vm6 = vcmp.lt.s32.totalorder %v5633_v14, 0  ;;  %v1329_v61 = vxor.u32 2147483648, %v5635_v24  ;;  %v5639_v25 = vld [vmem:[#allocation14_spill] sm:$0xff] }
 0x297   :  { %v1319_v13 = vsel %vm5634_vm6, %v1318_v5, %v5632_v21  ;;  %v1422_v60 = vsub.s32 4, %v5636_v10  ;;  %v2251_v55 = vmul.f32 %v2250_v19, %v2248_v9  ;;  %v2442_v33 = vsub.s32 0, %v5128_v31 }
 0x298   :  { %3174 = vmatprep.subr.bf16.mxu0 %v3173_v37  ;;  %v1321_v38 = vsel %vm4012_vm11, 0, %v1319_v13  ;;  %v1332_v50 = vxor.u32 2147483648, %v5638_v51  ;;  %vm1223_vm5 = vcmp.lt.s32.totalorder %v1222_v59, 2  ;;  %vm1224_vm4 = vcmp.eq.s32.totalorder %v1222_v59, 0 }
 0x299   :  { %3176 = vmatpush3.bf16.msra.mxu0 %v3173_v37  ;;  %vm1227_vm12 = vcmp.eq.s32.totalorder %v1222_v59, 2  ;;  %v1325_v48 = vadd.s32 3, %v1321_v38  ;;  %v2252_v44 = vxor.u32 2147483648, %v2251_v55  ;;  %v2950_v23 = vmin.u32 %v2442_v33, %v5128_v31 }
 0x29a   :  { %v1226_v15 = vsel %vm1224_vm4, %v5631_v16, %v1225_v1  ;;  %v1229_v41 = vsel %vm1227_vm12, %v1228_v18, %v5630_v40  ;;  %vm1220_vm8 = vweird.f32 %v5624_v8  ;;  %vm5640_vm11 = vcmp.lt.s32.totalorder %v5639_v25, 0 }
 0x29b   :  { %v1230_v45 = vsel %vm1223_vm5, %v1226_v15, %v1229_v41  ;;  %v1326_v42 = vand.u32 3, %v1325_v48  ;;  %v1423_v46 = vsel %vm5640_vm11, %v1422_v60, %v5636_v10  ;;  %v2253_v21 = vsel %vm2170_vm14, %v2252_v44, %v2251_v55  ;;  %v5642_v10 = vld [vmem:[#allocation38_spill] sm:$0xff] }
 0x29c   :  { %v2444_v5 = vclz %v2950_v23  ;;  %vm1324_vm10 = vweird.f32 %v5633_v14  ;;  %v1425_v19 = vsel %vm4234_vm13, 0, %v1423_v46  ;;  %v5154_v40 = vsel %vm5116_vm9, %v4750_v27, %v2253_v21  ;;  %v5643_v55 = vld [vmem:[#allocation18_spill] sm:$0xff]  ;;  %v5655_v23 = vld [vmem:[#allocation17_spill] sm:$0xff] }
 0x29d   :  { %v1231_v8 = vsel %vm1220_vm8, nan, %v1230_v45  ;;  %vm1328_vm6 = vcmp.eq.s32.totalorder %v1326_v42, 0  ;;  %vm1331_vm5 = vcmp.eq.s32.totalorder %v1326_v42, 2  ;;  %vm1327_vm4 = vcmp.lt.s32.totalorder %v1326_v42, 2 }
 0x29e   :  { %v2951_v1 = vadd.s32 4294967294, %v2444_v5  ;;  %v1330_v16 = vsel %vm1328_vm6, %v5638_v51, %v1329_v61  ;;  %v1333_v18 = vsel %vm1331_vm5, %v1332_v50, %v5635_v24  ;;  %vm1428_vm12 = vweird.f32 %v5639_v25  ;;  %v5644_v50 = vld [vmem:[#allocation12_spill] sm:$0xff]  ;;  %v5647_v5 = vld [vmem:[#allocation37_spill] sm:$0xff] }
 0x29f   :  { %v1334_v37 = vsel %vm1327_vm4, %v1330_v16, %v1333_v18  ;;  %v1429_v59 = vadd.s32 3, %v1425_v19  ;;  %v1433_v14 = vxor.u32 2147483648, %v4466_v36  ;;  %v1436_v60 = vxor.u32 2147483648, %v5642_v10  ;;  %v5648_v19 = vld [vmem:[#allocation28_spill] sm:$0xff] }
 0x2a0   :  { %vm2952_vm13 = vcmp.lt.s32.totalorder %v2951_v1, 0  ;;  %v1335_v13 = vsel %vm1324_vm10, nan, %v1334_v37  ;;  %v1526_v33 = vsub.s32 4, %v5643_v55  ;;  %3402 = vcosq.f32 %v5154_v40  ;;  %v5649_v37 = vld [vmem:[#allocation35_spill] sm:$0xff] }
 0x2a1   :  { %v2447_v26 = vsel %vm2952_vm13, 0, %v2951_v1  ;;  %v3177_v38 = vpack.c.bf16 %v1335_v13, %v1231_v8  ;;  %v1430_v48 = vand.u32 3, %v1429_v59  ;;  %vm5645_vm8 = vcmp.lt.s32.totalorder %v5644_v50, 0  ;;  %v5650_v13 = vld [vmem:[#allocation20_spill] sm:$0xff] }
 0x2a2   :  { %v2448_v61 = vsub.s32 32, %v2447_v26  ;;  %v2449_v24 = vshll.u32 %v5128_v31, %v2447_v26  ;;  %v2452_v51 = vsub.s32 4294967266, %v2447_v26  ;;  %v1527_v44 = vsel %vm5645_vm8, %v1526_v33, %v5643_v55  ;;  %v5660_v26 = vld [vmem:[#allocation47_spill] sm:$0xff] }
 0x2a3   :  { %3178 = vmatprep.subr.bf16.mxu0 %v3177_v38  ;;  %vm1431_vm11 = vcmp.lt.s32.totalorder %v1430_v48, 2  ;;  %vm1432_vm10 = vcmp.eq.s32.totalorder %v1430_v48, 0  ;;  %vm1435_vm6 = vcmp.eq.s32.totalorder %v1430_v48, 2  ;;  %v1529_v15 = vsel %vm4196_vm7, 0, %v1527_v44  ;;  %v5654_v48 = vld [vmem:[#allocation26_spill] sm:$0xff] }
 0x2a4   :  { %v2450_v41 = vshrl.u32 %v5091_v47, %v2448_v61  ;;  %v2453_v45 = vadd.s32 127, %v2452_v51  ;;  %3180 = vmatpush3.bf16.msra.mxu0 %v3177_v38  ;;  %v1434_v42 = vsel %vm1432_vm10, %v5642_v10, %v1433_v14  ;;  %v1437_v31 = vsel %vm1435_vm6, %v1436_v60, %v4466_v36  ;;  %v5652_v10 = vld [vmem:[#allocation44_spill] sm:$0xff] }
 0x2a5   :  { %v1438_v46 = vsel %vm1431_vm11, %v1434_v42, %v1437_v31  ;;  %v1533_v21 = vadd.s32 3, %v1529_v15  ;;  %v1537_v9 = vxor.u32 2147483648, %v5647_v5  ;;  %v1630_v8 = vsub.s32 4, %v5648_v19 }
 0x2a6   :  { %v2451_v1 = vor.u32 %v2450_v41, %v2449_v24  ;;  %v2454_v16 = vshll.u32 %v2453_v45, 23  ;;  %v1439_v18 = vsel %vm1428_vm12, nan, %v1438_v46  ;;  %v1540_v59 = vxor.u32 2147483648, %v5649_v37 }
 0x2a7   :  { %v1534_v47 = vand.u32 3, %v1533_v21  ;;  %vm5651_vm7 = vcmp.lt.s32.totalorder %v5650_v13, 0  ;;  %v1641_v36 = vxor.u32 2147483648, %v4545_v35  ;;  %v1644_v60 = vxor.u32 2147483648, %v5652_v10 }
 0x2a8   :  { %v1631_v14 = vsel %vm5651_vm7, %v1630_v8, %v5648_v19  ;;  %v2455_v55 = vor.u32 4788187, %v2454_v16  ;;  %v2458_v33 = vcvt.s32.f32 %v2451_v1  ;;  %v1734_v61 = vsub.s32 4, %v5654_v48  ;;  %v5658_v1 = vld [vmem:[#allocation43_spill] sm:$0xff] }
 0x2a9   :  { %v1633_v38 = vsel %vm4389_vm15, 0, %v1631_v14  ;;  %vm1535_vm5 = vcmp.lt.s32.totalorder %v1534_v47, 2  ;;  %vm1536_vm4 = vcmp.eq.s32.totalorder %v1534_v47, 0  ;;  %vm1539_vm12 = vcmp.eq.s32.totalorder %v1534_v47, 2  ;;  %v5659_v14 = vld [vmem:[#allocation42_spill] sm:$0xff] }
 0x2aa   :  { %v1637_v25 = vadd.s32 3, %v1633_v38  ;;  %v2456_v24 = vand.u32 2147483647, %v2455_v55  ;;  %v1538_v51 = vsel %vm1536_vm4, %v5649_v37, %v1537_v9  ;;  %v1541_v44 = vsel %vm1539_vm12, %v1540_v59, %v5647_v5  ;;  %v5190_v41 = vpop.eup %3402 }
 0x2ab   :  { %vm5656_vm13 = vcmp.lt.s32.totalorder %v5655_v23, 0  ;;  %vm1532_vm8 = vweird.f32 %v5644_v50  ;;  %v1542_v45 = vsel %vm1535_vm5, %v1538_v51, %v1541_v44  ;;  %v1745_v9 = vxor.u32 2147483648, %v5658_v1 }
 0x2ac   :  { %v1735_v15 = vsel %vm5656_vm13, %v1734_v61, %v5654_v48  ;;  %v1638_v42 = vand.u32 3, %v1637_v25  ;;  %v2459_v21 = vmul.f32 %v2458_v33, %v2456_v24  ;;  %v1543_v19 = vsel %vm1532_vm8, nan, %v1542_v45  ;;  %v5662_v61 = vld [vmem:[#allocation39_spill] sm:$0xff] }
 0x2ad   :  { %v1737_v46 = vsel %vm4307_vm0, 0, %v1735_v15  ;;  %v3181_v16 = vpack.c.bf16 %v1543_v19, %v1439_v18  ;;  %v1748_v55 = vxor.u32 2147483648, %v5659_v14  ;;  %v1838_v33 = vsub.s32 4, %v5660_v26 }
 0x2ae   :  { %v1741_v8 = vadd.s32 3, %v1737_v46  ;;  %vm1639_vm15 = vcmp.lt.s32.totalorder %v1638_v42, 2  ;;  %vm1640_vm11 = vcmp.eq.s32.totalorder %v1638_v42, 0  ;;  %vm1643_vm10 = vcmp.eq.s32.totalorder %v1638_v42, 2 }
 0x2af   :  { %v2460_v5 = vxor.u32 2147483648, %v2459_v21  ;;  %v1642_v37 = vsel %vm1640_vm11, %v5652_v10, %v1641_v36  ;;  %v1645_v59 = vsel %vm1643_vm10, %v1644_v60, %v4545_v35  ;;  %3182 = vmatprep.subr.bf16.mxu0 %v3181_v16  ;;  %3404 = vsinq.f32 %v5154_v40 }
 0x2b0   :  { %v1742_v50 = vand.u32 3, %v1741_v8  ;;  %v1646_v47 = vsel %vm1639_vm15, %v1642_v37, %v1645_v59  ;;  %vm5493_vm0 = vcmp.lt.s32.totalorder %v4770_v29, 0  ;;  %3184 = vmatpush3.bf16.msra.mxu0 %v3181_v16  ;;  %vm1636_vm6 = vweird.f32 %v5650_v13  ;;  %v5665_v8 = vld [vmem:[#allocation50_spill] sm:$0xff] }
 0x2b1   :  { %v3501_v18 = vmov 0.0|0.0   ;;  %vm1740_vm5 = vweird.f32 %v5655_v23  ;;  %vm5661_vm12 = vcmp.lt.s32.totalorder %v4349_v63, 0  ;;  %v1647_v10 = vsel %vm1636_vm6, nan, %v1646_v47  ;;  %v5666_v59 = vld [vmem:[#allocation34_spill] sm:$0xff] }
 0x2b2   :  { %vm1744_vm7 = vcmp.eq.s32.totalorder %v1742_v50, 0  ;;  %3201 = vmatprep.subr.bf16.mxu1 %v3501_v18  ;;  %vm1747_vm4 = vcmp.eq.s32.totalorder %v1742_v50, 2  ;;  %v1839_v36 = vsel %vm5661_vm12, %v1838_v33, %v5660_v26  ;;  %vm1743_vm13 = vcmp.lt.s32.totalorder %v1742_v50, 2  ;;  %v5667_v47 = vld [vmem:[#allocation46_spill] sm:$0xff] }
 0x2b3   :  { %v1746_v35 = vsel %vm1744_vm7, %v5659_v14, %v1745_v9  ;;  %v1749_v40 = vsel %vm1747_vm4, %v1748_v55, %v5658_v1  ;;  %v1841_v13 = vsel %vm4671_vm1, 0, %v1839_v36  ;;  %v5214_v60 = vsel %vm5493_vm0, %v2460_v5, %v2459_v21  ;;  %v5668_v55 = vld [vmem:[#allocation49_spill] sm:$0xff] }
 0x2b4   :  { %v1750_v38 = vsel %vm1743_vm13, %v1746_v35, %v1749_v40  ;;  %v1845_v48 = vadd.s32 3, %v1841_v13  ;;  %v1942_v25 = vsub.s32 4, %v5662_v61  ;;  %vm1844_vm8 = vweird.f32 %v4349_v63  ;;  %v5669_v36 = vld [vmem:[#allocation25_spill] sm:$0xff] }
 0x2b5   :  { %v1751_v24 = vsel %vm1740_vm5, nan, %v1750_v38  ;;  %v1849_v51 = vxor.u32 2147483648, %v4793_v43  ;;  %v1852_v44 = vxor.u32 2147483648, %v4785_v39  ;;  %vm5663_vm1 = vcmp.lt.s32.totalorder %v4158_v49, 0 }
 0x2b6   :  { %v3185_v23 = vpack.c.bf16 %v1751_v24, %v1647_v10  ;;  %v1846_v15 = vand.u32 3, %v1845_v48  ;;  %v1943_v57 = vsel %vm5663_vm1, %v1942_v25, %v5662_v61  ;;  %vm1948_vm15 = vweird.f32 %v4158_v49 }
 0x2b7   :  { %v598_v45 = vand.u32 3, %v4667_v11  ;;  %vm5664_vm11 = vnez %v5576_v20  ;;  %v1953_v31 = vxor.u32 2147483648, %v4705_v34  ;;  %v601_v46 = vxor.u32 2147483648, %v4783_v2 }
 0x2b8   :  { %v1945_v42 = vsel %vm5664_vm11, 0, %v1943_v57  ;;  %v604_v21 = vxor.u32 2147483648, %v4709_v32  ;;  %3186 = vmatprep.subr.bf16.mxu0 %v3185_v23  ;;  %vm1848_vm10 = vcmp.eq.s32.totalorder %v1846_v15, 0  ;;  %vm1851_vm6 = vcmp.eq.s32.totalorder %v1846_v15, 2  ;;  %v5672_v57 = vld [vmem:[#allocation45_spill] sm:$0xff] }
 0x2b9   :  { %v1949_v19 = vadd.s32 3, %v1945_v42  ;;  %v1956_v1 = vxor.u32 2147483648, %v5665_v8  ;;  %3188 = vmatpush3.bf16.msra.mxu0 %v3185_v23  ;;  %vm1847_vm7 = vcmp.lt.s32.totalorder %v1846_v15, 2  ;;  %v1850_v9 = vsel %vm1848_vm10, %v4785_v39, %v1849_v51  ;;  %v5234_v37 = vpop.eup %3404  ;;  %v5674_v42 = vld [vmem:[#allocation52_spill] sm:$0xff] }
 0x2ba   :  { %v1853_v11 = vsel %vm1851_vm6, %v1852_v44, %v4793_v43  ;;  %vm600_vm5 = vcmp.eq.s32.totalorder %v598_v45, 0  ;;  %vm603_vm4 = vcmp.eq.s32.totalorder %v598_v45, 2  ;;  %vm596_vm12 = vweird.f32 %v5666_v59 }
 0x2bb   :  { %v1854_v20 = vsel %vm1847_vm7, %v1850_v9, %v1853_v11  ;;  %v1950_v16 = vand.u32 3, %v1949_v19  ;;  %v602_v5 = vsel %vm600_vm5, %v4709_v32, %v601_v46  ;;  %v605_v50 = vsel %vm603_vm4, %v604_v21, %v4783_v2  ;;  %v5670_v2 = vld [vmem:[#allocation48_spill] sm:$0xff]  ;;  %v5678_v11 = vld [vmem:[#allocation55_spill] sm:$0xff] }
 0x2bc   :  { %v702_v14 = vand.u32 3, %v5667_v47  ;;  %v705_v26 = vxor.u32 2147483648, %v5668_v55  ;;  %v1855_v39 = vsel %vm1844_vm8, nan, %v1854_v20  ;;  %vm599_vm11 = vcmp.lt.s32.totalorder %v598_v45, 2  ;;  %v5677_v21 = vld [vmem:[#allocation56_spill] sm:$0xff] }
 0x2bd   :  { %vm1952_vm13 = vcmp.eq.s32.totalorder %v1950_v16, 0  ;;  %vm1955_vm1 = vcmp.eq.s32.totalorder %v1950_v16, 2  ;;  %vm1951_vm10 = vcmp.lt.s32.totalorder %v1950_v16, 2  ;;  %v606_v33 = vsel %vm599_vm11, %v602_v5, %v605_v50  ;;  %v5680_v5 = vld [vmem:[#allocation51_spill] sm:$0xff]  ;;  %v5681_v50 = vld [vmem:[#allocation54_spill] sm:$0xff] }
 0x2be   :  { %v1954_v32 = vsel %vm1952_vm13, %v5665_v8, %v1953_v31  ;;  %v1957_v43 = vsel %vm1955_vm1, %v1956_v1, %v4705_v34  ;;  %vm700_vm6 = vweird.f32 %v5669_v36  ;;  %vm704_vm7 = vcmp.eq.s32.totalorder %v702_v14, 0  ;;  %v5676_v31 = vld [vmem:[#allocation57_spill] sm:$0xff] }
 0x2bf   :  { %v1958_v35 = vsel %vm1951_vm10, %v1954_v32, %v1957_v43  ;;  %v708_v10 = vxor.u32 2147483648, %v5670_v2  ;;  %v706_v63 = vsel %vm704_vm7, %v5670_v2, %v705_v26  ;;  %vm707_vm8 = vcmp.eq.s32.totalorder %v702_v14, 2 }
 0x2c0   :  { %v1959_v40 = vsel %vm1948_vm15, nan, %v1958_v35  ;;  %v2046_v13 = vsub.s32 4, %v4880_v62  ;;  %v607_v48 = vsel %vm596_vm12, nan, %v606_v33  ;;  %vm703_vm5 = vcmp.lt.s32.totalorder %v702_v14, 2 }
 0x2c1   :  { %v3189_v38 = vpack.c.bf16 %v1959_v40, %v1855_v39  ;;  %v709_v34 = vsel %vm707_vm8, %v708_v10, %v5668_v55  ;;  %vm5671_vm4 = vcmp.lt.s32.totalorder %v4692_v53, 0  ;;  %vm2052_vm13 = vweird.f32 %v4692_v53 }
 0x2c2   :  { %v710_v61 = vsel %vm703_vm5, %v706_v63, %v709_v34  ;;  %v2047_v25 = vsel %vm5671_vm4, %v2046_v13, %v4880_v62  ;;  %v2150_v49 = vsub.s32 4, %v4702_v7  ;;  %v2057_v44 = vxor.u32 2147483648, %v5112_v52  ;;  %v5683_v13 = vld [vmem:[#allocation58_spill] sm:$0xff] }
 0x2c3   :  { %3190 = vmatprep.subr.bf16.mxu0 %v3189_v38  ;;  %v711_v24 = vsel %vm700_vm6, nan, %v710_v61  ;;  %v2049_v51 = vsel %vm4973_vm2, 0, %v2047_v25  ;;  %v2060_v23 = vxor.u32 2147483648, %v5093_v12  ;;  %vm804_vm15 = vweird.f32 %v4537_v0 }
 0x2c4   :  { %v3202_v15 = vpack.c.bf16 %v711_v24, %v607_v48  ;;  %3192 = vmatpush3.bf16.msra.mxu0 %v3189_v38  ;;  %v2053_v62 = vadd.s32 3, %v2049_v51  ;;  %vm5673_vm12 = vcmp.lt.s32.totalorder %v5672_v57, 0  ;;  %vm2156_vm1 = vweird.f32 %v5672_v57 }
 0x2c5   :  { %v2151_v45 = vsel %vm5673_vm12, %v2150_v49, %v4702_v7  ;;  %vm2673_vm11 = vcmask 1045504   ;;  %vm5675_vm10 = vnez %v5674_v42  ;;  %v2161_v46 = vxor.u32 2147483648, %v5676_v31  ;;  %v5679_v7 = vld [vmem:[#allocation41_spill] sm:$0xff] }
 0x2c6   :  { %v2153_v58 = vsel %vm5675_vm10, 0, %v2151_v45  ;;  %v2164_v19 = vxor.u32 2147483648, %v5677_v21  ;;  %v809_v8 = vxor.u32 2147483648, %v4962_v54  ;;  %3203 = vmatpush3.bf16.msra.mxu1 %v3202_v15  ;;  %v2054_v1 = vand.u32 3, %v2053_v62  ;;  %v2480_v62 = vld [vmem:[#allocation2 + $0x100] sm:$0xff] }
 0x2c7   :  { %v2157_v9 = vadd.s32 3, %v2153_v58  ;;  %vm808_vm2 = vcmp.eq.s32.totalorder %v5678_v11, 0  ;;  %v812_v20 = vxor.u32 2147483648, %v4959_v28  ;;  %3204 = vmatprep.subr.bf16.mxu1 %v3501_v18  ;;  %vm807_vm7 = vcmp.lt.s32.totalorder %v5678_v11, 2 }
 0x2c8   :  { %v810_v16 = vsel %vm808_vm2, %v4959_v28, %v809_v8  ;;  %vm811_vm8 = vcmp.eq.s32.totalorder %v5678_v11, 2  ;;  %vm912_vm5 = vcmp.eq.s32.totalorder %v5680_v5, 0  ;;  %vm2056_vm4 = vcmp.eq.s32.totalorder %v2054_v1, 0 }
 0x2c9   :  { %vm2059_vm12 = vcmp.eq.s32.totalorder %v2054_v1, 2  ;;  %v2158_v59 = vand.u32 3, %v2157_v9  ;;  %v913_v47 = vxor.u32 2147483648, %v5681_v50  ;;  %vm2055_vm10 = vcmp.lt.s32.totalorder %v2054_v1, 2 }
 0x2ca   :  { %v2058_v14 = vsel %vm2056_vm4, %v5093_v12, %v2057_v44  ;;  %v2061_v55 = vsel %vm2059_vm12, %v2060_v23, %v5112_v52  ;;  %v813_v26 = vsel %vm811_vm8, %v812_v20, %v4962_v54  ;;  %v5682_v12 = vld [vmem:[#allocation53_spill] sm:$0xff]  ;;  %v2254_v36 = vsub.s32 4, %v5032_v3 }
 0x2cb   :  { %v2062_v39 = vsel %vm2055_vm10, %v2058_v14, %v2061_v55  ;;  %vm2159_vm0 = vcmp.lt.s32.totalorder %v2158_v59, 2  ;;  %vm2160_vm6 = vcmp.eq.s32.totalorder %v2158_v59, 0  ;;  %vm2163_vm2 = vcmp.eq.s32.totalorder %v2158_v59, 2  ;;  %v2482_v14 = vld [vmem:[#allocation2 + $0x110] sm:$0xff]  ;;  %v2483_v55 = vld [vmem:[#allocation2 + $0x118] sm:$0xff] }
 0x2cc   :  { %v2063_v28 = vsel %vm2052_vm13, nan, %v2062_v39  ;;  %v2162_v32 = vsel %vm2160_vm6, %v5677_v21, %v2161_v46  ;;  %v2165_v43 = vsel %vm2163_vm2, %v2164_v19, %v5676_v31  ;;  %v814_v33 = vsel %vm807_vm7, %v810_v16, %v813_v26  ;;  %v2484_v26 = vld [vmem:[#allocation2 + $0x120] sm:$0xff]  ;;  %v2485_v39 = vld [vmem:[#allocation2 + $0x128] sm:$0xff] }
 0x2cd   :  { %v2166_v35 = vsel %vm2159_vm0, %v2162_v32, %v2165_v43  ;;  %v914_v52 = vsel %vm912_vm5, %v5682_v12, %v913_v47  ;;  %v916_v54 = vxor.u32 2147483648, %v5682_v12  ;;  %v815_v2 = vsel %vm804_vm15, nan, %v814_v33  ;;  %v2667_v12 = vld [vmem:[#allocation2 + $0x148] sm:$0x7] }
 0x2ce   :  { %v2167_v53 = vsel %vm2156_vm1, nan, %v2166_v35  ;;  %vm911_vm13 = vcmp.lt.s32.totalorder %v5680_v5, 2  ;;  %vm915_vm6 = vcmp.eq.s32.totalorder %v5680_v5, 2  ;;  %v2255_v63 = vsel %vm2170_vm14, %v2254_v36, %v5032_v3 }
 0x2cf   :  { %v3193_v10 = vpack.c.bf16 %v2167_v53, %v2063_v28  ;;  %v917_v40 = vsel %vm915_vm6, %v916_v54, %v5681_v50  ;;  %v2358_v38 = vsub.s32 4, %v5683_v13  ;;  %v2257_v34 = vsel %vm5116_vm9, 0, %v2255_v63  ;;  %v2486_v28 = vld [vmem:[#allocation2 + $0x130] sm:$0xff]  ;;  %v68_v53 = vpop.permute.xlu0 %67 }
 0x2d0   :  { %v918_v48 = vsel %vm911_vm13, %v914_v52, %v917_v40  ;;  %vm2260_vm0 = vweird.f32 %v4750_v27  ;;  %v2265_v0 = vxor.u32 2147483648, %v5234_v37  ;;  %vm5684_vm15 = vmmov 1   ;;  %v2668_v54 = vld [vmem:[#allocation2 + $0x150] sm:$0x7] }
 0x2d1   :  { %vm5314_vm1 = vmpackc.low %vm2673_vm11, %vm5684_vm15  ;;  %3194 = vmatprep.subr.bf16.mxu0 %v3193_v10  ;;  %vm5687_vm7 = vweird.f32 %v5679_v7  ;;  %v2261_v25 = vadd.s32 3, %v2257_v34  ;;  %v2268_v49 = vxor.u32 2147483648, %v5190_v41  ;;  %vm5688_vm14 = vcmp.lt.s32.totalorder %v4742_v30, 0 }
 0x2d2   :  { %v919_v3 = vsel %vm5687_vm7, nan, %v918_v48  ;;  %v2359_v22 = vsel %vm5688_vm14, %v2358_v38, %v5683_v13  ;;  %3196 = vmatpush3.bf16.msra.mxu0 %v3193_v10  ;;  %v5689_v44 = vand.u32 2147483647, %v4770_v29  ;;  %v2462_v15 = vsub.s32 4, %v5104_v56 }
 0x2d3   :  { %v3205_v24 = vpack.c.bf16 %v919_v3, %v815_v2  ;;  %v2361_v51 = vsel %vm5040_vm3, 0, %v2359_v22  ;;  %v2262_v57 = vand.u32 3, %v2261_v25  ;;  %v2369_v42 = vxor.u32 2147483648, %v5126_v17  ;;  %v63_v2 = vpop.permute.xlu1 %62  ;;  %v78_v10 = vpop.permute.xlu0 %77 }
 0x2d4   :  { %vm5328_vm9 = vcmp.le.f32.partialorder %v5689_v44, 0.7853982  ;;  %v2365_v45 = vadd.s32 3, %v2361_v51  ;;  %v2372_v4 = vxor.u32 2147483648, %v5122_v6  ;;  %vm5692_vm3 = vcmp.lt.s32.totalorder %v4770_v29, 0 }
 0x2d5   :  { %v2464_v58 = vsel %vm5328_vm9, %v4770_v29, %v5214_v60  ;;  %3207 = vmatpush3.bf16.msk.msra.mxu1 %vm5314_vm1, %v3205_v24  ;;  %v2463_v31 = vsel %vm5692_vm3, %v2462_v15, %v5104_v56  ;;  %vm2488_vm11 = vcmask 982016   ;;  %vm2263_vm8 = vcmp.lt.s32.totalorder %v2262_v57, 2 }
 0x2d6   :  { %3406 = vcosq.f32 %v2464_v58  ;;  %vm2264_vm5 = vcmp.eq.s32.totalorder %v2262_v57, 0  ;;  %vm2267_vm4 = vcmp.eq.s32.totalorder %v2262_v57, 2  ;;  %v2366_v46 = vand.u32 3, %v2365_v45  ;;  %3125 = vmatprep.mubr.msk.f32.mxu0 %vm2488_vm11, %v2480_v62  ;;  %3208 = vmatprep.subr.bf16.mxu1 %v3501_v18 }
 0x2d7   :  { %v2266_v60 = vsel %vm2264_vm5, %v5190_v41, %v2265_v0  ;;  %v2269_v21 = vsel %vm2267_vm4, %v2268_v49, %v5234_v37  ;;  %v2465_v19 = vsel %vm5328_vm9, 0, %v2463_v31  ;;  %3408 = vsinq.f32 %v2464_v58  ;;  %v73_v63 = vpop.permute.xlu1 %72  ;;  %v88_v49 = vpop.permute.xlu0 %87 }
 0x2d8   :  { %v2270_v8 = vsel %vm2263_vm8, %v2266_v60, %v2269_v21  ;;  %vm2367_vm12 = vcmp.lt.s32.totalorder %v2366_v46, 2  ;;  %vm2368_vm10 = vcmp.eq.s32.totalorder %v2366_v46, 0  ;;  %vm2371_vm2 = vcmp.eq.s32.totalorder %v2366_v46, 2 }
 0x2d9   :  { %v2271_v56 = vsel %vm2260_vm0, nan, %v2270_v8  ;;  %v2370_v1 = vsel %vm2368_vm10, %v5122_v6, %v2369_v42  ;;  %v2373_v9 = vsel %vm2371_vm2, %v2372_v4, %v5126_v17  ;;  %v2469_v11 = vadd.s32 3, %v2465_v19 }
 0x2da   :  { %vm2364_vm13 = vweird.f32 %v4742_v30  ;;  %v2374_v41 = vsel %vm2367_vm12, %v2370_v1, %v2373_v9  ;;  %vm2468_vm1 = vweird.f32 %v4770_v29  ;;  %v2481_v30 = vld [vmem:[#allocation2 + $0x108] sm:$0xff]  ;;  %v2487_v29 = vld [vmem:[#allocation2 + $0x138] sm:$0xff]  ;;  %vm2669_vm7 = vcmask 244736  }
 0x2db   :  { %v2375_v37 = vsel %vm2364_vm13, nan, %v2374_v41  ;;  %v2470_v7 = vand.u32 3, %v2469_v11  ;;  %vm3502_vm14 = vmmov 0   ;;  %v3503_v52 = vmov 0.0   ;;  %v83_v24 = vpop.permute.xlu1 %82  ;;  %v98_v42 = vpop.permute.xlu0 %97 }
 0x2dc   :  { %v3197_v20 = vpack.c.bf16 %v2375_v37, %v2271_v56  ;;  %3145 = vmatprep.mubr.msk.f32.mxu1 %vm3502_vm14, %v3503_v52  ;;  %v3504_v36 = vmov 0   ;;  %vm2747_vm9 = vcmask 523264   ;;  %vm2827_vm3 = vcmask 59392  }
 0x2dd   :  { %vm2475_vm6 = vcmp.eq.s32.totalorder %v2470_v7, 2  ;;  %vm2472_vm0 = vcmp.eq.s32.totalorder %v2470_v7, 0  ;;  %vm2471_vm15 = vcmp.lt.s32.totalorder %v2470_v7, 2  ;;  %3146 = vmatmul.mubr.msk.f32.vlgmr.msra.gmra.mrb[16].mxu1 %vm2669_vm7, %v2667_v12  ;;  %3332 = vset.pattern.permute.xlu1 %v3504_v36 }
 0x2de   :  { %3198 = vmatprep.subr.bf16.mxu0 %v3197_v20  ;;  %3164 = vmatprep.mubr.msk.f32.mxu1 %vm3502_vm14, %v3503_v52  ;;  %v2666_v52 = vld [vmem:[#allocation2 + $0x140] sm:$0x7] }
 0x2df   :  { %3200 = vmatpush3.bf16.msra.mxu0 %v3197_v20  ;;  %3333 = vset.pattern.permute.xlu0 %v3504_v36  ;;  %v93_v31 = vpop.permute.xlu1 %92 }
 0x2e0   :  { %v3407_v16 = vpop.eup %3406  ;;  %2823 = vperm.xlu1 %3332, %v2668_v54  }
 0x2e1   :  { %v2476_v5 = vxor.u32 2147483648, %v3407_v16  ;;  %v3409_v59 = vpop.eup %3408 }
 0x2e2   :  { %v2473_v50 = vxor.u32 2147483648, %v3409_v59 }
 0x2e3   :  { %v2477_v27 = vsel %vm2475_vm6, %v2476_v5, %v3409_v59 }
 0x2e4   :  { %v2474_v6 = vsel %vm2472_vm0, %v3407_v16, %v2473_v50 }
 0x2e5   :  { %v2478_v17 = vsel %vm2471_vm15, %v2474_v6, %v2477_v27 }
 0x2e6   :  { %v2479_v47 = vsel %vm2468_vm1, nan, %v2478_v17 }
 0x2e7   :  { %3123 = vmatprep.subr.mxu0 %v2479_v47 }
 0x2e8   :  { %3124 = vmatpush3.msra.mxu0 %v2479_v47 }
 0x2e9   :  { %3126 = vmatmul.mubr.msk.f32.vlgmr.msra.gmra.mrb[0].mxu0 %vm2488_vm11, %v2481_v30 }
 0x2ea   :  { %3128 = vmatprep.mubr.msk.f32.mxu0 %vm2488_vm11, %v2482_v14 }
 0x2ed   :  { %3129 = vmatmul.mubr.msk.f32.gmra.mrb[2].mxu0 %vm2488_vm11, %v2483_v55 }
 0x2ee   :  { %3131 = vmatprep.mubr.msk.f32.mxu0 %vm2488_vm11, %v2484_v26 }
 0x2f1   :  { %3132 = vmatmul.mubr.msk.f32.gmra.mrb[4].mxu0 %vm2488_vm11, %v2485_v39 }
 0x2f2   :  { %3134 = vmatprep.mubr.msk.f32.mxu0 %vm2488_vm11, %v2486_v28 }
 0x2f5   :  { %3135 = vmatmul.mubr.msk.f32.gmra.mrb[6].mxu0 %vm2488_vm11, %v2487_v29 }
 0x323   :  { %v3067_v32 = vpop.f32.mrb[12].mxu0 }
 0x324   :  { %v410_v43 = vpop.f32.mrb[13].mxu0 }
 0x32c   :  { %v3070_v33 = vpop.f32.mrb[14].mxu0 }
 0x32d   :  { %v418_v35 = vpop.f32.mrb[15].mxu0 }
 0x3b0   :  { %v2743_v54 = vpop.f32.mrb[16].mxu1 }
 0x3b1   :  { %v3147_v36 = vpop.f32.mrb[17].mxu1 }
 0x3bc   :  { %v3127_v40 = vpop.f32.mrb[0].mxu0 }
 0x3bd   :  { %v3222_v13 = vadd.f32 %v3127_v40, %v68_v53  ;;  %v2579_v38 = vpop.f32.mrb[1].mxu0 }
 0x3be   :  { %v3223_v48 = vadd.f32 %v2579_v38, %v63_v2  ;;  %v2824_v2 = vpop.permute.xlu1 %2823 }
 0x3bf   :  { %v2962_v34 = vmul.f32 -1.442695, %v3222_v13 }
 0x3c0   :  { %v2961_v0 = vmul.f32 -1.442695, %v3223_v48  ;;  %v3130_v61 = vpop.f32.mrb[2].mxu0 }
 0x3c1   :  { %3410 = vpow2.f32 %v2962_v34  ;;  %v3224_v3 = vadd.f32 %v3130_v61, %v78_v10  ;;  %v2589_v25 = vpop.f32.mrb[3].mxu0 }
 0x3c2   :  { %3412 = vpow2.f32 %v2961_v0  ;;  %v3225_v22 = vadd.f32 %v2589_v25, %v73_v63 }
 0x3c3   :  { %v2964_v51 = vmul.f32 -1.442695, %v3224_v3 }
 0x3c4   :  { %v2963_v44 = vmul.f32 -1.442695, %v3225_v22  ;;  %v3133_v23 = vpop.f32.mrb[4].mxu0 }
 0x3c5   :  { %3414 = vpow2.f32 %v2964_v51  ;;  %v3226_v15 = vadd.f32 %v3133_v23, %v88_v49  ;;  %v2599_v62 = vpop.f32.mrb[5].mxu0 }
 0x3c6   :  { %3416 = vpow2.f32 %v2963_v44  ;;  %v3227_v57 = vadd.f32 %v2599_v62, %v83_v24 }
 0x3c7   :  { %v2966_v45 = vmul.f32 -1.442695, %v3226_v15 }
 0x3c8   :  { %v2965_v58 = vmul.f32 -1.442695, %v3227_v57  ;;  %v3136_v4 = vpop.f32.mrb[6].mxu0 }
 0x3c9   :  { %3418 = vpow2.f32 %v2966_v45  ;;  %v3228_v46 = vadd.f32 %v3136_v4, %v98_v42  ;;  %v2609_v60 = vpop.f32.mrb[7].mxu0 }
 0x3ca   :  { %3420 = vpow2.f32 %v2965_v58  ;;  %v3229_v21 = vadd.f32 %v2609_v60, %v93_v31 }
 0x3cb   :  { %v3411_v19 = vpop.eup %3410  ;;  %v2968_v8 = vmul.f32 -1.442695, %v3228_v46 }
 0x3cc   :  { %v3413_v56 = vpop.eup %3412  ;;  %v2643_v1 = vadd.f32 1.0, %v3411_v19  ;;  %v2967_v9 = vmul.f32 -1.442695, %v3229_v21 }
 0x3cd   :  { %v2642_v11 = vadd.f32 1.0, %v3413_v56  ;;  %3422 = vpow2.f32 %v2968_v8 }
 0x3ce   :  { %3424 = vrcp.f32 %v2643_v1 }
 0x3cf   :  { %v3415_v41 = vpop.eup %3414  ;;  %3426 = vrcp.f32 %v2642_v11 }
 0x3d0   :  { %v3417_v37 = vpop.eup %3416  ;;  %v2645_v20 = vadd.f32 1.0, %v3415_v41  ;;  %3428 = vpow2.f32 %v2967_v9 }
 0x3d1   :  { %v2644_v7 = vadd.f32 1.0, %v3417_v37 }
 0x3d2   :  { %3430 = vrcp.f32 %v2645_v20 }
 0x3d3   :  { %v3419_v16 = vpop.eup %3418  ;;  %3432 = vrcp.f32 %v2644_v7 }
 0x3d4   :  { %v3421_v5 = vpop.eup %3420  ;;  %v2647_v59 = vadd.f32 1.0, %v3419_v16 }
 0x3d5   :  { %v2646_v50 = vadd.f32 1.0, %v3421_v5 }
 0x3d6   :  { %3434 = vrcp.f32 %v2647_v59 }
 0x3d7   :  { %v3423_v27 = vpop.eup %3422  ;;  %3436 = vrcp.f32 %v2646_v50 }
 0x3d8   :  { %v3425_v6 = vpop.eup %3424  ;;  %v2649_v17 = vadd.f32 1.0, %v3423_v27 }
 0x3d9   :  { %v3427_v47 = vpop.eup %3426 }
 0x3da   :  { %v3429_v30 = vpop.eup %3428  ;;  %v3209_v14 = vpack.c.bf16 %v3425_v6, %v3427_v47  ;;  %3438 = vrcp.f32 %v2649_v17 }
 0x3db   :  { %v2648_v55 = vadd.f32 1.0, %v3429_v30 }
 0x3dc   :  { %v3431_v26 = vpop.eup %3430  ;;  %3210 = vmatpush3.bf16.msra.mxu1 %v3209_v14 }
 0x3dd   :  { %v3433_v39 = vpop.eup %3432  ;;  %3440 = vrcp.f32 %v2648_v55  ;;  %3211 = vmatprep.subr.bf16.mxu1 %v3501_v18 }
 0x3de   :  { %v3212_v28 = vpack.c.bf16 %v3431_v26, %v3433_v39 }
 0x3e0   :  { %v3435_v29 = vpop.eup %3434  ;;  %3213 = vmatpush3.bf16.msra.mxu1 %v3212_v28 }
 0x3e1   :  { %v3437_v32 = vpop.eup %3436  ;;  %3214 = vmatprep.subr.bf16.mxu1 %v3501_v18 }
 0x3e2   :  { %v3215_v43 = vpack.c.bf16 %v3435_v29, %v3437_v32 }
 0x3e4   :  { %3216 = vmatpush3.bf16.msra.mxu1 %v3215_v43  ;;  %v3439_v33 = vpop.eup %3438 }
 0x3e5   :  { %3217 = vmatprep.subr.bf16.mxu1 %v3501_v18 }
 0x3e7   :  { %v3441_v35 = vpop.eup %3440 }
 0x3e8   :  { %v3218_v12 = vpack.c.bf16 %v3439_v33, %v3441_v35 }
 0x3ea   :  { %3219 = vmatpush3.bf16.msra.mxu1 %v3218_v12 }
 0x3ed   :  { %3165 = vmatmul.mubr.msk.f32.vlgmr.msra.gmra.mrb[18].mxu1 %vm2747_vm9, %v2666_v52 }
 0x4c0   :  { %v2817_v53 = vpop.f32.mrb[18].mxu1 }
 0x4c1   :  { %v2818_v10 = vadd.f32 %v2817_v53, %v2743_v54  ;;  %v3166_v40 = vpop.f32.mrb[19].mxu1 }
 0x4c3   :  { %v2826_v63 = vadd.f32 %v2824_v2, %v2818_v10 }
 0x4c5   :  { %2828 = vst.msk [vmem:[#allocation5] sm:$0x7] %vm2827_vm3, %v2826_v63 }
 0x4c6   :  { %3475 = shalt.err (!%p3472_p12)
}
 0x4c7   :  { %s3476_s30 = scalar_lea.hbm %s5380_s2, 64 }
 0x4c8   :  { %p3477_p13 = scmp.ne.s32.totalorder %s5380_s2, %s3476_s30  ;;  %p3480_p0 = scmp.lt.u32.totalorder %s3476_s30, %s5380_s2 }
 0x4ca   :  { %p3482_p1 = pnand %p3480_p0, %p3477_p13 }
 0x4cc   :  { %3485 = shalt.err (!%p3482_p1)
}
 0x4cd   :  { %2838 = dma.vmem_to_hbm [thread:$0]  %s2836_s1, 64, %s5380_s2, [#allocation4]  }
 0x4ce   :  { %3488 = dma.done.wait [#allocation4], 64  }
 0x4cf   :  { %3489 = vsyncadd [#allocation4], 4294967232 }
 0x4d0   :  { %2842 = vsyncpa [#allocation3], 1 }
 0x4d1   :  { %2843 = vsyncpa [#allocation4], 1 }

</bundles_post_ra>
